<compile_context>
chip_gen: v6e
topology: v6e:2x2x1
jax: 0.10.0
libtpu: 0.0.40
codegen_flags: <defaults>
</compile_context>

<pallas_src>
import jax
import jax.numpy as jnp
from jax import lax
from jax.experimental import pallas as pl
from jax.experimental.pallas import tpu as pltpu

NEG_SLOPE = 0.01
BN_EPS = 1e-5


def _pick_row_tile(h_out, w_out):
    """Output rows per grid step: prefer 8-32 rows while keeping the flattened
    row tile (TH * w_out) a multiple of 128 lanes (unmasked stores)."""
    for t in (16, 8, 32, 4, 64, 2, 1):
        if h_out % t == 0 and (t * w_out) % 128 == 0:
            return t
    return h_out   # fall back to the whole image (block == full array dims)


def conv_transpose_layer(x_nchw, wt, bias, gamma, beta, *, stride, padding,
                         output_padding, kernel_size=3):
    """Forward pass of ConvTransposeLayer.

    x_nchw: (N, Cin, H, W) float32
    wt:     (Cin, Cout, K, K)  (PyTorch ConvTranspose2d weight layout)
    bias, gamma, beta: (Cout,)
    Returns (N, Cout, H_out, W_out) float32 (NCHW, like the PyTorch module).
    """
    n, cin, h, w = x_nchw.shape
    cin_w, cout, kh, kw = wt.shape
    assert cin_w == cin and kh == kernel_size and kw == kernel_size
    assert kh - 1 - padding >= 0, "padding > kernel_size - 1 not supported"

    h_out = (h - 1) * stride - 2 * padding + kh + output_padding
    w_out = (w - 1) * stride - 2 * padding + kw + output_padding

    # ---- XLA glue: zero-dilation + zero-padding (stays channel-first / NCHW) ----
    # TODO(synk): the zero-dilated copy is still materialized in HBM; a stride^2
    # sub-pixel decomposition would avoid DMA'ing ~(1 - 1/stride^2) zeros.
    x = x_nchw.astype(jnp.float32)
    hd = (h - 1) * stride + 1
    wd = (w - 1) * stride + 1
    xd = jnp.zeros((n, cin, hd, wd), jnp.float32).at[:, :, ::stride, ::stride].set(x)
    plo = kh - 1 - padding
    phi = kh - 1 - padding + output_padding
    xp = jnp.pad(xd, ((0, 0), (0, 0), (plo, phi), (plo, phi)))
    hp, wp = xp.shape[2], xp.shape[3]
    assert hp == h_out + kh - 1 and wp == w_out + kw - 1

    # flipped kernel, tap-major: w2[co, (dh*kw + dw)*cin + ci] = wt[ci, co, K-1-dh, K-1-dw]
    w2 = jnp.transpose(wt[:, :, ::-1, ::-1], (1, 2, 3, 0)) \
            .reshape(cout, kh * kw * cin).astype(jnp.float32)
    b2 = bias.reshape(cout, 1).astype(jnp.float32)

    th = _pick_row_tile(h_out, w_out)     # output rows per grid step
    ht = h_out // th                      # number of row tiles
    hw = h_out * w_out

    # ---------------- kernel 1: transposed conv + bias + partial BN stats --------
    def convt_kernel(x_ref, w_ref, b_ref, y_ref, sum_ref, ssq_ref, col_ref):
        # x_ref: (1, cin, hp, wp)   full dilated+padded image of one batch item
        # w_ref: (cout, kh*kw*cin); b_ref: (cout, 1)
        # y_ref: (1, cout, th*w_out) lane-dense output row tile (flattened H*W)
        # sum_ref/ssq_ref: (1, 1, cout, 1) per-(batch, row-tile) partial stats
        # col_ref: (kh*kw*cin, th*w_out) im2col scratch (VMEM)
        oh0 = pl.multiple_of(pl.program_id(1) * th, th)

        # explicit im2col into VMEM scratch (each padded input row loaded once)
        rows = [x_ref[0, :, oh0 + j, :] for j in range(th + kh - 1)]   # (cin, wp) each
        for r in range(th):
            for dh in range(kh):
                src = rows[r + dh]
                for dw in range(kw):
                    t = dh * kw + dw
                    col_ref[t * cin:(t + 1) * cin,
                            r * w_out:(r + 1) * w_out] = src[:, dw:dw + w_out]

        # one MXU matmul per grid step: (cout, kh*kw*cin) @ (kh*kw*cin, th*w_out)
        acc = jnp.dot(w_ref[...], col_ref[...],
                      preferred_element_type=jnp.float32) + b_ref[...]
        y_ref[...] = acc[None].astype(y_ref.dtype)

        # per-channel partial sums for BatchNorm (distinct block per step -> no races)
        sum_ref[...] = jnp.sum(acc, axis=1, keepdims=True)[None, None]
        ssq_ref[...] = jnp.sum(acc * acc, axis=1, keepdims=True)[None, None]

    y_flat, psum, pssq = pl.pallas_call(
        convt_kernel,
        grid_spec=pltpu.PrefetchScalarGridSpec(
            num_scalar_prefetch=0,
            grid=(n, ht),
            in_specs=[
                # TODO(synk): for production-sized images, row-tile the input with a
                # (th + kh - 1)-row halo (manual DMA) instead of one full image per item.
                pl.BlockSpec((1, cin, hp, wp), lambda b, i: (b, 0, 0, 0)),
                pl.BlockSpec((cout, kh * kw * cin), lambda b, i: (0, 0)),
                pl.BlockSpec((cout, 1), lambda b, i: (0, 0)),
            ],
            out_specs=[
                pl.BlockSpec((1, cout, th * w_out), lambda b, i: (b, 0, i)),
                pl.BlockSpec((1, 1, cout, 1), lambda b, i: (b, i, 0, 0)),
                pl.BlockSpec((1, 1, cout, 1), lambda b, i: (b, i, 0, 0)),
            ],
            scratch_shapes=[pltpu.VMEM((kh * kw * cin, th * w_out), jnp.float32)],
        ),
        out_shape=[
            jax.ShapeDtypeStruct((n, cout, hw), jnp.float32),
            jax.ShapeDtypeStruct((n, ht, cout, 1), jnp.float32),
            jax.ShapeDtypeStruct((n, ht, cout, 1), jnp.float32),
        ],
        compiler_params=pltpu.CompilerParams(
            dimension_semantics=("parallel", "parallel")),
    )(xp, w2, b2)

    # ---- tiny scalar glue: reduce partial stats, fold BN affine into scale/shift ----
    count = n * hw
    csum = jnp.sum(psum[..., 0], axis=(0, 1))                 # (cout,)
    cssq = jnp.sum(pssq[..., 0], axis=(0, 1))
    mean = csum / count
    # biased variance (training-mode BatchNorm). E[x^2]-mean^2 can cancel for
    # large-mean data; fine at f32 for this layer.
    var = cssq / count - mean * mean
    invstd = lax.rsqrt(var + BN_EPS)
    scale = (gamma.astype(jnp.float32) * invstd).reshape(cout, 1)
    shift = beta.astype(jnp.float32).reshape(cout, 1) - mean.reshape(cout, 1) * scale

    # ---------------- kernel 2: fused BatchNorm + LeakyReLU ----------------------
    def bn_lrelu_kernel(y_ref, scale_ref, shift_ref, o_ref):
        # y_ref/o_ref: (1, cout, hw) lane-dense; scale/shift: (cout, 1) per-sublane scalars
        z = y_ref[...] * scale_ref[...][None] + shift_ref[...][None]
        o_ref[...] = jnp.where(z >= 0, z, NEG_SLOPE * z)

    out_flat = pl.pallas_call(
        bn_lrelu_kernel,
        grid_spec=pltpu.PrefetchScalarGridSpec(
            num_scalar_prefetch=0,
            grid=(n,),
            in_specs=[
                pl.BlockSpec((1, cout, hw), lambda b: (b, 0, 0)),
                pl.BlockSpec((cout, 1), lambda b: (0, 0)),
                pl.BlockSpec((cout, 1), lambda b: (0, 0)),
            ],
            out_specs=pl.BlockSpec((1, cout, hw), lambda b: (b, 0, 0)),
        ),
        out_shape=jax.ShapeDtypeStruct((n, cout, hw), jnp.float32),
        compiler_params=pltpu.CompilerParams(dimension_semantics=("parallel",)),
    )(y_flat, scale, shift)

    return out_flat.reshape(n, cout, h_out, w_out)     # already NCHW; free reshape


if __name__ == "__main__":
    key = jax.random.PRNGKey(0)
    k1, k2, k3, k4, k5 = jax.random.split(key, 5)

    N, C_IN, H, W = 2, 4, 16, 16
    C_OUT, K, STRIDE, PAD = 8, 3, 2, 1
    OUT_PAD = PAD   # the module sets output_padding = padding

    # deterministic synthetic parameters (shapes per the PyTorch module __init__)
    x = jax.random.normal(k1, (N, C_IN, H, W), jnp.float32)
    wt = jax.random.normal(k2, (C_IN, C_OUT, K, K), jnp.float32) * 0.1
    bias = jax.random.normal(k3, (C_OUT,), jnp.float32) * 0.1
    gamma = 1.0 + 0.1 * jax.random.normal(k4, (C_OUT,), jnp.float32)
    beta = 0.1 * jax.random.normal(k5, (C_OUT,), jnp.float32)

    out = conv_transpose_layer(x, wt, bias, gamma, beta, stride=STRIDE,
                               padding=PAD, output_padding=OUT_PAD, kernel_size=K)
    out = jax.block_until_ready(out)
    assert out.shape == (N, C_OUT, 32, 32), out.shape

    # ---- independent reference path (lax.conv_general_dilated + BN + LeakyReLU) ----
    plo = K - 1 - PAD
    phi = K - 1 - PAD + OUT_PAD
    x_nhwc = jnp.transpose(x, (0, 2, 3, 1))
    w_hwio = jnp.transpose(wt[:, :, ::-1, ::-1], (2, 3, 0, 1))
    ref = lax.conv_general_dilated(
        x_nhwc, w_hwio, window_strides=(1, 1),
        padding=((plo, phi), (plo, phi)), lhs_dilation=(STRIDE, STRIDE),
        dimension_numbers=("NHWC", "HWIO", "NHWC")) + bias.reshape(1, 1, 1, -1)
    mean = ref.mean(axis=(0, 1, 2))
    var = ref.var(axis=(0, 1, 2))
    refn = (ref - mean) / jnp.sqrt(var + BN_EPS) * gamma + beta
    refo = jnp.where(refn > 0, refn, NEG_SLOPE * refn)
    refo = jnp.transpose(refo, (0, 3, 1, 2))

    err = float(jnp.max(jnp.abs(out - refo)))
    assert jnp.allclose(out, refo, atol=2e-3, rtol=2e-3), err

    print("KERNEL_OK")
</pallas_src>

<mosaic_0001>
module attributes {stable_mosaic.version = 11 : i64} {
  func.func @convt_kernel(%arg0: i32, %arg1: i32, %arg2: memref<1x4x34x34xf32, #tpu.memory_space<vmem>>, %arg3: memref<8x36xf32, #tpu.memory_space<vmem>>, %arg4: memref<8x1xf32, #tpu.memory_space<vmem>>, %arg5: memref<1x8x512xf32, #tpu.memory_space<vmem>>, %arg6: memref<1x1x8x1xf32, #tpu.memory_space<vmem>>, %arg7: memref<1x1x8x1xf32, #tpu.memory_space<vmem>>, %arg8: memref<36x512xf32, #tpu.memory_space<vmem>>) attributes {dimension_semantics = [#tpu.dimension_semantics<parallel>, #tpu.dimension_semantics<parallel>], iteration_bounds = array<i64: 2, 2>, scalar_prefetch = 0 : i64, scratch_operands = 1 : i64, tpu.core_type = #tpu.core_type<tc>, window_params = [{transform_indices = @transform_0, window_bounds = array<i64: 1, 4, 34, 34>}, {pipeline_mode = #tpu.pipeline_mode<synchronous>, transform_indices = @transform_1, window_bounds = array<i64: 8, 36>}, {pipeline_mode = #tpu.pipeline_mode<synchronous>, transform_indices = @transform_2, window_bounds = array<i64: 8, 1>}, {transform_indices = @transform_3, window_bounds = array<i64: 1, 8, 512>}, {transform_indices = @transform_4, window_bounds = array<i64: 1, 1, 8, 1>}, {transform_indices = @transform_5, window_bounds = array<i64: 1, 1, 8, 1>}]} {
    %c16_i32 = arith.constant 16 : i32
    %0 = arith.muli %arg1, %c16_i32 : i32
    %1 = tpu.assume_multiple %0, 16 : i32
    %c0_i32 = arith.constant 0 : i32
    %2 = arith.addi %1, %c0_i32 : i32
    %c0 = arith.constant 0 : index
    %c0_0 = arith.constant 0 : index
    %3 = arith.index_cast %2 : i32 to index
    %c0_1 = arith.constant 0 : index
    %4 = vector.load %arg2[%c0, %c0_0, %3, %c0_1] : memref<1x4x34x34xf32, #tpu.memory_space<vmem>>, vector<1x4x1x34xf32>
    %5 = vector.shape_cast %4 : vector<1x4x1x34xf32> to vector<4x34xf32>
    %c1_i32 = arith.constant 1 : i32
    %6 = arith.addi %1, %c1_i32 : i32
    %c0_2 = arith.constant 0 : index
    %c0_3 = arith.constant 0 : index
    %7 = arith.index_cast %6 : i32 to index
    %c0_4 = arith.constant 0 : index
    %8 = vector.load %arg2[%c0_2, %c0_3, %7, %c0_4] : memref<1x4x34x34xf32, #tpu.memory_space<vmem>>, vector<1x4x1x34xf32>
    %9 = vector.shape_cast %8 : vector<1x4x1x34xf32> to vector<4x34xf32>
    %c2_i32 = arith.constant 2 : i32
    %10 = arith.addi %1, %c2_i32 : i32
    %c0_5 = arith.constant 0 : index
    %c0_6 = arith.constant 0 : index
    %11 = arith.index_cast %10 : i32 to index
    %c0_7 = arith.constant 0 : index
    %12 = vector.load %arg2[%c0_5, %c0_6, %11, %c0_7] : memref<1x4x34x34xf32, #tpu.memory_space<vmem>>, vector<1x4x1x34xf32>
    %13 = vector.shape_cast %12 : vector<1x4x1x34xf32> to vector<4x34xf32>
    %c3_i32 = arith.constant 3 : i32
    %14 = arith.addi %1, %c3_i32 : i32
    %c0_8 = arith.constant 0 : index
    %c0_9 = arith.constant 0 : index
    %15 = arith.index_cast %14 : i32 to index
    %c0_10 = arith.constant 0 : index
    %16 = vector.load %arg2[%c0_8, %c0_9, %15, %c0_10] : memref<1x4x34x34xf32, #tpu.memory_space<vmem>>, vector<1x4x1x34xf32>
    %17 = vector.shape_cast %16 : vector<1x4x1x34xf32> to vector<4x34xf32>
    %c4_i32 = arith.constant 4 : i32
    %18 = arith.addi %1, %c4_i32 : i32
    %c0_11 = arith.constant 0 : index
    %c0_12 = arith.constant 0 : index
    %19 = arith.index_cast %18 : i32 to index
    %c0_13 = arith.constant 0 : index
    %20 = vector.load %arg2[%c0_11, %c0_12, %19, %c0_13] : memref<1x4x34x34xf32, #tpu.memory_space<vmem>>, vector<1x4x1x34xf32>
    %21 = vector.shape_cast %20 : vector<1x4x1x34xf32> to vector<4x34xf32>
    %c5_i32 = arith.constant 5 : i32
    %22 = arith.addi %1, %c5_i32 : i32
    %c0_14 = arith.constant 0 : index
    %c0_15 = arith.constant 0 : index
    %23 = arith.index_cast %22 : i32 to index
    %c0_16 = arith.constant 0 : index
    %24 = vector.load %arg2[%c0_14, %c0_15, %23, %c0_16] : memref<1x4x34x34xf32, #tpu.memory_space<vmem>>, vector<1x4x1x34xf32>
    %25 = vector.shape_cast %24 : vector<1x4x1x34xf32> to vector<4x34xf32>
    %c6_i32 = arith.constant 6 : i32
    %26 = arith.addi %1, %c6_i32 : i32
    %c0_17 = arith.constant 0 : index
    %c0_18 = arith.constant 0 : index
    %27 = arith.index_cast %26 : i32 to index
    %c0_19 = arith.constant 0 : index
    %28 = vector.load %arg2[%c0_17, %c0_18, %27, %c0_19] : memref<1x4x34x34xf32, #tpu.memory_space<vmem>>, vector<1x4x1x34xf32>
    %29 = vector.shape_cast %28 : vector<1x4x1x34xf32> to vector<4x34xf32>
    %c7_i32 = arith.constant 7 : i32
    %30 = arith.addi %1, %c7_i32 : i32
    %c0_20 = arith.constant 0 : index
    %c0_21 = arith.constant 0 : index
    %31 = arith.index_cast %30 : i32 to index
    %c0_22 = arith.constant 0 : index
    %32 = vector.load %arg2[%c0_20, %c0_21, %31, %c0_22] : memref<1x4x34x34xf32, #tpu.memory_space<vmem>>, vector<1x4x1x34xf32>
    %33 = vector.shape_cast %32 : vector<1x4x1x34xf32> to vector<4x34xf32>
    %c8_i32 = arith.constant 8 : i32
    %34 = arith.addi %1, %c8_i32 : i32
    %c0_23 = arith.constant 0 : index
    %c0_24 = arith.constant 0 : index
    %35 = arith.index_cast %34 : i32 to index
    %c0_25 = arith.constant 0 : index
    %36 = vector.load %arg2[%c0_23, %c0_24, %35, %c0_25] : memref<1x4x34x34xf32, #tpu.memory_space<vmem>>, vector<1x4x1x34xf32>
    %37 = vector.shape_cast %36 : vector<1x4x1x34xf32> to vector<4x34xf32>
    %c9_i32 = arith.constant 9 : i32
    %38 = arith.addi %1, %c9_i32 : i32
    %c0_26 = arith.constant 0 : index
    %c0_27 = arith.constant 0 : index
    %39 = arith.index_cast %38 : i32 to index
    %c0_28 = arith.constant 0 : index
    %40 = vector.load %arg2[%c0_26, %c0_27, %39, %c0_28] : memref<1x4x34x34xf32, #tpu.memory_space<vmem>>, vector<1x4x1x34xf32>
    %41 = vector.shape_cast %40 : vector<1x4x1x34xf32> to vector<4x34xf32>
    %c10_i32 = arith.constant 10 : i32
    %42 = arith.addi %1, %c10_i32 : i32
    %c0_29 = arith.constant 0 : index
    %c0_30 = arith.constant 0 : index
    %43 = arith.index_cast %42 : i32 to index
    %c0_31 = arith.constant 0 : index
    %44 = vector.load %arg2[%c0_29, %c0_30, %43, %c0_31] : memref<1x4x34x34xf32, #tpu.memory_space<vmem>>, vector<1x4x1x34xf32>
    %45 = vector.shape_cast %44 : vector<1x4x1x34xf32> to vector<4x34xf32>
    %c11_i32 = arith.constant 11 : i32
    %46 = arith.addi %1, %c11_i32 : i32
    %c0_32 = arith.constant 0 : index
    %c0_33 = arith.constant 0 : index
    %47 = arith.index_cast %46 : i32 to index
    %c0_34 = arith.constant 0 : index
    %48 = vector.load %arg2[%c0_32, %c0_33, %47, %c0_34] : memref<1x4x34x34xf32, #tpu.memory_space<vmem>>, vector<1x4x1x34xf32>
    %49 = vector.shape_cast %48 : vector<1x4x1x34xf32> to vector<4x34xf32>
    %c12_i32 = arith.constant 12 : i32
    %50 = arith.addi %1, %c12_i32 : i32
    %c0_35 = arith.constant 0 : index
    %c0_36 = arith.constant 0 : index
    %51 = arith.index_cast %50 : i32 to index
    %c0_37 = arith.constant 0 : index
    %52 = vector.load %arg2[%c0_35, %c0_36, %51, %c0_37] : memref<1x4x34x34xf32, #tpu.memory_space<vmem>>, vector<1x4x1x34xf32>
    %53 = vector.shape_cast %52 : vector<1x4x1x34xf32> to vector<4x34xf32>
    %c13_i32 = arith.constant 13 : i32
    %54 = arith.addi %1, %c13_i32 : i32
    %c0_38 = arith.constant 0 : index
    %c0_39 = arith.constant 0 : index
    %55 = arith.index_cast %54 : i32 to index
    %c0_40 = arith.constant 0 : index
    %56 = vector.load %arg2[%c0_38, %c0_39, %55, %c0_40] : memref<1x4x34x34xf32, #tpu.memory_space<vmem>>, vector<1x4x1x34xf32>
    %57 = vector.shape_cast %56 : vector<1x4x1x34xf32> to vector<4x34xf32>
    %c14_i32 = arith.constant 14 : i32
    %58 = arith.addi %1, %c14_i32 : i32
    %c0_41 = arith.constant 0 : index
    %c0_42 = arith.constant 0 : index
    %59 = arith.index_cast %58 : i32 to index
    %c0_43 = arith.constant 0 : index
    %60 = vector.load %arg2[%c0_41, %c0_42, %59, %c0_43] : memref<1x4x34x34xf32, #tpu.memory_space<vmem>>, vector<1x4x1x34xf32>
    %61 = vector.shape_cast %60 : vector<1x4x1x34xf32> to vector<4x34xf32>
    %c15_i32 = arith.constant 15 : i32
    %62 = arith.addi %1, %c15_i32 : i32
    %c0_44 = arith.constant 0 : index
    %c0_45 = arith.constant 0 : index
    %63 = arith.index_cast %62 : i32 to index
    %c0_46 = arith.constant 0 : index
    %64 = vector.load %arg2[%c0_44, %c0_45, %63, %c0_46] : memref<1x4x34x34xf32, #tpu.memory_space<vmem>>, vector<1x4x1x34xf32>
    %65 = vector.shape_cast %64 : vector<1x4x1x34xf32> to vector<4x34xf32>
    %c16_i32_47 = arith.constant 16 : i32
    %66 = arith.addi %1, %c16_i32_47 : i32
    %c0_48 = arith.constant 0 : index
    %c0_49 = arith.constant 0 : index
    %67 = arith.index_cast %66 : i32 to index
    %c0_50 = arith.constant 0 : index
    %68 = vector.load %arg2[%c0_48, %c0_49, %67, %c0_50] : memref<1x4x34x34xf32, #tpu.memory_space<vmem>>, vector<1x4x1x34xf32>
    %69 = vector.shape_cast %68 : vector<1x4x1x34xf32> to vector<4x34xf32>
    %c17_i32 = arith.constant 17 : i32
    %70 = arith.addi %1, %c17_i32 : i32
    %c0_51 = arith.constant 0 : index
    %c0_52 = arith.constant 0 : index
    %71 = arith.index_cast %70 : i32 to index
    %c0_53 = arith.constant 0 : index
    %72 = vector.load %arg2[%c0_51, %c0_52, %71, %c0_53] : memref<1x4x34x34xf32, #tpu.memory_space<vmem>>, vector<1x4x1x34xf32>
    %73 = vector.shape_cast %72 : vector<1x4x1x34xf32> to vector<4x34xf32>
    %74 = vector.extract_strided_slice %5 {offsets = [0, 0], sizes = [4, 32], strides = [1, 1]} : vector<4x34xf32> to vector<4x32xf32>
    %c0_54 = arith.constant 0 : index
    %c0_55 = arith.constant 0 : index
    %75 = vector.load %arg8[%c0_54, %c0_55] : memref<36x512xf32, #tpu.memory_space<vmem>>, vector<4x32xf32>
    tpu.vector_store %arg8[%c0_54, %c0_55], %74 {strides = array<i32>} : memref<36x512xf32, #tpu.memory_space<vmem>>, vector<4x32xf32>,
    %76 = vector.extract_strided_slice %5 {offsets = [0, 1], sizes = [4, 32], strides = [1, 1]} : vector<4x34xf32> to vector<4x32xf32>
    %c4 = arith.constant 4 : index
    %c0_56 = arith.constant 0 : index
    %77 = vector.load %arg8[%c4, %c0_56] : memref<36x512xf32, #tpu.memory_space<vmem>>, vector<4x32xf32>
    tpu.vector_store %arg8[%c4, %c0_56], %76 {strides = array<i32>} : memref<36x512xf32, #tpu.memory_space<vmem>>, vector<4x32xf32>,
    %78 = vector.extract_strided_slice %5 {offsets = [0, 2], sizes = [4, 32], strides = [1, 1]} : vector<4x34xf32> to vector<4x32xf32>
    %c8 = arith.constant 8 : index
    %c0_57 = arith.constant 0 : index
    %79 = vector.load %arg8[%c8, %c0_57] : memref<36x512xf32, #tpu.memory_space<vmem>>, vector<4x32xf32>
    tpu.vector_store %arg8[%c8, %c0_57], %78 {strides = array<i32>} : memref<36x512xf32, #tpu.memory_space<vmem>>, vector<4x32xf32>,
    %80 = vector.extract_strided_slice %9 {offsets = [0, 0], sizes = [4, 32], strides = [1, 1]} : vector<4x34xf32> to vector<4x32xf32>
    %c12 = arith.constant 12 : index
    %c0_58 = arith.constant 0 : index
    %81 = vector.load %arg8[%c12, %c0_58] : memref<36x512xf32, #tpu.memory_space<vmem>>, vector<4x32xf32>
    tpu.vector_store %arg8[%c12, %c0_58], %80 {strides = array<i32>} : memref<36x512xf32, #tpu.memory_space<vmem>>, vector<4x32xf32>,
    %82 = vector.extract_strided_slice %9 {offsets = [0, 1], sizes = [4, 32], strides = [1, 1]} : vector<4x34xf32> to vector<4x32xf32>
    %c16 = arith.constant 16 : index
    %c0_59 = arith.constant 0 : index
    %83 = vector.load %arg8[%c16, %c0_59] : memref<36x512xf32, #tpu.memory_space<vmem>>, vector<4x32xf32>
    tpu.vector_store %arg8[%c16, %c0_59], %82 {strides = array<i32>} : memref<36x512xf32, #tpu.memory_space<vmem>>, vector<4x32xf32>,
    %84 = vector.extract_strided_slice %9 {offsets = [0, 2], sizes = [4, 32], strides = [1, 1]} : vector<4x34xf32> to vector<4x32xf32>
    %c20 = arith.constant 20 : index
    %c0_60 = arith.constant 0 : index
    %85 = vector.load %arg8[%c20, %c0_60] : memref<36x512xf32, #tpu.memory_space<vmem>>, vector<4x32xf32>
    tpu.vector_store %arg8[%c20, %c0_60], %84 {strides = array<i32>} : memref<36x512xf32, #tpu.memory_space<vmem>>, vector<4x32xf32>,
    %86 = vector.extract_strided_slice %13 {offsets = [0, 0], sizes = [4, 32], strides = [1, 1]} : vector<4x34xf32> to vector<4x32xf32>
    %c24 = arith.constant 24 : index
    %c0_61 = arith.constant 0 : index
    %87 = vector.load %arg8[%c24, %c0_61] : memref<36x512xf32, #tpu.memory_space<vmem>>, vector<4x32xf32>
    tpu.vector_store %arg8[%c24, %c0_61], %86 {strides = array<i32>} : memref<36x512xf32, #tpu.memory_space<vmem>>, vector<4x32xf32>,
    %88 = vector.extract_strided_slice %13 {offsets = [0, 1], sizes = [4, 32], strides = [1, 1]} : vector<4x34xf32> to vector<4x32xf32>
    %c28 = arith.constant 28 : index
    %c0_62 = arith.constant 0 : index
    %89 = vector.load %arg8[%c28, %c0_62] : memref<36x512xf32, #tpu.memory_space<vmem>>, vector<4x32xf32>
    tpu.vector_store %arg8[%c28, %c0_62], %88 {strides = array<i32>} : memref<36x512xf32, #tpu.memory_space<vmem>>, vector<4x32xf32>,
    %90 = vector.extract_strided_slice %13 {offsets = [0, 2], sizes = [4, 32], strides = [1, 1]} : vector<4x34xf32> to vector<4x32xf32>
    %c32 = arith.constant 32 : index
    %c0_63 = arith.constant 0 : index
    %91 = vector.load %arg8[%c32, %c0_63] : memref<36x512xf32, #tpu.memory_space<vmem>>, vector<4x32xf32>
    tpu.vector_store %arg8[%c32, %c0_63], %90 {strides = array<i32>} : memref<36x512xf32, #tpu.memory_space<vmem>>, vector<4x32xf32>,
    %92 = vector.extract_strided_slice %9 {offsets = [0, 0], sizes = [4, 32], strides = [1, 1]} : vector<4x34xf32> to vector<4x32xf32>
    %c0_64 = arith.constant 0 : index
    %c32_65 = arith.constant 32 : index
    %93 = vector.load %arg8[%c0_64, %c32_65] : memref<36x512xf32, #tpu.memory_space<vmem>>, vector<4x32xf32>
    tpu.vector_store %arg8[%c0_64, %c32_65], %92 {strides = array<i32>} : memref<36x512xf32, #tpu.memory_space<vmem>>, vector<4x32xf32>,
    %94 = vector.extract_strided_slice %9 {offsets = [0, 1], sizes = [4, 32], strides = [1, 1]} : vector<4x34xf32> to vector<4x32xf32>
    %c4_66 = arith.constant 4 : index
    %c32_67 = arith.constant 32 : index
    %95 = vector.load %arg8[%c4_66, %c32_67] : memref<36x512xf32, #tpu.memory_space<vmem>>, vector<4x32xf32>
    tpu.vector_store %arg8[%c4_66, %c32_67], %94 {strides = array<i32>} : memref<36x512xf32, #tpu.memory_space<vmem>>, vector<4x32xf32>,
    %96 = vector.extract_strided_slice %9 {offsets = [0, 2], sizes = [4, 32], strides = [1, 1]} : vector<4x34xf32> to vector<4x32xf32>
    %c8_68 = arith.constant 8 : index
    %c32_69 = arith.constant 32 : index
    %97 = vector.load %arg8[%c8_68, %c32_69] : memref<36x512xf32, #tpu.memory_space<vmem>>, vector<4x32xf32>
    tpu.vector_store %arg8[%c8_68, %c32_69], %96 {strides = array<i32>} : memref<36x512xf32, #tpu.memory_space<vmem>>, vector<4x32xf32>,
    %98 = vector.extract_strided_slice %13 {offsets = [0, 0], sizes = [4, 32], strides = [1, 1]} : vector<4x34xf32> to vector<4x32xf32>
    %c12_70 = arith.constant 12 : index
    %c32_71 = arith.constant 32 : index
    %99 = vector.load %arg8[%c12_70, %c32_71] : memref<36x512xf32, #tpu.memory_space<vmem>>, vector<4x32xf32>
    tpu.vector_store %arg8[%c12_70, %c32_71], %98 {strides = array<i32>} : memref<36x512xf32, #tpu.memory_space<vmem>>, vector<4x32xf32>,
    %100 = vector.extract_strided_slice %13 {offsets = [0, 1], sizes = [4, 32], strides = [1, 1]} : vector<4x34xf32> to vector<4x32xf32>
    %c16_72 = arith.constant 16 : index
    %c32_73 = arith.constant 32 : index
    %101 = vector.load %arg8[%c16_72, %c32_73] : memref<36x512xf32, #tpu.memory_space<vmem>>, vector<4x32xf32>
    tpu.vector_store %arg8[%c16_72, %c32_73], %100 {strides = array<i32>} : memref<36x512xf32, #tpu.memory_space<vmem>>, vector<4x32xf32>,
    %102 = vector.extract_strided_slice %13 {offsets = [0, 2], sizes = [4, 32], strides = [1, 1]} : vector<4x34xf32> to vector<4x32xf32>
    %c20_74 = arith.constant 20 : index
    %c32_75 = arith.constant 32 : index
    %103 = vector.load %arg8[%c20_74, %c32_75] : memref<36x512xf32, #tpu.memory_space<vmem>>, vector<4x32xf32>
    tpu.vector_store %arg8[%c20_74, %c32_75], %102 {strides = array<i32>} : memref<36x512xf32, #tpu.memory_space<vmem>>, vector<4x32xf32>,
    %104 = vector.extract_strided_slice %17 {offsets = [0, 0], sizes = [4, 32], strides = [1, 1]} : vector<4x34xf32> to vector<4x32xf32>
    %c24_76 = arith.constant 24 : index
    %c32_77 = arith.constant 32 : index
    %105 = vector.load %arg8[%c24_76, %c32_77] : memref<36x512xf32, #tpu.memory_space<vmem>>, vector<4x32xf32>
    tpu.vector_store %arg8[%c24_76, %c32_77], %104 {strides = array<i32>} : memref<36x512xf32, #tpu.memory_space<vmem>>, vector<4x32xf32>,
    %106 = vector.extract_strided_slice %17 {offsets = [0, 1], sizes = [4, 32], strides = [1, 1]} : vector<4x34xf32> to vector<4x32xf32>
    %c28_78 = arith.constant 28 : index
    %c32_79 = arith.constant 32 : index
    %107 = vector.load %arg8[%c28_78, %c32_79] : memref<36x512xf32, #tpu.memory_space<vmem>>, vector<4x32xf32>
    tpu.vector_store %arg8[%c28_78, %c32_79], %106 {strides = array<i32>} : memref<36x512xf32, #tpu.memory_space<vmem>>, vector<4x32xf32>,
    %108 = vector.extract_strided_slice %17 {offsets = [0, 2], sizes = [4, 32], strides = [1, 1]} : vector<4x34xf32> to vector<4x32xf32>
    %c32_80 = arith.constant 32 : index
    %c32_81 = arith.constant 32 : index
    %109 = vector.load %arg8[%c32_80, %c32_81] : memref<36x512xf32, #tpu.memory_space<vmem>>, vector<4x32xf32>
    tpu.vector_store %arg8[%c32_80, %c32_81], %108 {strides = array<i32>} : memref<36x512xf32, #tpu.memory_space<vmem>>, vector<4x32xf32>,
    %110 = vector.extract_strided_slice %13 {offsets = [0, 0], sizes = [4, 32], strides = [1, 1]} : vector<4x34xf32> to vector<4x32xf32>
    %c0_82 = arith.constant 0 : index
    %c64 = arith.constant 64 : index
    %111 = vector.load %arg8[%c0_82, %c64] : memref<36x512xf32, #tpu.memory_space<vmem>>, vector<4x32xf32>
    tpu.vector_store %arg8[%c0_82, %c64], %110 {strides = array<i32>} : memref<36x512xf32, #tpu.memory_space<vmem>>, vector<4x32xf32>,
    %112 = vector.extract_strided_slice %13 {offsets = [0, 1], sizes = [4, 32], strides = [1, 1]} : vector<4x34xf32> to vector<4x32xf32>
    %c4_83 = arith.constant 4 : index
    %c64_84 = arith.constant 64 : index
    %113 = vector.load %arg8[%c4_83, %c64_84] : memref<36x512xf32, #tpu.memory_space<vmem>>, vector<4x32xf32>
    tpu.vector_store %arg8[%c4_83, %c64_84], %112 {strides = array<i32>} : memref<36x512xf32, #tpu.memory_space<vmem>>, vector<4x32xf32>,
    %114 = vector.extract_strided_slice %13 {offsets = [0, 2], sizes = [4, 32], strides = [1, 1]} : vector<4x34xf32> to vector<4x32xf32>
    %c8_85 = arith.constant 8 : index
    %c64_86 = arith.constant 64 : index
    %115 = vector.load %arg8[%c8_85, %c64_86] : memref<36x512xf32, #tpu.memory_space<vmem>>, vector<4x32xf32>
    tpu.vector_store %arg8[%c8_85, %c64_86], %114 {strides = array<i32>} : memref<36x512xf32, #tpu.memory_space<vmem>>, vector<4x32xf32>,
    %116 = vector.extract_strided_slice %17 {offsets = [0, 0], sizes = [4, 32], strides = [1, 1]} : vector<4x34xf32> to vector<4x32xf32>
    %c12_87 = arith.constant 12 : index
    %c64_88 = arith.constant 64 : index
    %117 = vector.load %arg8[%c12_87, %c64_88] : memref<36x512xf32, #tpu.memory_space<vmem>>, vector<4x32xf32>
    tpu.vector_store %arg8[%c12_87, %c64_88], %116 {strides = array<i32>} : memref<36x512xf32, #tpu.memory_space<vmem>>, vector<4x32xf32>,
    %118 = vector.extract_strided_slice %17 {offsets = [0, 1], sizes = [4, 32], strides = [1, 1]} : vector<4x34xf32> to vector<4x32xf32>
    %c16_89 = arith.constant 16 : index
    %c64_90 = arith.constant 64 : index
    %119 = vector.load %arg8[%c16_89, %c64_90] : memref<36x512xf32, #tpu.memory_space<vmem>>, vector<4x32xf32>
    tpu.vector_store %arg8[%c16_89, %c64_90], %118 {strides = array<i32>} : memref<36x512xf32, #tpu.memory_space<vmem>>, vector<4x32xf32>,
    %120 = vector.extract_strided_slice %17 {offsets = [0, 2], sizes = [4, 32], strides = [1, 1]} : vector<4x34xf32> to vector<4x32xf32>
    %c20_91 = arith.constant 20 : index
    %c64_92 = arith.constant 64 : index
    %121 = vector.load %arg8[%c20_91, %c64_92] : memref<36x512xf32, #tpu.memory_space<vmem>>, vector<4x32xf32>
    tpu.vector_store %arg8[%c20_91, %c64_92], %120 {strides = array<i32>} : memref<36x512xf32, #tpu.memory_space<vmem>>, vector<4x32xf32>,
    %122 = vector.extract_strided_slice %21 {offsets = [0, 0], sizes = [4, 32], strides = [1, 1]} : vector<4x34xf32> to vector<4x32xf32>
    %c24_93 = arith.constant 24 : index
    %c64_94 = arith.constant 64 : index
    %123 = vector.load %arg8[%c24_93, %c64_94] : memref<36x512xf32, #tpu.memory_space<vmem>>, vector<4x32xf32>
    tpu.vector_store %arg8[%c24_93, %c64_94], %122 {strides = array<i32>} : memref<36x512xf32, #tpu.memory_space<vmem>>, vector<4x32xf32>,
    %124 = vector.extract_strided_slice %21 {offsets = [0, 1], sizes = [4, 32], strides = [1, 1]} : vector<4x34xf32> to vector<4x32xf32>
    %c28_95 = arith.constant 28 : index
    %c64_96 = arith.constant 64 : index
    %125 = vector.load %arg8[%c28_95, %c64_96] : memref<36x512xf32, #tpu.memory_space<vmem>>, vector<4x32xf32>
    tpu.vector_store %arg8[%c28_95, %c64_96], %124 {strides = array<i32>} : memref<36x512xf32, #tpu.memory_space<vmem>>, vector<4x32xf32>,
    %126 = vector.extract_strided_slice %21 {offsets = [0, 2], sizes = [4, 32], strides = [1, 1]} : vector<4x34xf32> to vector<4x32xf32>
    %c32_97 = arith.constant 32 : index
    %c64_98 = arith.constant 64 : index
    %127 = vector.load %arg8[%c32_97, %c64_98] : memref<36x512xf32, #tpu.memory_space<vmem>>, vector<4x32xf32>
    tpu.vector_store %arg8[%c32_97, %c64_98], %126 {strides = array<i32>} : memref<36x512xf32, #tpu.memory_space<vmem>>, vector<4x32xf32>,
    %128 = vector.extract_strided_slice %17 {offsets = [0, 0], sizes = [4, 32], strides = [1, 1]} : vector<4x34xf32> to vector<4x32xf32>
    %c0_99 = arith.constant 0 : index
    %c96 = arith.constant 96 : index
    %129 = vector.load %arg8[%c0_99, %c96] : memref<36x512xf32, #tpu.memory_space<vmem>>, vector<4x32xf32>
    tpu.vector_store %arg8[%c0_99, %c96], %128 {strides = array<i32>} : memref<36x512xf32, #tpu.memory_space<vmem>>, vector<4x32xf32>,
    %130 = vector.extract_strided_slice %17 {offsets = [0, 1], sizes = [4, 32], strides = [1, 1]} : vector<4x34xf32> to vector<4x32xf32>
    %c4_100 = arith.constant 4 : index
    %c96_101 = arith.constant 96 : index
    %131 = vector.load %arg8[%c4_100, %c96_101] : memref<36x512xf32, #tpu.memory_space<vmem>>, vector<4x32xf32>
    tpu.vector_store %arg8[%c4_100, %c96_101], %130 {strides = array<i32>} : memref<36x512xf32, #tpu.memory_space<vmem>>, vector<4x32xf32>,
    %132 = vector.extract_strided_slice %17 {offsets = [0, 2], sizes = [4, 32], strides = [1, 1]} : vector<4x34xf32> to vector<4x32xf32>
    %c8_102 = arith.constant 8 : index
    %c96_103 = arith.constant 96 : index
    %133 = vector.load %arg8[%c8_102, %c96_103] : memref<36x512xf32, #tpu.memory_space<vmem>>, vector<4x32xf32>
    tpu.vector_store %arg8[%c8_102, %c96_103], %132 {strides = array<i32>} : memref<36x512xf32, #tpu.memory_space<vmem>>, vector<4x32xf32>,
    %134 = vector.extract_strided_slice %21 {offsets = [0, 0], sizes = [4, 32], strides = [1, 1]} : vector<4x34xf32> to vector<4x32xf32>
    %c12_104 = arith.constant 12 : index
    %c96_105 = arith.constant 96 : index
    %135 = vector.load %arg8[%c12_104, %c96_105] : memref<36x512xf32, #tpu.memory_space<vmem>>, vector<4x32xf32>
    tpu.vector_store %arg8[%c12_104, %c96_105], %134 {strides = array<i32>} : memref<36x512xf32, #tpu.memory_space<vmem>>, vector<4x32xf32>,
    %136 = vector.extract_strided_slice %21 {offsets = [0, 1], sizes = [4, 32], strides = [1, 1]} : vector<4x34xf32> to vector<4x32xf32>
    %c16_106 = arith.constant 16 : index
    %c96_107 = arith.constant 96 : index
    %137 = vector.load %arg8[%c16_106, %c96_107] : memref<36x512xf32, #tpu.memory_space<vmem>>, vector<4x32xf32>
    tpu.vector_store %arg8[%c16_106, %c96_107], %136 {strides = array<i32>} : memref<36x512xf32, #tpu.memory_space<vmem>>, vector<4x32xf32>,
    %138 = vector.extract_strided_slice %21 {offsets = [0, 2], sizes = [4, 32], strides = [1, 1]} : vector<4x34xf32> to vector<4x32xf32>
    %c20_108 = arith.constant 20 : index
    %c96_109 = arith.constant 96 : index
    %139 = vector.load %arg8[%c20_108, %c96_109] : memref<36x512xf32, #tpu.memory_space<vmem>>, vector<4x32xf32>
    tpu.vector_store %arg8[%c20_108, %c96_109], %138 {strides = array<i32>} : memref<36x512xf32, #tpu.memory_space<vmem>>, vector<4x32xf32>,
    %140 = vector.extract_strided_slice %25 {offsets = [0, 0], sizes = [4, 32], strides = [1, 1]} : vector<4x34xf32> to vector<4x32xf32>
    %c24_110 = arith.constant 24 : index
    %c96_111 = arith.constant 96 : index
    %141 = vector.load %arg8[%c24_110, %c96_111] : memref<36x512xf32, #tpu.memory_space<vmem>>, vector<4x32xf32>
    tpu.vector_store %arg8[%c24_110, %c96_111], %140 {strides = array<i32>} : memref<36x512xf32, #tpu.memory_space<vmem>>, vector<4x32xf32>,
    %142 = vector.extract_strided_slice %25 {offsets = [0, 1], sizes = [4, 32], strides = [1, 1]} : vector<4x34xf32> to vector<4x32xf32>
    %c28_112 = arith.constant 28 : index
    %c96_113 = arith.constant 96 : index
    %143 = vector.load %arg8[%c28_112, %c96_113] : memref<36x512xf32, #tpu.memory_space<vmem>>, vector<4x32xf32>
    tpu.vector_store %arg8[%c28_112, %c96_113], %142 {strides = array<i32>} : memref<36x512xf32, #tpu.memory_space<vmem>>, vector<4x32xf32>,
    %144 = vector.extract_strided_slice %25 {offsets = [0, 2], sizes = [4, 32], strides = [1, 1]} : vector<4x34xf32> to vector<4x32xf32>
    %c32_114 = arith.constant 32 : index
    %c96_115 = arith.constant 96 : index
    %145 = vector.load %arg8[%c32_114, %c96_115] : memref<36x512xf32, #tpu.memory_space<vmem>>, vector<4x32xf32>
    tpu.vector_store %arg8[%c32_114, %c96_115], %144 {strides = array<i32>} : memref<36x512xf32, #tpu.memory_space<vmem>>, vector<4x32xf32>,
    %146 = vector.extract_strided_slice %21 {offsets = [0, 0], sizes = [4, 32], strides = [1, 1]} : vector<4x34xf32> to vector<4x32xf32>
    %c0_116 = arith.constant 0 : index
    %c128 = arith.constant 128 : index
    %147 = vector.load %arg8[%c0_116, %c128] : memref<36x512xf32, #tpu.memory_space<vmem>>, vector<4x32xf32>
    tpu.vector_store %arg8[%c0_116, %c128], %146 {strides = array<i32>} : memref<36x512xf32, #tpu.memory_space<vmem>>, vector<4x32xf32>,
    %148 = vector.extract_strided_slice %21 {offsets = [0, 1], sizes = [4, 32], strides = [1, 1]} : vector<4x34xf32> to vector<4x32xf32>
    %c4_117 = arith.constant 4 : index
    %c128_118 = arith.constant 128 : index
    %149 = vector.load %arg8[%c4_117, %c128_118] : memref<36x512xf32, #tpu.memory_space<vmem>>, vector<4x32xf32>
    tpu.vector_store %arg8[%c4_117, %c128_118], %148 {strides = array<i32>} : memref<36x512xf32, #tpu.memory_space<vmem>>, vector<4x32xf32>,
    %150 = vector.extract_strided_slice %21 {offsets = [0, 2], sizes = [4, 32], strides = [1, 1]} : vector<4x34xf32> to vector<4x32xf32>
    %c8_119 = arith.constant 8 : index
    %c128_120 = arith.constant 128 : index
    %151 = vector.load %arg8[%c8_119, %c128_120] : memref<36x512xf32, #tpu.memory_space<vmem>>, vector<4x32xf32>
    tpu.vector_store %arg8[%c8_119, %c128_120], %150 {strides = array<i32>} : memref<36x512xf32, #tpu.memory_space<vmem>>, vector<4x32xf32>,
    %152 = vector.extract_strided_slice %25 {offsets = [0, 0], sizes = [4, 32], strides = [1, 1]} : vector<4x34xf32> to vector<4x32xf32>
    %c12_121 = arith.constant 12 : index
    %c128_122 = arith.constant 128 : index
    %153 = vector.load %arg8[%c12_121, %c128_122] : memref<36x512xf32, #tpu.memory_space<vmem>>, vector<4x32xf32>
    tpu.vector_store %arg8[%c12_121, %c128_122], %152 {strides = array<i32>} : memref<36x512xf32, #tpu.memory_space<vmem>>, vector<4x32xf32>,
    %154 = vector.extract_strided_slice %25 {offsets = [0, 1], sizes = [4, 32], strides = [1, 1]} : vector<4x34xf32> to vector<4x32xf32>
    %c16_123 = arith.constant 16 : index
    %c128_124 = arith.constant 128 : index
    %155 = vector.load %arg8[%c16_123, %c128_124] : memref<36x512xf32, #tpu.memory_space<vmem>>, vector<4x32xf32>
    tpu.vector_store %arg8[%c16_123, %c128_124], %154 {strides = array<i32>} : memref<36x512xf32, #tpu.memory_space<vmem>>, vector<4x32xf32>,
    %156 = vector.extract_strided_slice %25 {offsets = [0, 2], sizes = [4, 32], strides = [1, 1]} : vector<4x34xf32> to vector<4x32xf32>
    %c20_125 = arith.constant 20 : index
    %c128_126 = arith.constant 128 : index
    %157 = vector.load %arg8[%c20_125, %c128_126] : memref<36x512xf32, #tpu.memory_space<vmem>>, vector<4x32xf32>
    tpu.vector_store %arg8[%c20_125, %c128_126], %156 {strides = array<i32>} : memref<36x512xf32, #tpu.memory_space<vmem>>, vector<4x32xf32>,
    %158 = vector.extract_strided_slice %29 {offsets = [0, 0], sizes = [4, 32], strides = [1, 1]} : vector<4x34xf32> to vector<4x32xf32>
    %c24_127 = arith.constant 24 : index
    %c128_128 = arith.constant 128 : index
    %159 = vector.load %arg8[%c24_127, %c128_128] : memref<36x512xf32, #tpu.memory_space<vmem>>, vector<4x32xf32>
    tpu.vector_store %arg8[%c24_127, %c128_128], %158 {strides = array<i32>} : memref<36x512xf32, #tpu.memory_space<vmem>>, vector<4x32xf32>,
    %160 = vector.extract_strided_slice %29 {offsets = [0, 1], sizes = [4, 32], strides = [1, 1]} : vector<4x34xf32> to vector<4x32xf32>
    %c28_129 = arith.constant 28 : index
    %c128_130 = arith.constant 128 : index
    %161 = vector.load %arg8[%c28_129, %c128_130] : memref<36x512xf32, #tpu.memory_space<vmem>>, vector<4x32xf32>
    tpu.vector_store %arg8[%c28_129, %c128_130], %160 {strides = array<i32>} : memref<36x512xf32, #tpu.memory_space<vmem>>, vector<4x32xf32>,
    %162 = vector.extract_strided_slice %29 {offsets = [0, 2], sizes = [4, 32], strides = [1, 1]} : vector<4x34xf32> to vector<4x32xf32>
    %c32_131 = arith.constant 32 : index
    %c128_132 = arith.constant 128 : index
    %163 = vector.load %arg8[%c32_131, %c128_132] : memref<36x512xf32, #tpu.memory_space<vmem>>, vector<4x32xf32>
    tpu.vector_store %arg8[%c32_131, %c128_132], %162 {strides = array<i32>} : memref<36x512xf32, #tpu.memory_space<vmem>>, vector<4x32xf32>,
    %164 = vector.extract_strided_slice %25 {offsets = [0, 0], sizes = [4, 32], strides = [1, 1]} : vector<4x34xf32> to vector<4x32xf32>
    %c0_133 = arith.constant 0 : index
    %c160 = arith.constant 160 : index
    %165 = vector.load %arg8[%c0_133, %c160] : memref<36x512xf32, #tpu.memory_space<vmem>>, vector<4x32xf32>
    tpu.vector_store %arg8[%c0_133, %c160], %164 {strides = array<i32>} : memref<36x512xf32, #tpu.memory_space<vmem>>, vector<4x32xf32>,
    %166 = vector.extract_strided_slice %25 {offsets = [0, 1], sizes = [4, 32], strides = [1, 1]} : vector<4x34xf32> to vector<4x32xf32>
    %c4_134 = arith.constant 4 : index
    %c160_135 = arith.constant 160 : index
    %167 = vector.load %arg8[%c4_134, %c160_135] : memref<36x512xf32, #tpu.memory_space<vmem>>, vector<4x32xf32>
    tpu.vector_store %arg8[%c4_134, %c160_135], %166 {strides = array<i32>} : memref<36x512xf32, #tpu.memory_space<vmem>>, vector<4x32xf32>,
    %168 = vector.extract_strided_slice %25 {offsets = [0, 2], sizes = [4, 32], strides = [1, 1]} : vector<4x34xf32> to vector<4x32xf32>
    %c8_136 = arith.constant 8 : index
    %c160_137 = arith.constant 160 : index
    %169 = vector.load %arg8[%c8_136, %c160_137] : memref<36x512xf32, #tpu.memory_space<vmem>>, vector<4x32xf32>
    tpu.vector_store %arg8[%c8_136, %c160_137], %168 {strides = array<i32>} : memref<36x512xf32, #tpu.memory_space<vmem>>, vector<4x32xf32>,
    %170 = vector.extract_strided_slice %29 {offsets = [0, 0], sizes = [4, 32], strides = [1, 1]} : vector<4x34xf32> to vector<4x32xf32>
    %c12_138 = arith.constant 12 : index
    %c160_139 = arith.constant 160 : index
    %171 = vector.load %arg8[%c12_138, %c160_139] : memref<36x512xf32, #tpu.memory_space<vmem>>, vector<4x32xf32>
    tpu.vector_store %arg8[%c12_138, %c160_139], %170 {strides = array<i32>} : memref<36x512xf32, #tpu.memory_space<vmem>>, vector<4x32xf32>,
    %172 = vector.extract_strided_slice %29 {offsets = [0, 1], sizes = [4, 32], strides = [1, 1]} : vector<4x34xf32> to vector<4x32xf32>
    %c16_140 = arith.constant 16 : index
    %c160_141 = arith.constant 160 : index
    %173 = vector.load %arg8[%c16_140, %c160_141] : memref<36x512xf32, #tpu.memory_space<vmem>>, vector<4x32xf32>
    tpu.vector_store %arg8[%c16_140, %c160_141], %172 {strides = array<i32>} : memref<36x512xf32, #tpu.memory_space<vmem>>, vector<4x32xf32>,
    %174 = vector.extract_strided_slice %29 {offsets = [0, 2], sizes = [4, 32], strides = [1, 1]} : vector<4x34xf32> to vector<4x32xf32>
    %c20_142 = arith.constant 20 : index
    %c160_143 = arith.constant 160 : index
    %175 = vector.load %arg8[%c20_142, %c160_143] : memref<36x512xf32, #tpu.memory_space<vmem>>, vector<4x32xf32>
    tpu.vector_store %arg8[%c20_142, %c160_143], %174 {strides = array<i32>} : memref<36x512xf32, #tpu.memory_space<vmem>>, vector<4x32xf32>,
    %176 = vector.extract_strided_slice %33 {offsets = [0, 0], sizes = [4, 32], strides = [1, 1]} : vector<4x34xf32> to vector<4x32xf32>
    %c24_144 = arith.constant 24 : index
    %c160_145 = arith.constant 160 : index
    %177 = vector.load %arg8[%c24_144, %c160_145] : memref<36x512xf32, #tpu.memory_space<vmem>>, vector<4x32xf32>
    tpu.vector_store %arg8[%c24_144, %c160_145], %176 {strides = array<i32>} : memref<36x512xf32, #tpu.memory_space<vmem>>, vector<4x32xf32>,
    %178 = vector.extract_strided_slice %33 {offsets = [0, 1], sizes = [4, 32], strides = [1, 1]} : vector<4x34xf32> to vector<4x32xf32>
    %c28_146 = arith.constant 28 : index
    %c160_147 = arith.constant 160 : index
    %179 = vector.load %arg8[%c28_146, %c160_147] : memref<36x512xf32, #tpu.memory_space<vmem>>, vector<4x32xf32>
    tpu.vector_store %arg8[%c28_146, %c160_147], %178 {strides = array<i32>} : memref<36x512xf32, #tpu.memory_space<vmem>>, vector<4x32xf32>,
    %180 = vector.extract_strided_slice %33 {offsets = [0, 2], sizes = [4, 32], strides = [1, 1]} : vector<4x34xf32> to vector<4x32xf32>
    %c32_148 = arith.constant 32 : index
    %c160_149 = arith.constant 160 : index
    %181 = vector.load %arg8[%c32_148, %c160_149] : memref<36x512xf32, #tpu.memory_space<vmem>>, vector<4x32xf32>
    tpu.vector_store %arg8[%c32_148, %c160_149], %180 {strides = array<i32>} : memref<36x512xf32, #tpu.memory_space<vmem>>, vector<4x32xf32>,
    %182 = vector.extract_strided_slice %29 {offsets = [0, 0], sizes = [4, 32], strides = [1, 1]} : vector<4x34xf32> to vector<4x32xf32>
    %c0_150 = arith.constant 0 : index
    %c192 = arith.constant 192 : index
    %183 = vector.load %arg8[%c0_150, %c192] : memref<36x512xf32, #tpu.memory_space<vmem>>, vector<4x32xf32>
    tpu.vector_store %arg8[%c0_150, %c192], %182 {strides = array<i32>} : memref<36x512xf32, #tpu.memory_space<vmem>>, vector<4x32xf32>,
    %184 = vector.extract_strided_slice %29 {offsets = [0, 1], sizes = [4, 32], strides = [1, 1]} : vector<4x34xf32> to vector<4x32xf32>
    %c4_151 = arith.constant 4 : index
    %c192_152 = arith.constant 192 : index
    %185 = vector.load %arg8[%c4_151, %c192_152] : memref<36x512xf32, #tpu.memory_space<vmem>>, vector<4x32xf32>
    tpu.vector_store %arg8[%c4_151, %c192_152], %184 {strides = array<i32>} : memref<36x512xf32, #tpu.memory_space<vmem>>, vector<4x32xf32>,
    %186 = vector.extract_strided_slice %29 {offsets = [0, 2], sizes = [4, 32], strides = [1, 1]} : vector<4x34xf32> to vector<4x32xf32>
    %c8_153 = arith.constant 8 : index
    %c192_154 = arith.constant 192 : index
    %187 = vector.load %arg8[%c8_153, %c192_154] : memref<36x512xf32, #tpu.memory_space<vmem>>, vector<4x32xf32>
    tpu.vector_store %arg8[%c8_153, %c192_154], %186 {strides = array<i32>} : memref<36x512xf32, #tpu.memory_space<vmem>>, vector<4x32xf32>,
    %188 = vector.extract_strided_slice %33 {offsets = [0, 0], sizes = [4, 32], strides = [1, 1]} : vector<4x34xf32> to vector<4x32xf32>
    %c12_155 = arith.constant 12 : index
    %c192_156 = arith.constant 192 : index
    %189 = vector.load %arg8[%c12_155, %c192_156] : memref<36x512xf32, #tpu.memory_space<vmem>>, vector<4x32xf32>
    tpu.vector_store %arg8[%c12_155, %c192_156], %188 {strides = array<i32>} : memref<36x512xf32, #tpu.memory_space<vmem>>, vector<4x32xf32>,
    %190 = vector.extract_strided_slice %33 {offsets = [0, 1], sizes = [4, 32], strides = [1, 1]} : vector<4x34xf32> to vector<4x32xf32>
    %c16_157 = arith.constant 16 : index
    %c192_158 = arith.constant 192 : index
    %191 = vector.load %arg8[%c16_157, %c192_158] : memref<36x512xf32, #tpu.memory_space<vmem>>, vector<4x32xf32>
    tpu.vector_store %arg8[%c16_157, %c192_158], %190 {strides = array<i32>} : memref<36x512xf32, #tpu.memory_space<vmem>>, vector<4x32xf32>,
    %192 = vector.extract_strided_slice %33 {offsets = [0, 2], sizes = [4, 32], strides = [1, 1]} : vector<4x34xf32> to vector<4x32xf32>
    %c20_159 = arith.constant 20 : index
    %c192_160 = arith.constant 192 : index
    %193 = vector.load %arg8[%c20_159, %c192_160] : memref<36x512xf32, #tpu.memory_space<vmem>>, vector<4x32xf32>
    tpu.vector_store %arg8[%c20_159, %c192_160], %192 {strides = array<i32>} : memref<36x512xf32, #tpu.memory_space<vmem>>, vector<4x32xf32>,
    %194 = vector.extract_strided_slice %37 {offsets = [0, 0], sizes = [4, 32], strides = [1, 1]} : vector<4x34xf32> to vector<4x32xf32>
    %c24_161 = arith.constant 24 : index
    %c192_162 = arith.constant 192 : index
    %195 = vector.load %arg8[%c24_161, %c192_162] : memref<36x512xf32, #tpu.memory_space<vmem>>, vector<4x32xf32>
    tpu.vector_store %arg8[%c24_161, %c192_162], %194 {strides = array<i32>} : memref<36x512xf32, #tpu.memory_space<vmem>>, vector<4x32xf32>,
    %196 = vector.extract_strided_slice %37 {offsets = [0, 1], sizes = [4, 32], strides = [1, 1]} : vector<4x34xf32> to vector<4x32xf32>
    %c28_163 = arith.constant 28 : index
    %c192_164 = arith.constant 192 : index
    %197 = vector.load %arg8[%c28_163, %c192_164] : memref<36x512xf32, #tpu.memory_space<vmem>>, vector<4x32xf32>
    tpu.vector_store %arg8[%c28_163, %c192_164], %196 {strides = array<i32>} : memref<36x512xf32, #tpu.memory_space<vmem>>, vector<4x32xf32>,
    %198 = vector.extract_strided_slice %37 {offsets = [0, 2], sizes = [4, 32], strides = [1, 1]} : vector<4x34xf32> to vector<4x32xf32>
    %c32_165 = arith.constant 32 : index
    %c192_166 = arith.constant 192 : index
    %199 = vector.load %arg8[%c32_165, %c192_166] : memref<36x512xf32, #tpu.memory_space<vmem>>, vector<4x32xf32>
    tpu.vector_store %arg8[%c32_165, %c192_166], %198 {strides = array<i32>} : memref<36x512xf32, #tpu.memory_space<vmem>>, vector<4x32xf32>,
    %200 = vector.extract_strided_slice %33 {offsets = [0, 0], sizes = [4, 32], strides = [1, 1]} : vector<4x34xf32> to vector<4x32xf32>
    %c0_167 = arith.constant 0 : index
    %c224 = arith.constant 224 : index
    %201 = vector.load %arg8[%c0_167, %c224] : memref<36x512xf32, #tpu.memory_space<vmem>>, vector<4x32xf32>
    tpu.vector_store %arg8[%c0_167, %c224], %200 {strides = array<i32>} : memref<36x512xf32, #tpu.memory_space<vmem>>, vector<4x32xf32>,
    %202 = vector.extract_strided_slice %33 {offsets = [0, 1], sizes = [4, 32], strides = [1, 1]} : vector<4x34xf32> to vector<4x32xf32>
    %c4_168 = arith.constant 4 : index
    %c224_169 = arith.constant 224 : index
    %203 = vector.load %arg8[%c4_168, %c224_169] : memref<36x512xf32, #tpu.memory_space<vmem>>, vector<4x32xf32>
    tpu.vector_store %arg8[%c4_168, %c224_169], %202 {strides = array<i32>} : memref<36x512xf32, #tpu.memory_space<vmem>>, vector<4x32xf32>,
    %204 = vector.extract_strided_slice %33 {offsets = [0, 2], sizes = [4, 32], strides = [1, 1]} : vector<4x34xf32> to vector<4x32xf32>
    %c8_170 = arith.constant 8 : index
    %c224_171 = arith.constant 224 : index
    %205 = vector.load %arg8[%c8_170, %c224_171] : memref<36x512xf32, #tpu.memory_space<vmem>>, vector<4x32xf32>
    tpu.vector_store %arg8[%c8_170, %c224_171], %204 {strides = array<i32>} : memref<36x512xf32, #tpu.memory_space<vmem>>, vector<4x32xf32>,
    %206 = vector.extract_strided_slice %37 {offsets = [0, 0], sizes = [4, 32], strides = [1, 1]} : vector<4x34xf32> to vector<4x32xf32>
    %c12_172 = arith.constant 12 : index
    %c224_173 = arith.constant 224 : index
    %207 = vector.load %arg8[%c12_172, %c224_173] : memref<36x512xf32, #tpu.memory_space<vmem>>, vector<4x32xf32>
    tpu.vector_store %arg8[%c12_172, %c224_173], %206 {strides = array<i32>} : memref<36x512xf32, #tpu.memory_space<vmem>>, vector<4x32xf32>,
    %208 = vector.extract_strided_slice %37 {offsets = [0, 1], sizes = [4, 32], strides = [1, 1]} : vector<4x34xf32> to vector<4x32xf32>
    %c16_174 = arith.constant 16 : index
    %c224_175 = arith.constant 224 : index
    %209 = vector.load %arg8[%c16_174, %c224_175] : memref<36x512xf32, #tpu.memory_space<vmem>>, vector<4x32xf32>
    tpu.vector_store %arg8[%c16_174, %c224_175], %208 {strides = array<i32>} : memref<36x512xf32, #tpu.memory_space<vmem>>, vector<4x32xf32>,
    %210 = vector.extract_strided_slice %37 {offsets = [0, 2], sizes = [4, 32], strides = [1, 1]} : vector<4x34xf32> to vector<4x32xf32>
    %c20_176 = arith.constant 20 : index
    %c224_177 = arith.constant 224 : index
    %211 = vector.load %arg8[%c20_176, %c224_177] : memref<36x512xf32, #tpu.memory_space<vmem>>, vector<4x32xf32>
    tpu.vector_store %arg8[%c20_176, %c224_177], %210 {strides = array<i32>} : memref<36x512xf32, #tpu.memory_space<vmem>>, vector<4x32xf32>,
    %212 = vector.extract_strided_slice %41 {offsets = [0, 0], sizes = [4, 32], strides = [1, 1]} : vector<4x34xf32> to vector<4x32xf32>
    %c24_178 = arith.constant 24 : index
    %c224_179 = arith.constant 224 : index
    %213 = vector.load %arg8[%c24_178, %c224_179] : memref<36x512xf32, #tpu.memory_space<vmem>>, vector<4x32xf32>
    tpu.vector_store %arg8[%c24_178, %c224_179], %212 {strides = array<i32>} : memref<36x512xf32, #tpu.memory_space<vmem>>, vector<4x32xf32>,
    %214 = vector.extract_strided_slice %41 {offsets = [0, 1], sizes = [4, 32], strides = [1, 1]} : vector<4x34xf32> to vector<4x32xf32>
    %c28_180 = arith.constant 28 : index
    %c224_181 = arith.constant 224 : index
    %215 = vector.load %arg8[%c28_180, %c224_181] : memref<36x512xf32, #tpu.memory_space<vmem>>, vector<4x32xf32>
    tpu.vector_store %arg8[%c28_180, %c224_181], %214 {strides = array<i32>} : memref<36x512xf32, #tpu.memory_space<vmem>>, vector<4x32xf32>,
    %216 = vector.extract_strided_slice %41 {offsets = [0, 2], sizes = [4, 32], strides = [1, 1]} : vector<4x34xf32> to vector<4x32xf32>
    %c32_182 = arith.constant 32 : index
    %c224_183 = arith.constant 224 : index
    %217 = vector.load %arg8[%c32_182, %c224_183] : memref<36x512xf32, #tpu.memory_space<vmem>>, vector<4x32xf32>
    tpu.vector_store %arg8[%c32_182, %c224_183], %216 {strides = array<i32>} : memref<36x512xf32, #tpu.memory_space<vmem>>, vector<4x32xf32>,
    %218 = vector.extract_strided_slice %37 {offsets = [0, 0], sizes = [4, 32], strides = [1, 1]} : vector<4x34xf32> to vector<4x32xf32>
    %c0_184 = arith.constant 0 : index
    %c256 = arith.constant 256 : index
    %219 = vector.load %arg8[%c0_184, %c256] : memref<36x512xf32, #tpu.memory_space<vmem>>, vector<4x32xf32>
    tpu.vector_store %arg8[%c0_184, %c256], %218 {strides = array<i32>} : memref<36x512xf32, #tpu.memory_space<vmem>>, vector<4x32xf32>,
    %220 = vector.extract_strided_slice %37 {offsets = [0, 1], sizes = [4, 32], strides = [1, 1]} : vector<4x34xf32> to vector<4x32xf32>
    %c4_185 = arith.constant 4 : index
    %c256_186 = arith.constant 256 : index
    %221 = vector.load %arg8[%c4_185, %c256_186] : memref<36x512xf32, #tpu.memory_space<vmem>>, vector<4x32xf32>
    tpu.vector_store %arg8[%c4_185, %c256_186], %220 {strides = array<i32>} : memref<36x512xf32, #tpu.memory_space<vmem>>, vector<4x32xf32>,
    %222 = vector.extract_strided_slice %37 {offsets = [0, 2], sizes = [4, 32], strides = [1, 1]} : vector<4x34xf32> to vector<4x32xf32>
    %c8_187 = arith.constant 8 : index
    %c256_188 = arith.constant 256 : index
    %223 = vector.load %arg8[%c8_187, %c256_188] : memref<36x512xf32, #tpu.memory_space<vmem>>, vector<4x32xf32>
    tpu.vector_store %arg8[%c8_187, %c256_188], %222 {strides = array<i32>} : memref<36x512xf32, #tpu.memory_space<vmem>>, vector<4x32xf32>,
    %224 = vector.extract_strided_slice %41 {offsets = [0, 0], sizes = [4, 32], strides = [1, 1]} : vector<4x34xf32> to vector<4x32xf32>
    %c12_189 = arith.constant 12 : index
    %c256_190 = arith.constant 256 : index
    %225 = vector.load %arg8[%c12_189, %c256_190] : memref<36x512xf32, #tpu.memory_space<vmem>>, vector<4x32xf32>
    tpu.vector_store %arg8[%c12_189, %c256_190], %224 {strides = array<i32>} : memref<36x512xf32, #tpu.memory_space<vmem>>, vector<4x32xf32>,
    %226 = vector.extract_strided_slice %41 {offsets = [0, 1], sizes = [4, 32], strides = [1, 1]} : vector<4x34xf32> to vector<4x32xf32>
    %c16_191 = arith.constant 16 : index
    %c256_192 = arith.constant 256 : index
    %227 = vector.load %arg8[%c16_191, %c256_192] : memref<36x512xf32, #tpu.memory_space<vmem>>, vector<4x32xf32>
    tpu.vector_store %arg8[%c16_191, %c256_192], %226 {strides = array<i32>} : memref<36x512xf32, #tpu.memory_space<vmem>>, vector<4x32xf32>,
    %228 = vector.extract_strided_slice %41 {offsets = [0, 2], sizes = [4, 32], strides = [1, 1]} : vector<4x34xf32> to vector<4x32xf32>
    %c20_193 = arith.constant 20 : index
    %c256_194 = arith.constant 256 : index
    %229 = vector.load %arg8[%c20_193, %c256_194] : memref<36x512xf32, #tpu.memory_space<vmem>>, vector<4x32xf32>
    tpu.vector_store %arg8[%c20_193, %c256_194], %228 {strides = array<i32>} : memref<36x512xf32, #tpu.memory_space<vmem>>, vector<4x32xf32>,
    %230 = vector.extract_strided_slice %45 {offsets = [0, 0], sizes = [4, 32], strides = [1, 1]} : vector<4x34xf32> to vector<4x32xf32>
    %c24_195 = arith.constant 24 : index
    %c256_196 = arith.constant 256 : index
    %231 = vector.load %arg8[%c24_195, %c256_196] : memref<36x512xf32, #tpu.memory_space<vmem>>, vector<4x32xf32>
    tpu.vector_store %arg8[%c24_195, %c256_196], %230 {strides = array<i32>} : memref<36x512xf32, #tpu.memory_space<vmem>>, vector<4x32xf32>,
    %232 = vector.extract_strided_slice %45 {offsets = [0, 1], sizes = [4, 32], strides = [1, 1]} : vector<4x34xf32> to vector<4x32xf32>
    %c28_197 = arith.constant 28 : index
    %c256_198 = arith.constant 256 : index
    %233 = vector.load %arg8[%c28_197, %c256_198] : memref<36x512xf32, #tpu.memory_space<vmem>>, vector<4x32xf32>
    tpu.vector_store %arg8[%c28_197, %c256_198], %232 {strides = array<i32>} : memref<36x512xf32, #tpu.memory_space<vmem>>, vector<4x32xf32>,
    %234 = vector.extract_strided_slice %45 {offsets = [0, 2], sizes = [4, 32], strides = [1, 1]} : vector<4x34xf32> to vector<4x32xf32>
    %c32_199 = arith.constant 32 : index
    %c256_200 = arith.constant 256 : index
    %235 = vector.load %arg8[%c32_199, %c256_200] : memref<36x512xf32, #tpu.memory_space<vmem>>, vector<4x32xf32>
    tpu.vector_store %arg8[%c32_199, %c256_200], %234 {strides = array<i32>} : memref<36x512xf32, #tpu.memory_space<vmem>>, vector<4x32xf32>,
    %236 = vector.extract_strided_slice %41 {offsets = [0, 0], sizes = [4, 32], strides = [1, 1]} : vector<4x34xf32> to vector<4x32xf32>
    %c0_201 = arith.constant 0 : index
    %c288 = arith.constant 288 : index
    %237 = vector.load %arg8[%c0_201, %c288] : memref<36x512xf32, #tpu.memory_space<vmem>>, vector<4x32xf32>
    tpu.vector_store %arg8[%c0_201, %c288], %236 {strides = array<i32>} : memref<36x512xf32, #tpu.memory_space<vmem>>, vector<4x32xf32>,
    %238 = vector.extract_strided_slice %41 {offsets = [0, 1], sizes = [4, 32], strides = [1, 1]} : vector<4x34xf32> to vector<4x32xf32>
    %c4_202 = arith.constant 4 : index
    %c288_203 = arith.constant 288 : index
    %239 = vector.load %arg8[%c4_202, %c288_203] : memref<36x512xf32, #tpu.memory_space<vmem>>, vector<4x32xf32>
    tpu.vector_store %arg8[%c4_202, %c288_203], %238 {strides = array<i32>} : memref<36x512xf32, #tpu.memory_space<vmem>>, vector<4x32xf32>,
    %240 = vector.extract_strided_slice %41 {offsets = [0, 2], sizes = [4, 32], strides = [1, 1]} : vector<4x34xf32> to vector<4x32xf32>
    %c8_204 = arith.constant 8 : index
    %c288_205 = arith.constant 288 : index
    %241 = vector.load %arg8[%c8_204, %c288_205] : memref<36x512xf32, #tpu.memory_space<vmem>>, vector<4x32xf32>
    tpu.vector_store %arg8[%c8_204, %c288_205], %240 {strides = array<i32>} : memref<36x512xf32, #tpu.memory_space<vmem>>, vector<4x32xf32>,
    %242 = vector.extract_strided_slice %45 {offsets = [0, 0], sizes = [4, 32], strides = [1, 1]} : vector<4x34xf32> to vector<4x32xf32>
    %c12_206 = arith.constant 12 : index
    %c288_207 = arith.constant 288 : index
    %243 = vector.load %arg8[%c12_206, %c288_207] : memref<36x512xf32, #tpu.memory_space<vmem>>, vector<4x32xf32>
    tpu.vector_store %arg8[%c12_206, %c288_207], %242 {strides = array<i32>} : memref<36x512xf32, #tpu.memory_space<vmem>>, vector<4x32xf32>,
    %244 = vector.extract_strided_slice %45 {offsets = [0, 1], sizes = [4, 32], strides = [1, 1]} : vector<4x34xf32> to vector<4x32xf32>
    %c16_208 = arith.constant 16 : index
    %c288_209 = arith.constant 288 : index
    %245 = vector.load %arg8[%c16_208, %c288_209] : memref<36x512xf32, #tpu.memory_space<vmem>>, vector<4x32xf32>
    tpu.vector_store %arg8[%c16_208, %c288_209], %244 {strides = array<i32>} : memref<36x512xf32, #tpu.memory_space<vmem>>, vector<4x32xf32>,
    %246 = vector.extract_strided_slice %45 {offsets = [0, 2], sizes = [4, 32], strides = [1, 1]} : vector<4x34xf32> to vector<4x32xf32>
    %c20_210 = arith.constant 20 : index
    %c288_211 = arith.constant 288 : index
    %247 = vector.load %arg8[%c20_210, %c288_211] : memref<36x512xf32, #tpu.memory_space<vmem>>, vector<4x32xf32>
    tpu.vector_store %arg8[%c20_210, %c288_211], %246 {strides = array<i32>} : memref<36x512xf32, #tpu.memory_space<vmem>>, vector<4x32xf32>,
    %248 = vector.extract_strided_slice %49 {offsets = [0, 0], sizes = [4, 32], strides = [1, 1]} : vector<4x34xf32> to vector<4x32xf32>
    %c24_212 = arith.constant 24 : index
    %c288_213 = arith.constant 288 : index
    %249 = vector.load %arg8[%c24_212, %c288_213] : memref<36x512xf32, #tpu.memory_space<vmem>>, vector<4x32xf32>
    tpu.vector_store %arg8[%c24_212, %c288_213], %248 {strides = array<i32>} : memref<36x512xf32, #tpu.memory_space<vmem>>, vector<4x32xf32>,
    %250 = vector.extract_strided_slice %49 {offsets = [0, 1], sizes = [4, 32], strides = [1, 1]} : vector<4x34xf32> to vector<4x32xf32>
    %c28_214 = arith.constant 28 : index
    %c288_215 = arith.constant 288 : index
    %251 = vector.load %arg8[%c28_214, %c288_215] : memref<36x512xf32, #tpu.memory_space<vmem>>, vector<4x32xf32>
    tpu.vector_store %arg8[%c28_214, %c288_215], %250 {strides = array<i32>} : memref<36x512xf32, #tpu.memory_space<vmem>>, vector<4x32xf32>,
    %252 = vector.extract_strided_slice %49 {offsets = [0, 2], sizes = [4, 32], strides = [1, 1]} : vector<4x34xf32> to vector<4x32xf32>
    %c32_216 = arith.constant 32 : index
    %c288_217 = arith.constant 288 : index
    %253 = vector.load %arg8[%c32_216, %c288_217] : memref<36x512xf32, #tpu.memory_space<vmem>>, vector<4x32xf32>
    tpu.vector_store %arg8[%c32_216, %c288_217], %252 {strides = array<i32>} : memref<36x512xf32, #tpu.memory_space<vmem>>, vector<4x32xf32>,
    %254 = vector.extract_strided_slice %45 {offsets = [0, 0], sizes = [4, 32], strides = [1, 1]} : vector<4x34xf32> to vector<4x32xf32>
    %c0_218 = arith.constant 0 : index
    %c320 = arith.constant 320 : index
    %255 = vector.load %arg8[%c0_218, %c320] : memref<36x512xf32, #tpu.memory_space<vmem>>, vector<4x32xf32>
    tpu.vector_store %arg8[%c0_218, %c320], %254 {strides = array<i32>} : memref<36x512xf32, #tpu.memory_space<vmem>>, vector<4x32xf32>,
    %256 = vector.extract_strided_slice %45 {offsets = [0, 1], sizes = [4, 32], strides = [1, 1]} : vector<4x34xf32> to vector<4x32xf32>
    %c4_219 = arith.constant 4 : index
    %c320_220 = arith.constant 320 : index
    %257 = vector.load %arg8[%c4_219, %c320_220] : memref<36x512xf32, #tpu.memory_space<vmem>>, vector<4x32xf32>
    tpu.vector_store %arg8[%c4_219, %c320_220], %256 {strides = array<i32>} : memref<36x512xf32, #tpu.memory_space<vmem>>, vector<4x32xf32>,
    %258 = vector.extract_strided_slice %45 {offsets = [0, 2], sizes = [4, 32], strides = [1, 1]} : vector<4x34xf32> to vector<4x32xf32>
    %c8_221 = arith.constant 8 : index
    %c320_222 = arith.constant 320 : index
    %259 = vector.load %arg8[%c8_221, %c320_222] : memref<36x512xf32, #tpu.memory_space<vmem>>, vector<4x32xf32>
    tpu.vector_store %arg8[%c8_221, %c320_222], %258 {strides = array<i32>} : memref<36x512xf32, #tpu.memory_space<vmem>>, vector<4x32xf32>,
    %260 = vector.extract_strided_slice %49 {offsets = [0, 0], sizes = [4, 32], strides = [1, 1]} : vector<4x34xf32> to vector<4x32xf32>
    %c12_223 = arith.constant 12 : index
    %c320_224 = arith.constant 320 : index
    %261 = vector.load %arg8[%c12_223, %c320_224] : memref<36x512xf32, #tpu.memory_space<vmem>>, vector<4x32xf32>
    tpu.vector_store %arg8[%c12_223, %c320_224], %260 {strides = array<i32>} : memref<36x512xf32, #tpu.memory_space<vmem>>, vector<4x32xf32>,
    %262 = vector.extract_strided_slice %49 {offsets = [0, 1], sizes = [4, 32], strides = [1, 1]} : vector<4x34xf32> to vector<4x32xf32>
    %c16_225 = arith.constant 16 : index
    %c320_226 = arith.constant 320 : index
    %263 = vector.load %arg8[%c16_225, %c320_226] : memref<36x512xf32, #tpu.memory_space<vmem>>, vector<4x32xf32>
    tpu.vector_store %arg8[%c16_225, %c320_226], %262 {strides = array<i32>} : memref<36x512xf32, #tpu.memory_space<vmem>>, vector<4x32xf32>,
    %264 = vector.extract_strided_slice %49 {offsets = [0, 2], sizes = [4, 32], strides = [1, 1]} : vector<4x34xf32> to vector<4x32xf32>
    %c20_227 = arith.constant 20 : index
    %c320_228 = arith.constant 320 : index
    %265 = vector.load %arg8[%c20_227, %c320_228] : memref<36x512xf32, #tpu.memory_space<vmem>>, vector<4x32xf32>
    tpu.vector_store %arg8[%c20_227, %c320_228], %264 {strides = array<i32>} : memref<36x512xf32, #tpu.memory_space<vmem>>, vector<4x32xf32>,
    %266 = vector.extract_strided_slice %53 {offsets = [0, 0], sizes = [4, 32], strides = [1, 1]} : vector<4x34xf32> to vector<4x32xf32>
    %c24_229 = arith.constant 24 : index
    %c320_230 = arith.constant 320 : index
    %267 = vector.load %arg8[%c24_229, %c320_230] : memref<36x512xf32, #tpu.memory_space<vmem>>, vector<4x32xf32>
    tpu.vector_store %arg8[%c24_229, %c320_230], %266 {strides = array<i32>} : memref<36x512xf32, #tpu.memory_space<vmem>>, vector<4x32xf32>,
    %268 = vector.extract_strided_slice %53 {offsets = [0, 1], sizes = [4, 32], strides = [1, 1]} : vector<4x34xf32> to vector<4x32xf32>
    %c28_231 = arith.constant 28 : index
    %c320_232 = arith.constant 320 : index
    %269 = vector.load %arg8[%c28_231, %c320_232] : memref<36x512xf32, #tpu.memory_space<vmem>>, vector<4x32xf32>
    tpu.vector_store %arg8[%c28_231, %c320_232], %268 {strides = array<i32>} : memref<36x512xf32, #tpu.memory_space<vmem>>, vector<4x32xf32>,
    %270 = vector.extract_strided_slice %53 {offsets = [0, 2], sizes = [4, 32], strides = [1, 1]} : vector<4x34xf32> to vector<4x32xf32>
    %c32_233 = arith.constant 32 : index
    %c320_234 = arith.constant 320 : index
    %271 = vector.load %arg8[%c32_233, %c320_234] : memref<36x512xf32, #tpu.memory_space<vmem>>, vector<4x32xf32>
    tpu.vector_store %arg8[%c32_233, %c320_234], %270 {strides = array<i32>} : memref<36x512xf32, #tpu.memory_space<vmem>>, vector<4x32xf32>,
    %272 = vector.extract_strided_slice %49 {offsets = [0, 0], sizes = [4, 32], strides = [1, 1]} : vector<4x34xf32> to vector<4x32xf32>
    %c0_235 = arith.constant 0 : index
    %c352 = arith.constant 352 : index
    %273 = vector.load %arg8[%c0_235, %c352] : memref<36x512xf32, #tpu.memory_space<vmem>>, vector<4x32xf32>
    tpu.vector_store %arg8[%c0_235, %c352], %272 {strides = array<i32>} : memref<36x512xf32, #tpu.memory_space<vmem>>, vector<4x32xf32>,
    %274 = vector.extract_strided_slice %49 {offsets = [0, 1], sizes = [4, 32], strides = [1, 1]} : vector<4x34xf32> to vector<4x32xf32>
    %c4_236 = arith.constant 4 : index
    %c352_237 = arith.constant 352 : index
    %275 = vector.load %arg8[%c4_236, %c352_237] : memref<36x512xf32, #tpu.memory_space<vmem>>, vector<4x32xf32>
    tpu.vector_store %arg8[%c4_236, %c352_237], %274 {strides = array<i32>} : memref<36x512xf32, #tpu.memory_space<vmem>>, vector<4x32xf32>,
    %276 = vector.extract_strided_slice %49 {offsets = [0, 2], sizes = [4, 32], strides = [1, 1]} : vector<4x34xf32> to vector<4x32xf32>
    %c8_238 = arith.constant 8 : index
    %c352_239 = arith.constant 352 : index
    %277 = vector.load %arg8[%c8_238, %c352_239] : memref<36x512xf32, #tpu.memory_space<vmem>>, vector<4x32xf32>
    tpu.vector_store %arg8[%c8_238, %c352_239], %276 {strides = array<i32>} : memref<36x512xf32, #tpu.memory_space<vmem>>, vector<4x32xf32>,
    %278 = vector.extract_strided_slice %53 {offsets = [0, 0], sizes = [4, 32], strides = [1, 1]} : vector<4x34xf32> to vector<4x32xf32>
    %c12_240 = arith.constant 12 : index
    %c352_241 = arith.constant 352 : index
    %279 = vector.load %arg8[%c12_240, %c352_241] : memref<36x512xf32, #tpu.memory_space<vmem>>, vector<4x32xf32>
    tpu.vector_store %arg8[%c12_240, %c352_241], %278 {strides = array<i32>} : memref<36x512xf32, #tpu.memory_space<vmem>>, vector<4x32xf32>,
    %280 = vector.extract_strided_slice %53 {offsets = [0, 1], sizes = [4, 32], strides = [1, 1]} : vector<4x34xf32> to vector<4x32xf32>
    %c16_242 = arith.constant 16 : index
    %c352_243 = arith.constant 352 : index
    %281 = vector.load %arg8[%c16_242, %c352_243] : memref<36x512xf32, #tpu.memory_space<vmem>>, vector<4x32xf32>
    tpu.vector_store %arg8[%c16_242, %c352_243], %280 {strides = array<i32>} : memref<36x512xf32, #tpu.memory_space<vmem>>, vector<4x32xf32>,
    %282 = vector.extract_strided_slice %53 {offsets = [0, 2], sizes = [4, 32], strides = [1, 1]} : vector<4x34xf32> to vector<4x32xf32>
    %c20_244 = arith.constant 20 : index
    %c352_245 = arith.constant 352 : index
    %283 = vector.load %arg8[%c20_244, %c352_245] : memref<36x512xf32, #tpu.memory_space<vmem>>, vector<4x32xf32>
    tpu.vector_store %arg8[%c20_244, %c352_245], %282 {strides = array<i32>} : memref<36x512xf32, #tpu.memory_space<vmem>>, vector<4x32xf32>,
    %284 = vector.extract_strided_slice %57 {offsets = [0, 0], sizes = [4, 32], strides = [1, 1]} : vector<4x34xf32> to vector<4x32xf32>
    %c24_246 = arith.constant 24 : index
    %c352_247 = arith.constant 352 : index
    %285 = vector.load %arg8[%c24_246, %c352_247] : memref<36x512xf32, #tpu.memory_space<vmem>>, vector<4x32xf32>
    tpu.vector_store %arg8[%c24_246, %c352_247], %284 {strides = array<i32>} : memref<36x512xf32, #tpu.memory_space<vmem>>, vector<4x32xf32>,
    %286 = vector.extract_strided_slice %57 {offsets = [0, 1], sizes = [4, 32], strides = [1, 1]} : vector<4x34xf32> to vector<4x32xf32>
    %c28_248 = arith.constant 28 : index
    %c352_249 = arith.constant 352 : index
    %287 = vector.load %arg8[%c28_248, %c352_249] : memref<36x512xf32, #tpu.memory_space<vmem>>, vector<4x32xf32>
    tpu.vector_store %arg8[%c28_248, %c352_249], %286 {strides = array<i32>} : memref<36x512xf32, #tpu.memory_space<vmem>>, vector<4x32xf32>,
    %288 = vector.extract_strided_slice %57 {offsets = [0, 2], sizes = [4, 32], strides = [1, 1]} : vector<4x34xf32> to vector<4x32xf32>
    %c32_250 = arith.constant 32 : index
    %c352_251 = arith.constant 352 : index
    %289 = vector.load %arg8[%c32_250, %c352_251] : memref<36x512xf32, #tpu.memory_space<vmem>>, vector<4x32xf32>
    tpu.vector_store %arg8[%c32_250, %c352_251], %288 {strides = array<i32>} : memref<36x512xf32, #tpu.memory_space<vmem>>, vector<4x32xf32>,
    %290 = vector.extract_strided_slice %53 {offsets = [0, 0], sizes = [4, 32], strides = [1, 1]} : vector<4x34xf32> to vector<4x32xf32>
    %c0_252 = arith.constant 0 : index
    %c384 = arith.constant 384 : index
    %291 = vector.load %arg8[%c0_252, %c384] : memref<36x512xf32, #tpu.memory_space<vmem>>, vector<4x32xf32>
    tpu.vector_store %arg8[%c0_252, %c384], %290 {strides = array<i32>} : memref<36x512xf32, #tpu.memory_space<vmem>>, vector<4x32xf32>,
    %292 = vector.extract_strided_slice %53 {offsets = [0, 1], sizes = [4, 32], strides = [1, 1]} : vector<4x34xf32> to vector<4x32xf32>
    %c4_253 = arith.constant 4 : index
    %c384_254 = arith.constant 384 : index
    %293 = vector.load %arg8[%c4_253, %c384_254] : memref<36x512xf32, #tpu.memory_space<vmem>>, vector<4x32xf32>
    tpu.vector_store %arg8[%c4_253, %c384_254], %292 {strides = array<i32>} : memref<36x512xf32, #tpu.memory_space<vmem>>, vector<4x32xf32>,
    %294 = vector.extract_strided_slice %53 {offsets = [0, 2], sizes = [4, 32], strides = [1, 1]} : vector<4x34xf32> to vector<4x32xf32>
    %c8_255 = arith.constant 8 : index
    %c384_256 = arith.constant 384 : index
    %295 = vector.load %arg8[%c8_255, %c384_256] : memref<36x512xf32, #tpu.memory_space<vmem>>, vector<4x32xf32>
    tpu.vector_store %arg8[%c8_255, %c384_256], %294 {strides = array<i32>} : memref<36x512xf32, #tpu.memory_space<vmem>>, vector<4x32xf32>,
    %296 = vector.extract_strided_slice %57 {offsets = [0, 0], sizes = [4, 32], strides = [1, 1]} : vector<4x34xf32> to vector<4x32xf32>
    %c12_257 = arith.constant 12 : index
    %c384_258 = arith.constant 384 : index
    %297 = vector.load %arg8[%c12_257, %c384_258] : memref<36x512xf32, #tpu.memory_space<vmem>>, vector<4x32xf32>
    tpu.vector_store %arg8[%c12_257, %c384_258], %296 {strides = array<i32>} : memref<36x512xf32, #tpu.memory_space<vmem>>, vector<4x32xf32>,
    %298 = vector.extract_strided_slice %57 {offsets = [0, 1], sizes = [4, 32], strides = [1, 1]} : vector<4x34xf32> to vector<4x32xf32>
    %c16_259 = arith.constant 16 : index
    %c384_260 = arith.constant 384 : index
    %299 = vector.load %arg8[%c16_259, %c384_260] : memref<36x512xf32, #tpu.memory_space<vmem>>, vector<4x32xf32>
    tpu.vector_store %arg8[%c16_259, %c384_260], %298 {strides = array<i32>} : memref<36x512xf32, #tpu.memory_space<vmem>>, vector<4x32xf32>,
    %300 = vector.extract_strided_slice %57 {offsets = [0, 2], sizes = [4, 32], strides = [1, 1]} : vector<4x34xf32> to vector<4x32xf32>
    %c20_261 = arith.constant 20 : index
    %c384_262 = arith.constant 384 : index
    %301 = vector.load %arg8[%c20_261, %c384_262] : memref<36x512xf32, #tpu.memory_space<vmem>>, vector<4x32xf32>
    tpu.vector_store %arg8[%c20_261, %c384_262], %300 {strides = array<i32>} : memref<36x512xf32, #tpu.memory_space<vmem>>, vector<4x32xf32>,
    %302 = vector.extract_strided_slice %61 {offsets = [0, 0], sizes = [4, 32], strides = [1, 1]} : vector<4x34xf32> to vector<4x32xf32>
    %c24_263 = arith.constant 24 : index
    %c384_264 = arith.constant 384 : index
    %303 = vector.load %arg8[%c24_263, %c384_264] : memref<36x512xf32, #tpu.memory_space<vmem>>, vector<4x32xf32>
    tpu.vector_store %arg8[%c24_263, %c384_264], %302 {strides = array<i32>} : memref<36x512xf32, #tpu.memory_space<vmem>>, vector<4x32xf32>,
    %304 = vector.extract_strided_slice %61 {offsets = [0, 1], sizes = [4, 32], strides = [1, 1]} : vector<4x34xf32> to vector<4x32xf32>
    %c28_265 = arith.constant 28 : index
    %c384_266 = arith.constant 384 : index
    %305 = vector.load %arg8[%c28_265, %c384_266] : memref<36x512xf32, #tpu.memory_space<vmem>>, vector<4x32xf32>
    tpu.vector_store %arg8[%c28_265, %c384_266], %304 {strides = array<i32>} : memref<36x512xf32, #tpu.memory_space<vmem>>, vector<4x32xf32>,
    %306 = vector.extract_strided_slice %61 {offsets = [0, 2], sizes = [4, 32], strides = [1, 1]} : vector<4x34xf32> to vector<4x32xf32>
    %c32_267 = arith.constant 32 : index
    %c384_268 = arith.constant 384 : index
    %307 = vector.load %arg8[%c32_267, %c384_268] : memref<36x512xf32, #tpu.memory_space<vmem>>, vector<4x32xf32>
    tpu.vector_store %arg8[%c32_267, %c384_268], %306 {strides = array<i32>} : memref<36x512xf32, #tpu.memory_space<vmem>>, vector<4x32xf32>,
    %308 = vector.extract_strided_slice %57 {offsets = [0, 0], sizes = [4, 32], strides = [1, 1]} : vector<4x34xf32> to vector<4x32xf32>
    %c0_269 = arith.constant 0 : index
    %c416 = arith.constant 416 : index
    %309 = vector.load %arg8[%c0_269, %c416] : memref<36x512xf32, #tpu.memory_space<vmem>>, vector<4x32xf32>
    tpu.vector_store %arg8[%c0_269, %c416], %308 {strides = array<i32>} : memref<36x512xf32, #tpu.memory_space<vmem>>, vector<4x32xf32>,
    %310 = vector.extract_strided_slice %57 {offsets = [0, 1], sizes = [4, 32], strides = [1, 1]} : vector<4x34xf32> to vector<4x32xf32>
    %c4_270 = arith.constant 4 : index
    %c416_271 = arith.constant 416 : index
    %311 = vector.load %arg8[%c4_270, %c416_271] : memref<36x512xf32, #tpu.memory_space<vmem>>, vector<4x32xf32>
    tpu.vector_store %arg8[%c4_270, %c416_271], %310 {strides = array<i32>} : memref<36x512xf32, #tpu.memory_space<vmem>>, vector<4x32xf32>,
    %312 = vector.extract_strided_slice %57 {offsets = [0, 2], sizes = [4, 32], strides = [1, 1]} : vector<4x34xf32> to vector<4x32xf32>
    %c8_272 = arith.constant 8 : index
    %c416_273 = arith.constant 416 : index
    %313 = vector.load %arg8[%c8_272, %c416_273] : memref<36x512xf32, #tpu.memory_space<vmem>>, vector<4x32xf32>
    tpu.vector_store %arg8[%c8_272, %c416_273], %312 {strides = array<i32>} : memref<36x512xf32, #tpu.memory_space<vmem>>, vector<4x32xf32>,
    %314 = vector.extract_strided_slice %61 {offsets = [0, 0], sizes = [4, 32], strides = [1, 1]} : vector<4x34xf32> to vector<4x32xf32>
    %c12_274 = arith.constant 12 : index
    %c416_275 = arith.constant 416 : index
    %315 = vector.load %arg8[%c12_274, %c416_275] : memref<36x512xf32, #tpu.memory_space<vmem>>, vector<4x32xf32>
    tpu.vector_store %arg8[%c12_274, %c416_275], %314 {strides = array<i32>} : memref<36x512xf32, #tpu.memory_space<vmem>>, vector<4x32xf32>,
    %316 = vector.extract_strided_slice %61 {offsets = [0, 1], sizes = [4, 32], strides = [1, 1]} : vector<4x34xf32> to vector<4x32xf32>
    %c16_276 = arith.constant 16 : index
    %c416_277 = arith.constant 416 : index
    %317 = vector.load %arg8[%c16_276, %c416_277] : memref<36x512xf32, #tpu.memory_space<vmem>>, vector<4x32xf32>
    tpu.vector_store %arg8[%c16_276, %c416_277], %316 {strides = array<i32>} : memref<36x512xf32, #tpu.memory_space<vmem>>, vector<4x32xf32>,
    %318 = vector.extract_strided_slice %61 {offsets = [0, 2], sizes = [4, 32], strides = [1, 1]} : vector<4x34xf32> to vector<4x32xf32>
    %c20_278 = arith.constant 20 : index
    %c416_279 = arith.constant 416 : index
    %319 = vector.load %arg8[%c20_278, %c416_279] : memref<36x512xf32, #tpu.memory_space<vmem>>, vector<4x32xf32>
    tpu.vector_store %arg8[%c20_278, %c416_279], %318 {strides = array<i32>} : memref<36x512xf32, #tpu.memory_space<vmem>>, vector<4x32xf32>,
    %320 = vector.extract_strided_slice %65 {offsets = [0, 0], sizes = [4, 32], strides = [1, 1]} : vector<4x34xf32> to vector<4x32xf32>
    %c24_280 = arith.constant 24 : index
    %c416_281 = arith.constant 416 : index
    %321 = vector.load %arg8[%c24_280, %c416_281] : memref<36x512xf32, #tpu.memory_space<vmem>>, vector<4x32xf32>
    tpu.vector_store %arg8[%c24_280, %c416_281], %320 {strides = array<i32>} : memref<36x512xf32, #tpu.memory_space<vmem>>, vector<4x32xf32>,
    %322 = vector.extract_strided_slice %65 {offsets = [0, 1], sizes = [4, 32], strides = [1, 1]} : vector<4x34xf32> to vector<4x32xf32>
    %c28_282 = arith.constant 28 : index
    %c416_283 = arith.constant 416 : index
    %323 = vector.load %arg8[%c28_282, %c416_283] : memref<36x512xf32, #tpu.memory_space<vmem>>, vector<4x32xf32>
    tpu.vector_store %arg8[%c28_282, %c416_283], %322 {strides = array<i32>} : memref<36x512xf32, #tpu.memory_space<vmem>>, vector<4x32xf32>,
    %324 = vector.extract_strided_slice %65 {offsets = [0, 2], sizes = [4, 32], strides = [1, 1]} : vector<4x34xf32> to vector<4x32xf32>
    %c32_284 = arith.constant 32 : index
    %c416_285 = arith.constant 416 : index
    %325 = vector.load %arg8[%c32_284, %c416_285] : memref<36x512xf32, #tpu.memory_space<vmem>>, vector<4x32xf32>
    tpu.vector_store %arg8[%c32_284, %c416_285], %324 {strides = array<i32>} : memref<36x512xf32, #tpu.memory_space<vmem>>, vector<4x32xf32>,
    %326 = vector.extract_strided_slice %61 {offsets = [0, 0], sizes = [4, 32], strides = [1, 1]} : vector<4x34xf32> to vector<4x32xf32>
    %c0_286 = arith.constant 0 : index
    %c448 = arith.constant 448 : index
    %327 = vector.load %arg8[%c0_286, %c448] : memref<36x512xf32, #tpu.memory_space<vmem>>, vector<4x32xf32>
    tpu.vector_store %arg8[%c0_286, %c448], %326 {strides = array<i32>} : memref<36x512xf32, #tpu.memory_space<vmem>>, vector<4x32xf32>,
    %328 = vector.extract_strided_slice %61 {offsets = [0, 1], sizes = [4, 32], strides = [1, 1]} : vector<4x34xf32> to vector<4x32xf32>
    %c4_287 = arith.constant 4 : index
    %c448_288 = arith.constant 448 : index
    %329 = vector.load %arg8[%c4_287, %c448_288] : memref<36x512xf32, #tpu.memory_space<vmem>>, vector<4x32xf32>
    tpu.vector_store %arg8[%c4_287, %c448_288], %328 {strides = array<i32>} : memref<36x512xf32, #tpu.memory_space<vmem>>, vector<4x32xf32>,
    %330 = vector.extract_strided_slice %61 {offsets = [0, 2], sizes = [4, 32], strides = [1, 1]} : vector<4x34xf32> to vector<4x32xf32>
    %c8_289 = arith.constant 8 : index
    %c448_290 = arith.constant 448 : index
    %331 = vector.load %arg8[%c8_289, %c448_290] : memref<36x512xf32, #tpu.memory_space<vmem>>, vector<4x32xf32>
    tpu.vector_store %arg8[%c8_289, %c448_290], %330 {strides = array<i32>} : memref<36x512xf32, #tpu.memory_space<vmem>>, vector<4x32xf32>,
    %332 = vector.extract_strided_slice %65 {offsets = [0, 0], sizes = [4, 32], strides = [1, 1]} : vector<4x34xf32> to vector<4x32xf32>
    %c12_291 = arith.constant 12 : index
    %c448_292 = arith.constant 448 : index
    %333 = vector.load %arg8[%c12_291, %c448_292] : memref<36x512xf32, #tpu.memory_space<vmem>>, vector<4x32xf32>
    tpu.vector_store %arg8[%c12_291, %c448_292], %332 {strides = array<i32>} : memref<36x512xf32, #tpu.memory_space<vmem>>, vector<4x32xf32>,
    %334 = vector.extract_strided_slice %65 {offsets = [0, 1], sizes = [4, 32], strides = [1, 1]} : vector<4x34xf32> to vector<4x32xf32>
    %c16_293 = arith.constant 16 : index
    %c448_294 = arith.constant 448 : index
    %335 = vector.load %arg8[%c16_293, %c448_294] : memref<36x512xf32, #tpu.memory_space<vmem>>, vector<4x32xf32>
    tpu.vector_store %arg8[%c16_293, %c448_294], %334 {strides = array<i32>} : memref<36x512xf32, #tpu.memory_space<vmem>>, vector<4x32xf32>,
    %336 = vector.extract_strided_slice %65 {offsets = [0, 2], sizes = [4, 32], strides = [1, 1]} : vector<4x34xf32> to vector<4x32xf32>
    %c20_295 = arith.constant 20 : index
    %c448_296 = arith.constant 448 : index
    %337 = vector.load %arg8[%c20_295, %c448_296] : memref<36x512xf32, #tpu.memory_space<vmem>>, vector<4x32xf32>
    tpu.vector_store %arg8[%c20_295, %c448_296], %336 {strides = array<i32>} : memref<36x512xf32, #tpu.memory_space<vmem>>, vector<4x32xf32>,
    %338 = vector.extract_strided_slice %69 {offsets = [0, 0], sizes = [4, 32], strides = [1, 1]} : vector<4x34xf32> to vector<4x32xf32>
    %c24_297 = arith.constant 24 : index
    %c448_298 = arith.constant 448 : index
    %339 = vector.load %arg8[%c24_297, %c448_298] : memref<36x512xf32, #tpu.memory_space<vmem>>, vector<4x32xf32>
    tpu.vector_store %arg8[%c24_297, %c448_298], %338 {strides = array<i32>} : memref<36x512xf32, #tpu.memory_space<vmem>>, vector<4x32xf32>,
    %340 = vector.extract_strided_slice %69 {offsets = [0, 1], sizes = [4, 32], strides = [1, 1]} : vector<4x34xf32> to vector<4x32xf32>
    %c28_299 = arith.constant 28 : index
    %c448_300 = arith.constant 448 : index
    %341 = vector.load %arg8[%c28_299, %c448_300] : memref<36x512xf32, #tpu.memory_space<vmem>>, vector<4x32xf32>
    tpu.vector_store %arg8[%c28_299, %c448_300], %340 {strides = array<i32>} : memref<36x512xf32, #tpu.memory_space<vmem>>, vector<4x32xf32>,
    %342 = vector.extract_strided_slice %69 {offsets = [0, 2], sizes = [4, 32], strides = [1, 1]} : vector<4x34xf32> to vector<4x32xf32>
    %c32_301 = arith.constant 32 : index
    %c448_302 = arith.constant 448 : index
    %343 = vector.load %arg8[%c32_301, %c448_302] : memref<36x512xf32, #tpu.memory_space<vmem>>, vector<4x32xf32>
    tpu.vector_store %arg8[%c32_301, %c448_302], %342 {strides = array<i32>} : memref<36x512xf32, #tpu.memory_space<vmem>>, vector<4x32xf32>,
    %344 = vector.extract_strided_slice %65 {offsets = [0, 0], sizes = [4, 32], strides = [1, 1]} : vector<4x34xf32> to vector<4x32xf32>
    %c0_303 = arith.constant 0 : index
    %c480 = arith.constant 480 : index
    %345 = vector.load %arg8[%c0_303, %c480] : memref<36x512xf32, #tpu.memory_space<vmem>>, vector<4x32xf32>
    tpu.vector_store %arg8[%c0_303, %c480], %344 {strides = array<i32>} : memref<36x512xf32, #tpu.memory_space<vmem>>, vector<4x32xf32>,
    %346 = vector.extract_strided_slice %65 {offsets = [0, 1], sizes = [4, 32], strides = [1, 1]} : vector<4x34xf32> to vector<4x32xf32>
    %c4_304 = arith.constant 4 : index
    %c480_305 = arith.constant 480 : index
    %347 = vector.load %arg8[%c4_304, %c480_305] : memref<36x512xf32, #tpu.memory_space<vmem>>, vector<4x32xf32>
    tpu.vector_store %arg8[%c4_304, %c480_305], %346 {strides = array<i32>} : memref<36x512xf32, #tpu.memory_space<vmem>>, vector<4x32xf32>,
    %348 = vector.extract_strided_slice %65 {offsets = [0, 2], sizes = [4, 32], strides = [1, 1]} : vector<4x34xf32> to vector<4x32xf32>
    %c8_306 = arith.constant 8 : index
    %c480_307 = arith.constant 480 : index
    %349 = vector.load %arg8[%c8_306, %c480_307] : memref<36x512xf32, #tpu.memory_space<vmem>>, vector<4x32xf32>
    tpu.vector_store %arg8[%c8_306, %c480_307], %348 {strides = array<i32>} : memref<36x512xf32, #tpu.memory_space<vmem>>, vector<4x32xf32>,
    %350 = vector.extract_strided_slice %69 {offsets = [0, 0], sizes = [4, 32], strides = [1, 1]} : vector<4x34xf32> to vector<4x32xf32>
    %c12_308 = arith.constant 12 : index
    %c480_309 = arith.constant 480 : index
    %351 = vector.load %arg8[%c12_308, %c480_309] : memref<36x512xf32, #tpu.memory_space<vmem>>, vector<4x32xf32>
    tpu.vector_store %arg8[%c12_308, %c480_309], %350 {strides = array<i32>} : memref<36x512xf32, #tpu.memory_space<vmem>>, vector<4x32xf32>,
    %352 = vector.extract_strided_slice %69 {offsets = [0, 1], sizes = [4, 32], strides = [1, 1]} : vector<4x34xf32> to vector<4x32xf32>
    %c16_310 = arith.constant 16 : index
    %c480_311 = arith.constant 480 : index
    %353 = vector.load %arg8[%c16_310, %c480_311] : memref<36x512xf32, #tpu.memory_space<vmem>>, vector<4x32xf32>
    tpu.vector_store %arg8[%c16_310, %c480_311], %352 {strides = array<i32>} : memref<36x512xf32, #tpu.memory_space<vmem>>, vector<4x32xf32>,
    %354 = vector.extract_strided_slice %69 {offsets = [0, 2], sizes = [4, 32], strides = [1, 1]} : vector<4x34xf32> to vector<4x32xf32>
    %c20_312 = arith.constant 20 : index
    %c480_313 = arith.constant 480 : index
    %355 = vector.load %arg8[%c20_312, %c480_313] : memref<36x512xf32, #tpu.memory_space<vmem>>, vector<4x32xf32>
    tpu.vector_store %arg8[%c20_312, %c480_313], %354 {strides = array<i32>} : memref<36x512xf32, #tpu.memory_space<vmem>>, vector<4x32xf32>,
    %356 = vector.extract_strided_slice %73 {offsets = [0, 0], sizes = [4, 32], strides = [1, 1]} : vector<4x34xf32> to vector<4x32xf32>
    %c24_314 = arith.constant 24 : index
    %c480_315 = arith.constant 480 : index
    %357 = vector.load %arg8[%c24_314, %c480_315] : memref<36x512xf32, #tpu.memory_space<vmem>>, vector<4x32xf32>
    tpu.vector_store %arg8[%c24_314, %c480_315], %356 {strides = array<i32>} : memref<36x512xf32, #tpu.memory_space<vmem>>, vector<4x32xf32>,
    %358 = vector.extract_strided_slice %73 {offsets = [0, 1], sizes = [4, 32], strides = [1, 1]} : vector<4x34xf32> to vector<4x32xf32>
    %c28_316 = arith.constant 28 : index
    %c480_317 = arith.constant 480 : index
    %359 = vector.load %arg8[%c28_316, %c480_317] : memref<36x512xf32, #tpu.memory_space<vmem>>, vector<4x32xf32>
    tpu.vector_store %arg8[%c28_316, %c480_317], %358 {strides = array<i32>} : memref<36x512xf32, #tpu.memory_space<vmem>>, vector<4x32xf32>,
    %360 = vector.extract_strided_slice %73 {offsets = [0, 2], sizes = [4, 32], strides = [1, 1]} : vector<4x34xf32> to vector<4x32xf32>
    %c32_318 = arith.constant 32 : index
    %c480_319 = arith.constant 480 : index
    %361 = vector.load %arg8[%c32_318, %c480_319] : memref<36x512xf32, #tpu.memory_space<vmem>>, vector<4x32xf32>
    tpu.vector_store %arg8[%c32_318, %c480_319], %360 {strides = array<i32>} : memref<36x512xf32, #tpu.memory_space<vmem>>, vector<4x32xf32>,
    %c0_320 = arith.constant 0 : index
    %c0_321 = arith.constant 0 : index
    %362 = vector.load %arg3[%c0_320, %c0_321] : memref<8x36xf32, #tpu.memory_space<vmem>>, vector<8x36xf32>
    %c0_322 = arith.constant 0 : index
    %c0_323 = arith.constant 0 : index
    %363 = vector.load %arg8[%c0_322, %c0_323] : memref<36x512xf32, #tpu.memory_space<vmem>>, vector<36x512xf32>
    %cst = arith.constant dense<0.000000e+00> : vector<8x512xf32>
    %364 = tpu.matmul %362, %363, %cst {dimension_numbers = #tpu.dot_dimension_numbers<[1], [0], [0], [1], [0, 0, 1, 1], [], []>} : vector<8x36xf32>, vector<36x512xf32>, vector<8x512xf32> -> vector<8x512xf32>
    %c0_324 = arith.constant 0 : index
    %c0_325 = arith.constant 0 : index
    %365 = vector.load %arg4[%c0_324, %c0_325] : memref<8x1xf32, #tpu.memory_space<vmem>>, vector<8x1xf32>
    %366 = vector.broadcast %365 : vector<8x1xf32> to vector<8x512xf32>
    %367 = arith.addf %364, %366 : vector<8x512xf32>
    %368 = vector.shape_cast %367 : vector<8x512xf32> to vector<1x8x512xf32>
    %c0_326 = arith.constant 0 : index
    %c0_327 = arith.constant 0 : index
    %c0_328 = arith.constant 0 : index
    %369 = vector.load %arg5[%c0_326, %c0_327, %c0_328] : memref<1x8x512xf32, #tpu.memory_space<vmem>>, vector<1x8x512xf32>
    tpu.vector_store %arg5[%c0_326, %c0_327, %c0_328], %368 {strides = array<i32>} : memref<1x8x512xf32, #tpu.memory_space<vmem>>, vector<1x8x512xf32>,
    %cst_329 = arith.constant dense<0.000000e+00> : vector<8xf32>
    %370 = vector.multi_reduction <add>, %367, %cst_329 [1] : vector<8x512xf32> to vector<8xf32>
    %371 = vector.shape_cast %370 : vector<8xf32> to vector<8x1xf32>
    %372 = vector.shape_cast %371 : vector<8x1xf32> to vector<1x1x8x1xf32>
    %c0_330 = arith.constant 0 : index
    %c0_331 = arith.constant 0 : index
    %c0_332 = arith.constant 0 : index
    %c0_333 = arith.constant 0 : index
    %373 = vector.load %arg6[%c0_330, %c0_331, %c0_332, %c0_333] : memref<1x1x8x1xf32, #tpu.memory_space<vmem>>, vector<1x1x8x1xf32>
    tpu.vector_store %arg6[%c0_330, %c0_331, %c0_332, %c0_333], %372 {strides = array<i32>} : memref<1x1x8x1xf32, #tpu.memory_space<vmem>>, vector<1x1x8x1xf32>,
    %374 = arith.mulf %367, %367 : vector<8x512xf32>
    %cst_334 = arith.constant dense<0.000000e+00> : vector<8xf32>
    %375 = vector.multi_reduction <add>, %374, %cst_334 [1] : vector<8x512xf32> to vector<8xf32>
    %376 = vector.shape_cast %375 : vector<8xf32> to vector<8x1xf32>
    %377 = vector.shape_cast %376 : vector<8x1xf32> to vector<1x1x8x1xf32>
    %c0_335 = arith.constant 0 : index
    %c0_336 = arith.constant 0 : index
    %c0_337 = arith.constant 0 : index
    %c0_338 = arith.constant 0 : index
    %378 = vector.load %arg7[%c0_335, %c0_336, %c0_337, %c0_338] : memref<1x1x8x1xf32, #tpu.memory_space<vmem>>, vector<1x1x8x1xf32>
    tpu.vector_store %arg7[%c0_335, %c0_336, %c0_337, %c0_338], %377 {strides = array<i32>} : memref<1x1x8x1xf32, #tpu.memory_space<vmem>>, vector<1x1x8x1xf32>,
    return
  }
  func.func @transform_0(%arg0: i32, %arg1: i32) -> (i32, i32, i32, i32) {
    %c0_i32 = arith.constant 0 : i32
    %c0_i32_0 = arith.constant 0 : i32
    %c0_i32_1 = arith.constant 0 : i32
    %c0_i32_2 = arith.constant 0 : i32
    return %arg0, %c0_i32, %c0_i32_0, %c0_i32_1 : i32, i32, i32, i32
  }
  func.func @transform_1(%arg0: i32, %arg1: i32) -> (i32, i32) {
    %c0_i32 = arith.constant 0 : i32
    %c0_i32_0 = arith.constant 0 : i32
    %c0_i32_1 = arith.constant 0 : i32
    return %c0_i32, %c0_i32_0 : i32, i32
  }
  func.func @transform_2(%arg0: i32, %arg1: i32) -> (i32, i32) {
    %c0_i32 = arith.constant 0 : i32
    %c0_i32_0 = arith.constant 0 : i32
    %c0_i32_1 = arith.constant 0 : i32
    return %c0_i32, %c0_i32_0 : i32, i32
  }
  func.func @transform_3(%arg0: i32, %arg1: i32) -> (i32, i32, i32) {
    %c0_i32 = arith.constant 0 : i32
    %c0_i32_0 = arith.constant 0 : i32
    return %arg0, %c0_i32, %arg1 : i32, i32, i32
  }
  func.func @transform_4(%arg0: i32, %arg1: i32) -> (i32, i32, i32, i32) {
    %c0_i32 = arith.constant 0 : i32
    %c0_i32_0 = arith.constant 0 : i32
    %c0_i32_1 = arith.constant 0 : i32
    return %arg0, %arg1, %c0_i32, %c0_i32_0 : i32, i32, i32, i32
  }
  func.func @transform_5(%arg0: i32, %arg1: i32) -> (i32, i32, i32, i32) {
    %c0_i32 = arith.constant 0 : i32
    %c0_i32_0 = arith.constant 0 : i32
    %c0_i32_1 = arith.constant 0 : i32
    return %arg0, %arg1, %c0_i32, %c0_i32_0 : i32, i32, i32, i32
  }
}

</mosaic_0001>

<bundles_post_ra>
// kernel: tpu_custom_call.1
= control target key start
LH: loop header
LB: loop body
LE: loop exit
PB: predicated region body
PF: predicated region fallthrough
CT: control target
= control target key end

     0   :  { %s3078_s0 = inlined_call_operand.vmem [shape: f32[2,4,34,34], index: 0, kind: input, shape index: {}]   ;;  %s3079_s1 = inlined_call_operand.vmem [shape: f32[8,36], index: 1, kind: input, shape index: {}]   ;;  %s3080_s2 = inlined_call_operand.vmem [shape: f32[8,1], index: 2, kind: input, shape index: {}]   ;;  %s3081_s3 = inlined_call_operand.hbm [shape: f32[2,8,1024], index: 3, kind: output, shape index: {0}]   ;;  %s3082_s4 = inlined_call_operand.vmem [shape: f32[2,2,8,1], index: 4, kind: output, shape index: {1}]   ;;  %s3083_s5 = inlined_call_operand.vmem [shape: f32[2,2,8,1], index: 5, kind: output, shape index: {2}]  }
   0x1   :  { %3096 = sst [smem:[#allocation13_spill]] %s3078_s0 }
   0x2   :  { %3097 = sst [smem:[#allocation14_spill]] %s3079_s1 }
   0x3   :  { %3098 = sst [smem:[#allocation15_spill]] %s3080_s2 }
   0x4   :  { %11 = vsyncpa [#allocation4], 0 }
   0x5   :  { %13 = vsyncpa [#allocation4 + $0x1], 0  ;;  %s2036_s18 = smov 0   ;;  %s2038_s19 = smov 0  }
   0x6   :  { %s2040_s20 = smov 0   ;;  %s2042_s21 = smov 0  }
   0x7   :  { %s2044_s22 = smov 0   ;;  %s2046_s23 = smov 0  }
   0x8   :  { %s2048_s24 = smov 0   ;;  %s2050_s25 = smov 0  }
   0x9 LB: > { %s1703_s26 = sadd.s32 4294967295, %s1990_s25   ;;  %s1704_s27 = sadd.s32 4294967294, %s1990_s25   ;;  %s1990_s25 = sphi %s2050_s25, %s19_s25   ;;  %s1986_s24 = sphi %s2048_s24, %s3125_s24   ;;  %s1982_s23 = sphi %s2046_s23, %s3124_s23   ;;  %s1978_s22 = sphi %s2044_s22, %s3123_s22   ;;  %s1974_s21 = sphi %s2042_s21, %s3122_s21   ;;  %s1970_s20 = sphi %s2040_s20, %s3121_s20   ;;  %s1966_s19 = sphi %s2038_s19, %s3120_s19   ;;  %s1962_s18 = sphi %s2036_s18, %s3119_s18  }
   0xa   : > { %s28_s28 = sadd.s32 1, %s1982_s23  ;;  %s31_s29 = sadd.s32 1, %s1986_s24 }
   0xb   : > { %p29_p0 = scmp.ge.s32.totalorder %s28_s28, 2  ;;  %p118_p1 = scmp.ne.s32.totalorder %s1970_s20, %s1966_s19 }
   0xc   : > { %p119_p2 = scmp.eq.s32.totalorder %s1703_s26, 3  ;;  %p124_p5 = scmp.ne.s32.totalorder %s1966_s19, %s1962_s18 }
   0xd   : > { %s3127_s28 = smov (%p29_p0, %s28_s28), 0  ;;  %s3129_s29 = smov (!%p29_p0, %s31_s29), %s1986_s24 }
   0xe   : > { %s104_s30 = ssub.s32 %s1982_s23, %s3127_s28  ;;  %p2087_p3 = por %p119_p2, %p118_p1 }
   0xf   : > { %p33_p4 = scmp.ge.s32.totalorder %s3129_s29, 2  ;;  %p125_p6 = scmp.eq.s32.totalorder %s1704_s27, 3 }
  0x10   : > { %p1707_p7 = scmp.ge.s32.totalorder %s1990_s25, 1  ;;  %p213_p9 = scmp.lt.s32.totalorder %s1990_s25, 5 }
  0x11   : > { %s3131_s29 = smov (%p33_p4, %s3129_s29), 0  ;;  %p2096_p8 = por %p125_p6, %p124_p5 }
  0x12   : > { %3100 = sst [smem:[#allocation6_spill]] %s3131_s29  ;;  %s103_s8 = ssub.s32 %s1986_s24, %s3131_s29 }
  0x13   : > { %s108_s9 = sadd.s32 1, %s1970_s20  ;;  %s105_s10 = sor.u32 %s104_s30, %s103_s8 }
  0x14   : > { %p214_p10 = pnand %p1707_p7, %p213_p9  ;;  %p106_p11 = scmp.eq.s32.totalorder %s105_s10, 0 }
  0x16   : > { %s2105_s11 = scalar_select %p106_p11, %s1970_s20, %s108_s9  }
  0x17   : > { %217 = sbr.rel (%p214_p10) target bundleno = 769 (0x301), region = 32 }
  0x1c   : > { %p257_p12 = scmp.lt.s32.totalorder %s1978_s22, 1  ;;  %s1714_s14 = sshll.u32 %s1974_s21, 4  ;;  %vm392_vm0 = vcmask 1041409   ;;  %vm395_vm1 = vcmask 1042434   ;;  %vm398_vm2 = vcmask 1043459   ;;  %vm405_vm3 = vcmask 1045509  }
  0x1d   : > { %s3102_s0 = sld [smem:[#allocation13_spill]]  ;;  %vm408_vm4 = vcmask 1046534   ;;  %vm411_vm5 = vcmask 1047559   ;;  %vm401_vm6 = vcmask 257024   ;;  %s1992_s27 = smov 30   ;;  %vm416_vm7 = vcmask 261124  }
  0x1e   : > { %s2109_s12 = scalar_select %p257_p12, %s1978_s22, 1  ;;  %vm479_vm8 = vcmask 519424   ;;  %vm534_vm9 = vcmask 781824   ;;  %vm484_vm10 = vcmask 523524   ;;  %vm589_vm11 = vcmask 1044224  }
  0x1f   : > { %s1993_s30 = smov 126   ;;  %s1994_s8 = smov 62   ;;  %vm1290_vm12 = vcmask 1043456   ;;  %vm539_vm13 = vcmask 785924   ;;  %vm594_vm14 = vcmask 1048324   ;;  %vm1286_vm15 = vcmask 293888  }
  0x20   : > { %s1812_s13 = smul.u32 160, %s2109_s12  ;;  %s1995_s9 = smov 127  }
  0x21   : > { %s1996_s10 = smov 31   ;;  %s1999_s15 = smov 63  }
  0x22   : > { %s2000_s16 = smov 64   ;;  %s3116_s2 = sld [smem:[#allocation15_spill]] }
  0x23   : > { %s261_s17 = scalar_lea.vmem %s3102_s0, %s1812_s13  ;;  %s1997_s13 = smov 32  }
  0x24   : > { %s2116_s26 = scalar_lea.vmem %s261_s17, %s1714_s14  ;;  %s1998_s14 = smov 94  }
  0x25   : > { %v2119_v0 = vld [vmem:[%s2116_s26 + $0x7] sm:$0x1]  ;;  %v2122_v1 = vld [vmem:[%s2116_s26 + $0x2f] sm:$0x1]  ;;  %v2125_v2 = vld [vmem:[%s2116_s26 + $0x57] sm:$0x1] }
  0x26   : > { %v2128_v3 = vld [vmem:[%s2116_s26 + $0x7f] sm:$0x1]  ;;  %v716_v4 = vrot.slane %v2122_v1, 7  ;;  %v718_v5 = vrot.slane %v2125_v2, 6  ;;  %v1741_v6 = vld [vmem:[%s2116_s26 + $0x6] sm:$0x1] }
  0x27   : > { %v720_v7 = vrot.slane %v2128_v3, 5  ;;  %v1742_v8 = vld [vmem:[%s2116_s26 + $0x2e] sm:$0x1]  ;;  %v1743_v9 = vld [vmem:[%s2116_s26 + $0x56] sm:$0x1]  ;;  %v673_v10 = vrot.slane %v1741_v6, 4 }
  0x28   : > { %v717_v11 = vsel %vm392_vm0, %v716_v4, %v2119_v0  ;;  %v1744_v12 = vld [vmem:[%s2116_s26 + $0x7e] sm:$0x1]  ;;  %v665_v13 = vrot.slane %v1742_v8, 7  ;;  %v667_v14 = vrot.slane %v1743_v9, 6  ;;  %v2140_v15 = vld [vmem:[%s2116_s26 + $0x3] sm:$0x1] }
  0x29   : > { %v719_v16 = vsel %vm395_vm1, %v718_v5, %v717_v11  ;;  %v669_v17 = vrot.slane %v1744_v12, 5  ;;  %v2144_v18 = vld [vmem:[%s2116_s26 + $0x2b] sm:$0x1]  ;;  %v2147_v19 = vld [vmem:[%s2116_s26 + $0x53] sm:$0x1]  ;;  %v674_v20 = vrot.slane %v1742_v8, 3 }
  0x2a   : > { %v2150_v21 = vsel %vm398_vm2, %v720_v7, %v719_v16  ;;  %v666_v22 = vsel %vm392_vm0, %v665_v13, %v1741_v6  ;;  %v2154_v23 = vld [vmem:[%s2116_s26 + $0x7b] sm:$0x1]  ;;  %v506_v24 = vrot.slane %v2144_v18, 7  ;;  %v508_v25 = vrot.slane %v2147_v19, 6  ;;  %v1721_v26 = vld [vmem:[%s2116_s26 + $0x2] sm:$0x1] }
  0x2b   : > { %737 = vrot.lane.b32.xlu1 %v2150_v21, %s1992_s27  ;;  %v668_v27 = vsel %vm395_vm1, %v667_v14, %v666_v22  ;;  %v510_v28 = vrot.slane %v2154_v23, 5  ;;  %v1722_v29 = vld [vmem:[%s2116_s26 + $0x2a] sm:$0x1]  ;;  %v1723_v30 = vld [vmem:[%s2116_s26 + $0x52] sm:$0x1]  ;;  %v675_v31 = vsel %vm405_vm3, %v674_v20, %v673_v10  ;;  %v676_v32 = vrot.slane %v1743_v9, 2 }
  0x2c   : > { %v2167_v33 = vsel %vm398_vm2, %v669_v17, %v668_v27  ;;  %v507_v34 = vsel %vm392_vm0, %v506_v24, %v2140_v15  ;;  %v2172_v35 = vld [vmem:[%s2116_s26 + $0x7a] sm:$0x1]  ;;  %v453_v36 = vrot.slane %v1722_v29, 7  ;;  %v455_v37 = vrot.slane %v1723_v30, 6  ;;  %v2175_v38 = vld [vmem:[%s2116_s26 + $0x8] sm:$0x1] }
  0x2d   : > { %3103 = vst [vmem:[#allocation7_spill] sm:$0xff] %v2167_v33  ;;  %684 = vrot.lane.b32.xlu0 %v2167_v33, %s1993_s30  ;;  %v509_v39 = vsel %vm395_vm1, %v508_v25, %v507_v34  ;;  %v457_v40 = vrot.slane %v2172_v35, 5  ;;  %v2182_v41 = vld [vmem:[%s2116_s26 + $0x30] sm:$0x1]  ;;  %v2185_v42 = vld [vmem:[%s2116_s26 + $0x58] sm:$0x1]  ;;  %v677_v43 = vsel %vm408_vm4, %v676_v32, %v675_v31 }
  0x2e   : > { %v678_v44 = vrot.slane %v1744_v12, 1  ;;  %672 = vst.msk [vmem:[#allocation2 + $0x68] sm:$0xf] %vm401_vm6, %v2167_v33  ;;  %v2191_v45 = vsel %vm398_vm2, %v510_v28, %v509_v39  ;;  %v454_v46 = vsel %vm392_vm0, %v453_v36, %v1721_v26  ;;  %v2195_v47 = vld [vmem:[%s2116_s26 + $0x80] sm:$0x1]  ;;  %v769_v48 = vrot.slane %v2182_v41, 7 }
  0x2f   : > { %v771_v49 = vrot.slane %v2185_v42, 6  ;;  %v2200_v50 = vld [vmem:[%s2116_s26 + $0x4] sm:$0x1]  ;;  %527 = vrot.lane.b32.xlu1 %v2191_v45, %s1992_s27  ;;  %v456_v51 = vsel %vm395_vm1, %v455_v37, %v454_v46  ;;  %v773_v52 = vrot.slane %v2195_v47, 5  ;;  %v2210_v54 = vld [vmem:[%s2116_s26 + $0x2c] sm:$0x1] }
  0x30   : > { %v2207_v53 = vsel %vm411_vm5, %v678_v44, %v677_v43  ;;  %v2213_v55 = vld [vmem:[%s2116_s26 + $0x54] sm:$0x1]  ;;  %v461_v56 = vrot.slane %v1721_v26, 4  ;;  %v2216_v57 = vsel %vm398_vm2, %v457_v40, %v456_v51  ;;  %v770_v58 = vsel %vm392_vm0, %v769_v48, %v2175_v38  ;;  %v2221_v59 = vld [vmem:[%s2116_s26 + $0x7c] sm:$0x1]  ;;  %s2001_s17 = smov 96  }
  0x31   : > { %v561_v60 = vrot.slane %v2210_v54, 7  ;;  %v563_v61 = vrot.slane %v2213_v55, 6  ;;  %472 = vrot.lane.b32.xlu0 %v2216_v57, %s1993_s30  ;;  %v772_v62 = vsel %vm395_vm1, %v771_v49, %v770_v58  ;;  %v565_v63 = vrot.slane %v2221_v59, 5  ;;  %v2230_v6 = vld [vmem:[%s2116_s26 + $0x31] sm:$0x1]  ;;  %s3117_s1 = sld [smem:[#allocation14_spill]] }
  0x32   : > { %v462_v4 = vrot.slane %v1722_v29, 3  ;;  %v464_v5 = vrot.slane %v1723_v30, 2  ;;  %460 = vst.msk [vmem:[#allocation2 + $0x60] sm:$0xf] %vm401_vm6, %v2216_v57  ;;  %v2235_v7 = vsel %vm398_vm2, %v773_v52, %v772_v62  ;;  %v466_v9 = vrot.slane %v2172_v35, 1 }
  0x33   : > { %3104 = vst [vmem:[#allocation8_spill] sm:$0xff] %v2235_v7  ;;  %v562_v8 = vsel %vm392_vm0, %v561_v60, %v2200_v50  ;;  %v726_v10 = vrot.slane %v2119_v0, 4  ;;  %790 = vrot.lane.b32.xlu1 %v2235_v7, %s1994_s8  ;;  %v727_v13 = vrot.slane %v2122_v1, 3  ;;  %v729_v14 = vrot.slane %v2125_v2, 2  ;;  %v1737_v16 = vld [vmem:[%s2116_s26 + $0x2d] sm:$0x1] }
  0x34   : > { %v564_v11 = vsel %vm395_vm1, %v563_v61, %v562_v8  ;;  %v463_v12 = vsel %vm405_vm3, %v462_v4, %v461_v56  ;;  %848 = vst.msk [vmem:[#allocation2 + $0x10] sm:$0xf] %vm401_vm6, %v2235_v7  ;;  %v731_v20 = vrot.slane %v2128_v3, 1  ;;  %v2256_v22 = vld [vmem:[%s2116_s26 + $0x9] sm:$0x1]  ;;  %v822_v1 = vrot.slane %v2230_v6, 7 }
  0x35   : > { %v2251_v0 = vsel %vm398_vm2, %v565_v63, %v564_v11  ;;  %v465_v17 = vsel %vm408_vm4, %v464_v5, %v463_v12  ;;  %v2259_v24 = vld [vmem:[%s2116_s26 + $0x59] sm:$0x1]  ;;  %680 = vrot.lane.b32.xlu0 %v2207_v53, %s1995_s9  ;;  %v728_v2 = vsel %vm405_vm3, %v727_v13, %v726_v10  ;;  %v1738_v25 = vld [vmem:[%s2116_s26 + $0x55] sm:$0x1]  ;;  %v1736_v27 = vld [vmem:[%s2116_s26 + $0x5] sm:$0x1] }
  0x36   : > { %642 = vst.msk [vmem:[#allocation2 + $0x8] sm:$0xf] %vm401_vm6, %v2251_v0  ;;  %v2269_v26 = vsel %vm411_vm5, %v466_v9, %v465_v17  ;;  %v730_v3 = vsel %vm408_vm4, %v729_v14, %v728_v2  ;;  %v616_v28 = vrot.slane %v1737_v16, 7  ;;  %v2276_v29 = vld [vmem:[%s2116_s26 + $0x81] sm:$0x1]  ;;  %v823_v30 = vsel %vm392_vm0, %v822_v1, %v2256_v22 }
  0x37   : > { %582 = vrot.lane.b32.xlu1 %v2251_v0, %s1994_s8  ;;  %v824_v31 = vrot.slane %v2259_v24, 6  ;;  %v516_v32 = vrot.slane %v2140_v15, 4  ;;  %v2283_v34 = vsel %vm411_vm5, %v731_v20, %v730_v3  ;;  %v1739_v35 = vld [vmem:[%s2116_s26 + $0x7d] sm:$0x1]  ;;  %v618_v36 = vrot.slane %v1738_v25, 6 }
  0x38   : > { %v517_v37 = vrot.slane %v2144_v18, 3  ;;  %v519_v39 = vrot.slane %v2147_v19, 2  ;;  %v617_v40 = vsel %vm392_vm0, %v616_v28, %v1736_v27  ;;  %v626_v43 = vrot.slane %v1736_v27, 4  ;;  %v2294_v49 = vld [vmem:[%s2116_s26 + $0x36] sm:$0x1] }
  0x39   : > { %468 = vrot.lane.b32.xlu0 %v2269_v26, %s1995_s9  ;;  %v627_v44 = vrot.slane %v1737_v16, 3  ;;  %v826_v15 = vrot.slane %v2276_v29, 5  ;;  %v629_v48 = vrot.slane %v1738_v25, 2  ;;  %v2297_v18 = vld [vmem:[%s2116_s26 + $0x5e] sm:$0x1]  ;;  %v825_v19 = vsel %vm395_vm1, %v824_v31, %v823_v30 }
  0x3a   : > { %v518_v46 = vsel %vm405_vm3, %v517_v37, %v516_v32  ;;  %v620_v51 = vrot.slane %v1739_v35, 5  ;;  %v521_v52 = vrot.slane %v2154_v23, 1  ;;  %v2305_v58 = vld [vmem:[%s2116_s26 + $0x86] sm:$0x1]  ;;  %v1717_v60 = vld [vmem:[%s2116_s26 + $0x29] sm:$0x1]  ;;  %v619_v61 = vsel %vm395_vm1, %v618_v36, %v617_v40 }
  0x3b   : > { %733 = vrot.lane.b32.xlu1 %v2283_v34, %s1996_s10  ;;  %v628_v56 = vsel %vm405_vm3, %v627_v44, %v626_v43  ;;  %v520_v62 = vsel %vm408_vm4, %v519_v39, %v518_v46  ;;  %v631_v63 = vrot.slane %v1739_v35, 1  ;;  %v2311_v4 = vld [vmem:[%s2116_s26 + $0xe] sm:$0x1]  ;;  %v779_v23 = vrot.slane %v2175_v38, 4  ;;  %v1716_v13 = vld [vmem:[%s2116_s26 + $0x1] sm:$0x1] }
  0x3c   : > { %v780_v5 = vrot.slane %v2182_v41, 3  ;;  %v1077_v8 = vrot.slane %v2294_v49, 7  ;;  %v1079_v9 = vrot.slane %v2297_v18, 6  ;;  %v2320_v10 = vsel %vm398_vm2, %v826_v15, %v825_v19  ;;  %v1718_v17 = vld [vmem:[%s2116_s26 + $0x51] sm:$0x1] }
  0x3d   : > { %722 = vrot.lane.b32.xlu0 %v2150_v21, %s1997_s13  ;;  %v630_v11 = vsel %vm408_vm4, %v629_v48, %v628_v56  ;;  %v1081_v12 = vrot.slane %v2305_v58, 5  ;;  %v435_v14 = vrot.slane %v1717_v60, 7  ;;  %v2328_v38 = vsel %vm398_vm2, %v620_v51, %v619_v61  ;;  %v2337_v1 = vld [vmem:[%s2116_s26 + $0x32] sm:$0x1]  ;;  %v2343_v28 = vld [vmem:[%s2116_s26 + $0x5a] sm:$0x1] }
  0x3e   : > { %v2331_v41 = vsel %vm411_vm5, %v521_v52, %v520_v62  ;;  %v1078_v16 = vsel %vm392_vm0, %v1077_v8, %v2311_v4  ;;  %v426_v20 = vrot.slane %v1716_v13, 4  ;;  %v782_v2 = vrot.slane %v2185_v42, 2  ;;  %v1719_v42 = vld [vmem:[%s2116_s26 + $0x79] sm:$0x1]  ;;  %v2357_v35 = vld [vmem:[%s2116_s26 + $0x82] sm:$0x1] }
  0x3f   : > { %512 = vrot.lane.b32.xlu1 %v2191_v45, %s1997_s13  ;;  %v784_v25 = vrot.slane %v2195_v47, 1  ;;  %v1080_v3 = vsel %vm395_vm1, %v1079_v9, %v1078_v16  ;;  %v427_v27 = vrot.slane %v1717_v60, 3  ;;  %v2348_v30 = vsel %vm411_vm5, %v631_v63, %v630_v11  ;;  %v2362_v43 = vld [vmem:[%s2116_s26 + $0xa] sm:$0x1]  ;;  %v2382_v61 = vld [vmem:[%s2116_s26 + $0x37] sm:$0x1] }
  0x40   : > { %v781_v31 = vsel %vm405_vm3, %v780_v5, %v779_v23  ;;  %v2352_v32 = vsel %vm398_vm2, %v1081_v12, %v1080_v3  ;;  %v571_v47 = vrot.slane %v2200_v50, 4  ;;  %v436_v36 = vsel %vm392_vm0, %v435_v14, %v1716_v13  ;;  %v2389_v5 = vld [vmem:[%s2116_s26 + $0x33] sm:$0x1]  ;;  %v2399_v11 = vld [vmem:[%s2116_s26 + $0xf] sm:$0x1] }
  0x41   : > { %843 = vrot.lane.b32.xlu0 %v2320_v10, %s1998_s14  ;;  %3105 = vst [vmem:[#allocation9_spill] sm:$0xff] %v2352_v32  ;;  %v437_v37 = vrot.slane %v1718_v17, 6  ;;  %v429_v39 = vrot.slane %v1718_v17, 2  ;;  %v572_v40 = vrot.slane %v2210_v54, 3  ;;  %1084 = vst.msk [vmem:[#allocation2 + $0x78] sm:$0xf] %vm401_vm6, %v2352_v32  ;;  %v428_v44 = vsel %vm405_vm3, %v427_v27, %v426_v20 }
  0x42   : > { %v574_v50 = vrot.slane %v2213_v55, 2  ;;  %v871_v15 = vrot.slane %v2337_v1, 7  ;;  %v873_v46 = vrot.slane %v2343_v28, 6  ;;  %v783_v54 = vsel %vm408_vm4, %v782_v2, %v781_v31  ;;  %v2405_v12 = vld [vmem:[%s2116_s26 + $0xb] sm:$0x1] }
  0x43   : > { %637 = vrot.lane.b32.xlu1 %v2328_v38, %s1998_s14  ;;  %v573_v48 = vsel %vm405_vm3, %v572_v40, %v571_v47  ;;  %v875_v19 = vrot.slane %v2357_v35, 5  ;;  %v832_v51 = vrot.slane %v2256_v22, 4  ;;  %v439_v52 = vrot.slane %v1719_v42, 5  ;;  %v2408_v13 = vld [vmem:[%s2116_s26 + $0x5b] sm:$0x1] }
  0x44   : > { %v431_v55 = vrot.slane %v1719_v42, 1  ;;  %v872_v56 = vsel %vm392_vm0, %v871_v15, %v2362_v43  ;;  %v833_v60 = vrot.slane %v2230_v6, 3  ;;  %v438_v62 = vsel %vm395_vm1, %v437_v37, %v436_v36  ;;  %v2411_v14 = vld [vmem:[%s2116_s26 + $0x83] sm:$0x1]  ;;  %v2419_v20 = vld [vmem:[%s2116_s26 + $0x38] sm:$0x1] }
  0x45   : > { %523 = vrot.lane.b32.xlu0 %v2331_v41, %s1996_s10  ;;  %v430_v22 = vsel %vm408_vm4, %v429_v39, %v428_v44  ;;  %v576_v63 = vrot.slane %v2221_v59, 1  ;;  %v874_v23 = vsel %vm395_vm1, %v873_v46, %v872_v56  ;;  %v575_v8 = vsel %vm408_vm4, %v574_v50, %v573_v48  ;;  %v2402_v59 = vld [vmem:[%s2116_s26 + $0x5f] sm:$0x1]  ;;  %v2422_v2 = vld [vmem:[%s2116_s26 + $0x60] sm:$0x1] }
  0x46   : > { %v2395_v6 = vsel %vm398_vm2, %v875_v19, %v874_v23  ;;  %v835_v9 = vrot.slane %v2259_v24, 2  ;;  %v2414_v16 = vsel %vm411_vm5, %v784_v25, %v783_v54  ;;  %v834_v17 = vsel %vm405_vm3, %v833_v60, %v832_v51  ;;  %v2435_v27 = vld [vmem:[%s2116_s26 + $0x10] sm:$0x1]  ;;  %v2438_v31 = vld [vmem:[%s2116_s26 + $0x88] sm:$0x1] }
  0x47   : > { %657 = vrot.lane.b32.xlu1 %v2348_v30, %s1993_s30  ;;  %v1128_v24 = vrot.slane %v2382_v61, 7  ;;  %878 = vst.msk [vmem:[#allocation2 + $0x70] sm:$0xf] %vm401_vm6, %v2395_v6  ;;  %v2429_v3 = vsel %vm398_vm2, %v439_v52, %v438_v62  ;;  %v2432_v25 = vsel %vm411_vm5, %v431_v55, %v430_v22  ;;  %v2441_v42 = vld [vmem:[%s2116_s26 + $0x28] sm:$0x1]  ;;  %v2444_v47 = vsel %vm411_vm5, %v576_v63, %v575_v8 }
  0x48   : > { %3106 = vst [vmem:[#allocation10_spill] sm:$0xff] %v2429_v3  ;;  %v837_v36 = vrot.slane %v2276_v29, 1  ;;  %v922_v37 = vrot.slane %v2389_v5, 7  ;;  %v924_v39 = vrot.slane %v2408_v13, 6  ;;  %v2450_v40 = vld [vmem:[%s2116_s26 + $0x50] sm:$0x1]  ;;  %v836_v44 = vsel %vm408_vm4, %v835_v9, %v834_v17 }
  0x49   : > { %653 = vrot.lane.b32.xlu0 %v2328_v38, %s1995_s9  ;;  %v926_v50 = vrot.slane %v2411_v14, 5  ;;  %v1181_v15 = vrot.slane %v2419_v20, 7  ;;  %v1183_v46 = vrot.slane %v2422_v2, 6  ;;  %v2459_v29 = vld [vmem:[%s2116_s26 + $0x78] sm:$0x1]  ;;  %v2463_v54 = vsel %vm392_vm0, %v1128_v24, %v2399_v11 }
  0x4a   : > { %v923_v19 = vsel %vm392_vm0, %v922_v37, %v2405_v12  ;;  %v1185_v51 = vrot.slane %v2438_v31, 5  ;;  %v2470_v52 = vld [vmem:[%s2116_s26] sm:$0x1]  ;;  %v391_v60 = vrot.slane %v2441_v42, 7  ;;  %v394_v62 = vrot.slane %v2450_v40, 6 }
  0x4b   : > { %786 = vrot.lane.b32.xlu1 %v2414_v16, %s1999_s15  ;;  %v925_v55 = vsel %vm395_vm1, %v924_v39, %v923_v19  ;;  %v1182_v56 = vsel %vm392_vm0, %v1181_v15, %v2435_v27  ;;  %v2480_v22 = vld [vmem:[%s2116_s26 + $0x34] sm:$0x1]  ;;  %v2483_v63 = vsel %vm411_vm5, %v837_v36, %v836_v44  ;;  %v397_v9 = vrot.slane %v2459_v29, 5  ;;  %v2491_v17 = vld [vmem:[%s2116_s26 + $0x5c] sm:$0x1] }
  0x4c   : > { %v2486_v23 = vsel %vm398_vm2, %v926_v50, %v925_v55  ;;  %v1184_v8 = vsel %vm395_vm1, %v1183_v46, %v1182_v56  ;;  %v2494_v24 = vld [vmem:[%s2116_s26 + $0x84] sm:$0x1]  ;;  %v393_v36 = vsel %vm392_vm0, %v391_v60, %v2470_v52  ;;  %v879_v39 = vrot.slane %v2362_v43, 4  ;;  %v2506_v50 = vld [vmem:[%s2116_s26 + $0xc] sm:$0x1] }
  0x4d   : > { %775 = vrot.lane.b32.xlu0 %v2235_v7, %s2000_s16  ;;  %v2499_v37 = vsel %vm398_vm2, %v1185_v51, %v1184_v8  ;;  %v880_v44 = vrot.slane %v2337_v1, 3  ;;  %v396_v15 = vsel %vm395_vm1, %v394_v62, %v393_v36  ;;  %v882_v46 = vrot.slane %v2343_v28, 2  ;;  %v2521_v60 = vld [vmem:[%s2116_s26 + $0x39] sm:$0x1]  ;;  %v2524_v28 = vld [vmem:[%s2116_s26 + $0x61] sm:$0x1] }
  0x4e   : > { %v884_v19 = vrot.slane %v2357_v35, 1  ;;  %v975_v51 = vrot.slane %v2480_v22, 7  ;;  %v2515_v55 = vsel %vm398_vm2, %v397_v9, %v396_v15  ;;  %v977_v1 = vrot.slane %v2491_v17, 6  ;;  %v2527_v35 = vld [vmem:[%s2116_s26 + $0x87] sm:$0x1] }
  0x4f   : > { %441 = vrot.lane.b32.xlu1 %v2429_v3, %s1995_s9  ;;  %v881_v43 = vsel %vm405_vm3, %v880_v44, %v879_v39  ;;  %v979_v56 = vrot.slane %v2494_v24, 5  ;;  %402 = vst.msk [vmem:[#allocation2] sm:$0xf] %vm401_vm6, %v2515_v55  ;;  %v1138_v9 = vrot.slane %v2399_v11, 4  ;;  %v1139_v36 = vrot.slane %v2382_v61, 3 }
  0x50   : > { %v883_v62 = vsel %vm408_vm4, %v882_v46, %v881_v43  ;;  %v976_v8 = vsel %vm392_vm0, %v975_v51, %v2506_v50  ;;  %v2537_v39 = vld [vmem:[%s2116_s26 + $0x89] sm:$0x1]  ;;  %v1141_v46 = vrot.slane %v2402_v59, 2  ;;  %v1143_v43 = vrot.slane %v2527_v35, 1  ;;  %v2548_v51 = vld [vmem:[%s2116_s26 + $0x11] sm:$0x1] }
  0x51   : > { %1096 = vrot.lane.b32.xlu0 %v2352_v32, %s1993_s30  ;;  %v2542_v44 = vsel %vm411_vm5, %v884_v19, %v883_v62  ;;  %v978_v15 = vsel %vm395_vm1, %v977_v1, %v976_v8  ;;  %v1140_v61 = vsel %vm405_vm3, %v1139_v36, %v1138_v9  ;;  %v1234_v48 = vrot.slane %v2521_v60, 7  ;;  %v1777_v62 = vld [vmem:[%s2116_s26 + $0x35] sm:$0x1]  ;;  %v1778_v32 = vld [vmem:[%s2116_s26 + $0x5d] sm:$0x1] }
  0x52   : > { %3107 = vst [vmem:[#allocation11_spill] sm:$0xff] %v2542_v44  ;;  %v2551_v11 = vsel %vm398_vm2, %v979_v56, %v978_v15  ;;  %v1236_v19 = vrot.slane %v2524_v28, 6  ;;  %v1191_v1 = vrot.slane %v2435_v27, 4  ;;  %v1142_v56 = vsel %vm408_vm4, %v1141_v46, %v1140_v61  ;;  %v1779_v36 = vld [vmem:[%s2116_s26 + $0x85] sm:$0x1] }
  0x53   : > { %567 = vrot.lane.b32.xlu1 %v2251_v0, %s2000_s16  ;;  %3108 = vst [vmem:[#allocation12_spill] sm:$0xff] %v2551_v11  ;;  %1054 = vst.msk [vmem:[#allocation2 + $0x18] sm:$0xf] %vm401_vm6, %v2551_v11  ;;  %v1238_v8 = vrot.slane %v2537_v39, 5  ;;  %v932_v9 = vrot.slane %v2405_v12, 4  ;;  %v2568_v15 = vsel %vm411_vm5, %v1143_v43, %v1142_v56  ;;  %v1235_v3 = vsel %vm392_vm0, %v1234_v48, %v2548_v51 }
  0x54   : > { %v933_v44 = vrot.slane %v2389_v5, 3  ;;  %v935_v27 = vrot.slane %v2408_v13, 2  ;;  %v1776_v7 = vld [vmem:[%s2116_s26 + $0xd] sm:$0x1]  ;;  %v1237_v46 = vsel %vm395_vm1, %v1236_v19, %v1235_v3  ;;  %v937_v61 = vrot.slane %v2411_v14, 1  ;;  %s2002_s26 = smov 95  }
  0x55   : > { %445 = vrot.lane.b32.xlu0 %v2432_v25, %s1993_s30  ;;  %v1028_v12 = vrot.slane %v1777_v62, 7  ;;  %v1030_v11 = vrot.slane %v1778_v32, 6  ;;  %v403_v43 = vrot.slane %v2470_v52, 4  ;;  %v2581_v56 = vsel %vm398_vm2, %v1238_v8, %v1237_v46  ;;  %434 = vst.msk [vmem:[#allocation2 + $0x20] sm:$0xf0] %vm416_vm7, %v2432_v25 }
  0x56   : > { %v934_v48 = vsel %vm405_vm3, %v933_v44, %v932_v9  ;;  %v1032_v5 = vrot.slane %v1779_v36, 5  ;;  %v1038_v3 = vrot.slane %v1776_v7, 4  ;;  %652 = vst.msk [vmem:[#allocation2 + $0x28] sm:$0xf0] %vm416_vm7, %v2348_v30  ;;  %858 = vst.msk [vmem:[#allocation2 + $0x30] sm:$0xf0] %vm416_vm7, %v2483_v63 }
  0x57   : > { %704 = vrot.lane.b32.xlu1 %v2167_v33, %s1996_s10  ;;  %v936_v13 = vsel %vm408_vm4, %v935_v27, %v934_v48  ;;  %v1029_v33 = vsel %vm392_vm0, %v1028_v12, %v1776_v7  ;;  %v1039_v44 = vrot.slane %v1777_v62, 3  ;;  %v1041_v19 = vrot.slane %v1778_v32, 2 }
  0x58   : > { %v2589_v14 = vsel %vm411_vm5, %v937_v61, %v936_v13  ;;  %v1031_v52 = vsel %vm395_vm1, %v1030_v11, %v1029_v33  ;;  %v1043_v8 = vrot.slane %v1779_v36, 1  ;;  %v1192_v33 = vrot.slane %v2419_v20, 3 }
  0x59   : > { %578 = vrot.lane.b32.xlu0 %v2444_v47, %s1999_s15  ;;  %v2601_v7 = vsel %vm398_vm2, %v1032_v5, %v1031_v52  ;;  %v1194_v11 = vrot.slane %v2422_v2, 2  ;;  %v1040_v9 = vsel %vm405_vm3, %v1039_v44, %v1038_v3  ;;  %v1196_v27 = vrot.slane %v2438_v31, 1 }
  0x5a   : > { %v404_v46 = vrot.slane %v2441_v42, 3  ;;  %v407_v32 = vrot.slane %v2450_v40, 2  ;;  %v1042_v62 = vsel %vm408_vm4, %v1041_v19, %v1040_v9  ;;  %v1193_v61 = vsel %vm405_vm3, %v1192_v33, %v1191_v1  ;;  %v3114_v9 = vld [vmem:[#allocation7_spill] sm:$0xff] }
  0x5b   : > { %828 = vrot.lane.b32.xlu1 %v2320_v10, %s2001_s17  ;;  %v410_v36 = vrot.slane %v2459_v29, 1  ;;  %v1132_v20 = vrot.slane %v2527_v35, 5  ;;  %v2616_v2 = vsel %vm411_vm5, %v1043_v8, %v1042_v62  ;;  %v1195_v31 = vsel %vm408_vm4, %v1194_v11, %v1193_v61  ;;  %v3113_v11 = vld [vmem:[#allocation10_spill] sm:$0xff] }
  0x5c   : > { %v406_v42 = vsel %vm405_vm3, %v404_v46, %v403_v43  ;;  %v3109_v40 = vrot.slane %v2402_v59, 6  ;;  %v1244_v1 = vrot.slane %v2548_v51, 4  ;;  %1064 = vst.msk [vmem:[#allocation2 + $0x38] sm:$0xf0] %vm416_vm7, %v2616_v2  ;;  %v2630_v29 = vsel %vm411_vm5, %v1196_v27, %v1195_v31 }
  0x5d   : > { %708 = vrot.lane.b32.xlu0 %v2207_v53, %s1992_s27  ;;  %v409_v35 = vsel %vm408_vm4, %v407_v32, %v406_v42  ;;  %v985_v48 = vrot.slane %v2506_v50, 4  ;;  %v986_v5 = vrot.slane %v2480_v22, 3  ;;  %v988_v59 = vrot.slane %v2491_v17, 2 }
  0x5e   : > { %v1131_v12 = vsel %vm395_vm1, %v3109_v40, %v2463_v54  ;;  %v2634_v43 = vsel %vm411_vm5, %v410_v36, %v409_v35  ;;  %v990_v54 = vrot.slane %v2494_v24, 1  ;;  %v1245_v51 = vrot.slane %v2521_v60, 3 }
  0x5f   : > { %890 = vrot.lane.b32.xlu1 %v2395_v6, %s1993_s30  ;;  %v1247_v13 = vrot.slane %v2524_v28, 2  ;;  %v1249_v3 = vrot.slane %v2537_v39, 1  ;;  %v2646_v52 = vsel %vm398_vm2, %v1132_v20, %v1131_v12  ;;  %v987_v50 = vsel %vm405_vm3, %v986_v5, %v985_v48 }
  0x60   : > { %v989_v22 = vsel %vm408_vm4, %v988_v59, %v987_v50  ;;  %v1246_v17 = vsel %vm405_vm3, %v1245_v51, %v1244_v1  ;;  %v1085_v39 = vrot.slane %v2311_v4, 4  ;;  %v1086_v44 = vrot.slane %v2294_v49, 3 }
  0x61   : > { %839 = vrot.lane.b32.xlu0 %v2483_v63, %s2002_s26  ;;  %v2654_v24 = vsel %vm411_vm5, %v990_v54, %v989_v22  ;;  %v1248_v60 = vsel %vm408_vm4, %v1247_v13, %v1246_v17  ;;  %v1088_v19 = vrot.slane %v2297_v18, 2  ;;  %v1090_v33 = vrot.slane %v2305_v58, 1  ;;  %v3110_v18 = vld [vmem:[#allocation8_spill] sm:$0xff]  ;;  %v3115_v13 = vld [vmem:[#allocation9_spill] sm:$0xff] }
  0x62   : > { %v2660_v28 = vsel %vm411_vm5, %v1249_v3, %v1248_v60  ;;  %v1087_v8 = vsel %vm405_vm3, %v1086_v44, %v1085_v39  ;;  %v3111_v58 = vld [vmem:[#allocation12_spill] sm:$0xff] }
  0x63   : > { %494 = vrot.lane.b32.xlu1 %v2216_v57, %s1996_s10  ;;  %v1089_v49 = vsel %vm408_vm4, %v1088_v19, %v1087_v8 }
  0x64   : > { %v2679_v4 = vsel %vm411_vm5, %v1090_v33, %v1089_v49 }
  0x65   : > { %1149 = vrot.lane.b32.xlu0 %v2646_v52, %s1992_s27 }
  0x67   : > { %622 = vrot.lane.b32.xlu1 %v2328_v38, %s2001_s17 }
  0x69   : > { %498 = vrot.lane.b32.xlu0 %v2269_v26, %s1992_s27 }
  0x6b   : > { %647 = vrot.lane.b32.xlu1 %v2251_v0, %s1993_s30 }
  0x6d   : > { %633 = vrot.lane.b32.xlu0 %v2348_v30, %s2002_s26 }
  0x6f   : > { %761 = vrot.lane.b32.xlu1 %v2283_v34, %s1994_s8 }
  0x71   : > { %757 = vrot.lane.b32.xlu0 %v2150_v21, %s1999_s15 }
  0x73   : > { %1092 = vrot.lane.b32.xlu1 %v2679_v4, %s1995_s9 }
  0x75   : > { %943 = vrot.lane.b32.xlu0 %v2486_v23, %s1992_s27 }
  0x77   : > { %418 = vrot.lane.b32.xlu1 %v2515_v55, %s1993_s30  ;;  %v3112_v55 = vld [vmem:[#allocation11_spill] sm:$0xff] }
  0x79   : > { %1202 = vrot.lane.b32.xlu0 %v2499_v37, %s1994_s8 }
  0x7b   : > { %553 = vrot.lane.b32.xlu1 %v2331_v41, %s1994_s8 }
  0x7d   : > { %549 = vrot.lane.b32.xlu0 %v2191_v45, %s1999_s15 }
  0x7f   : > { %700 = vrot.lane.b32.xlu1 %v2207_v53, %s1997_s13 }
  0x81   : > { %696 = vrot.lane.b32.xlu0 %v2328_v38, %s1992_s27 }
  0x83   : > { %814 = vrot.lane.b32.xlu1 %v2414_v16, %s1998_s14 }
  0x85   : > { %810 = vrot.lane.b32.xlu0 %v3110_v18, %s2002_s26 }
  0x87   : > { %996 = vrot.lane.b32.xlu1 %v3111_v58, %s1994_s8 }
  0x89   : > { %886 = vrot.lane.b32.xlu0 %v3112_v55, %s1995_s9 }
  0x8b   : > { %1145 = vrot.lane.b32.xlu1 %v2568_v15, %s1996_s10 }
  0x8d   : > { %1134 = vrot.lane.b32.xlu0 %v2646_v52, %s1997_s13 }
  0x8f   : > { %486 = vrot.lane.b32.xlu1 %v3113_v11, %s1992_s27 }
  0x91   : > { %1255 = vrot.lane.b32.xlu0 %v2581_v56, %s1998_s14 }
  0x93   : > { %604 = vrot.lane.b32.xlu1 %v2251_v0, %s2002_s26 }
  0x95   : > { %490 = vrot.lane.b32.xlu0 %v2269_v26, %s1997_s13 }
  0x97   : > { %643 = vrot.lane.b32.xlu1 %v2444_v47, %s1995_s9 }
  0x99   : > { %608 = vrot.lane.b32.xlu0 %v2444_v47, %s1998_s14 }
  0x9b   : > { %753 = vrot.lane.b32.xlu1 %v2283_v34, %s2000_s16 }
  0x9d   : > { %749 = vrot.lane.b32.xlu0 %v3114_v9, %s1994_s8  ;;  %v738_v27 = vpop.permute.xlu1 %737 }
  0x9f   : > { %v685_v46 = vpop.permute.xlu0 %684  ;;  %939 = vrot.lane.b32.xlu1 %v2589_v14, %s1996_s10 }
  0xa0   : > { %687 = vst.msk [vmem:[#allocation2 + $0x88] sm:$0xf] %vm401_vm6, %v685_v46 }
  0xa1   : > { %928 = vrot.lane.b32.xlu0 %v2486_v23, %s1997_s13  ;;  %v528_v0 = vpop.permute.xlu1 %527  ;;  %740 = vst.msk [vmem:[#allocation2 + $0x88] sm:$0xf] %vm479_vm8, %v738_v27 }
  0xa3   : > { %v473_v32 = vpop.permute.xlu0 %472  ;;  %1065 = vrot.lane.b32.xlu1 %v2601_v7, %s1995_s9 }
  0xa4   : > { %475 = vst.msk [vmem:[#allocation2 + $0x80] sm:$0xf] %vm401_vm6, %v473_v32 }
  0xa5   : > { %1049 = vrot.lane.b32.xlu0 %v2601_v7, %s1998_s14  ;;  %v791_v62 = vpop.permute.xlu1 %790  ;;  %530 = vst.msk [vmem:[#allocation2 + $0x80] sm:$0xf] %vm479_vm8, %v528_v0 }
  0xa6   : > { %793 = vst.msk [vmem:[#allocation2 + $0x88] sm:$0xf] %vm534_vm9, %v791_v62 }
  0xa7   : > { %v681_v61 = vpop.permute.xlu0 %680  ;;  %1187 = vrot.lane.b32.xlu1 %v2499_v37, %s2000_s16 }
  0xa8   : > { %683 = vst.msk [vmem:[#allocation2 + $0x68] sm:$0xf0] %vm416_vm7, %v681_v61 }
  0xa9   : > { %1069 = vrot.lane.b32.xlu0 %v2616_v2, %s1993_s30  ;;  %v583_v36 = vpop.permute.xlu1 %582 }
  0xaa   : > { %585 = vst.msk [vmem:[#allocation2 + $0x80] sm:$0xf] %vm534_vm9, %v583_v36 }
  0xab   : > { %v469_v20 = vpop.permute.xlu0 %468  ;;  %413 = vrot.lane.b32.xlu1 %v2634_v43, %s1995_s9 }
  0xac   : > { %471 = vst.msk [vmem:[#allocation2 + $0x60] sm:$0xf0] %vm416_vm7, %v469_v20 }
  0xad   : > { %1198 = vrot.lane.b32.xlu0 %v2630_v29, %s1999_s15  ;;  %v734_v31 = vpop.permute.xlu1 %733 }
  0xae   : > { %736 = vst.msk [vmem:[#allocation2 + $0x68] sm:$0xf0] %vm484_vm10, %v734_v31 }
  0xaf   : > { %v723_v42 = vpop.permute.xlu0 %722  ;;  %545 = vrot.lane.b32.xlu1 %v2331_v41, %s2000_s16 }
  0xb0   : > { %725 = vst.msk [vmem:[#allocation2 + $0x68] sm:$0xf] %vm479_vm8, %v723_v42 }
  0xb1   : > { %541 = vrot.lane.b32.xlu0 %v2216_v57, %s1994_s8  ;;  %v513_v40 = vpop.permute.xlu1 %512 }
  0xb2   : > { %515 = vst.msk [vmem:[#allocation2 + $0x60] sm:$0xf] %vm479_vm8, %v513_v40 }
  0xb3   : > { %v844_v12 = vpop.permute.xlu0 %843  ;;  %692 = vrot.lane.b32.xlu1 %v2348_v30, %s1996_s10 }
  0xb4   : > { %846 = vst.msk [vmem:[#allocation2 + $0x88] sm:$0xf] %vm589_vm11, %v844_v12 }
  0xb5   : > { %688 = vrot.lane.b32.xlu0 %v2328_v38, %s1997_s13  ;;  %v638_v1 = vpop.permute.xlu1 %637 }
  0xb6   : > { %640 = vst.msk [vmem:[#allocation2 + $0x80] sm:$0xf] %vm589_vm11, %v638_v1 }
  0xb7   : > { %v524_v35 = vpop.permute.xlu0 %523  ;;  %806 = vrot.lane.b32.xlu1 %v2414_v16, %s2001_s17 }
  0xb8   : > { %526 = vst.msk [vmem:[#allocation2 + $0x60] sm:$0xf0] %vm484_vm10, %v524_v35 }
  0xb9   : > { %802 = vrot.lane.b32.xlu0 %v2150_v21, %s1998_s14  ;;  %v658_v43 = vpop.permute.xlu1 %657 }
  0xba   : > { %660 = vst.msk [vmem:[#allocation2 + $0x48] sm:$0xf0] %vm416_vm7, %v658_v43 }
  0xbb   : > { %v654_v30 = vpop.permute.xlu0 %653  ;;  %v1277_v48 = vld [vmem:[#allocation2 + $0x88] sm:$0xf]  ;;  %863 = vrot.lane.b32.xlu1 %v2483_v63, %s1993_s30 }
  0xbc   : > { %656 = vst.msk [vmem:[#allocation2 + $0x48] sm:$0xf] %vm401_vm6, %v654_v30  ;;  %1800 = vmatprep.subr.msk.mxu0 %vm1290_vm12, %v1277_v48 }
  0xbd   : > { %859 = vrot.lane.b32.xlu0 %v2320_v10, %s1995_s9  ;;  %v787_v38 = vpop.permute.xlu1 %786  ;;  %v1276_v5 = vld [vmem:[#allocation2 + $0x80] sm:$0xf] }
  0xbe   : > { %789 = vst.msk [vmem:[#allocation2 + $0x68] sm:$0xf0] %vm539_vm13, %v787_v38  ;;  %1801 = vmatpush1.msk.msra.mxu0 %vm1290_vm12, %v1276_v5 }
  0xbf   : > { %v776_v59 = vpop.permute.xlu0 %775  ;;  %992 = vrot.lane.b32.xlu1 %v2654_v24, %s1999_s15 }
  0xc0   : > { %778 = vst.msk [vmem:[#allocation2 + $0x68] sm:$0xf] %vm534_vm9, %v776_v59 }
  0xc1   : > { %981 = vrot.lane.b32.xlu0 %v3111_v58, %s2000_s16  ;;  %v442_v54 = vpop.permute.xlu1 %441 }
  0xc2   : > { %444 = vst.msk [vmem:[#allocation2 + $0x40] sm:$0xf] %vm401_vm6, %v442_v54 }
  0xc3   : > { %v1097_v51 = vpop.permute.xlu0 %1096  ;;  %1120 = vrot.lane.b32.xlu1 %v2679_v4, %s1992_s27 }
  0xc4   : > { %1099 = vst.msk [vmem:[#allocation2 + $0x98] sm:$0xf] %vm401_vm6, %v1097_v51 }
  0xc5   : > { %1116 = vrot.lane.b32.xlu0 %v3115_v13, %s1996_s10  ;;  %v568_v3 = vpop.permute.xlu1 %567 }
  0xc6   : > { %570 = vst.msk [vmem:[#allocation2 + $0x60] sm:$0xf] %vm534_vm9, %v568_v3 }
  0xc7   : > { %v446_v50 = vpop.permute.xlu0 %445  ;;  %1251 = vrot.lane.b32.xlu1 %v2660_v28, %s2002_s26 }
  0xc8   : > { %448 = vst.msk [vmem:[#allocation2 + $0x40] sm:$0xf0] %vm416_vm7, %v446_v50 }
  0xc9   : > { %1240 = vrot.lane.b32.xlu0 %v2581_v56, %s2001_s17  ;;  %v705_v22 = vpop.permute.xlu1 %704 }
  0xca   : > { %707 = vst.msk [vmem:[#allocation2 + $0x48] sm:$0xf] %vm479_vm8, %v705_v22 }
  0xcb   : > { %v579_v17 = vpop.permute.xlu0 %578  ;;  %481 = vrot.lane.b32.xlu1 %v2432_v25, %s1996_s10 }
  0xcc   : > { %581 = vst.msk [vmem:[#allocation2 + $0x60] sm:$0xf0] %vm539_vm13, %v579_v17 }
  0xcd   : > { %476 = vrot.lane.b32.xlu0 %v3113_v11, %s1997_s13  ;;  %v829_v60 = vpop.permute.xlu1 %828 }
  0xce   : > { %831 = vst.msk [vmem:[#allocation2 + $0x68] sm:$0xf] %vm589_vm11, %v829_v60 }
  0xcf   : > { %v709_v28 = vpop.permute.xlu0 %708  ;;  %600 = vrot.lane.b32.xlu1 %v2444_v47, %s2001_s17 }
  0xd0   : > { %711 = vst.msk [vmem:[#allocation2 + $0x48] sm:$0xf0] %vm484_vm10, %v709_v28 }
  0xd1   : > { %596 = vrot.lane.b32.xlu0 %v2191_v45, %s1998_s14  ;;  %v891_v56 = vpop.permute.xlu1 %890 }
  0xd2   : > { %893 = vst.msk [vmem:[#allocation2 + $0x90] sm:$0xf] %vm401_vm6, %v891_v56 }
  0xd3   : > { %v840_v25 = vpop.permute.xlu0 %839  ;;  %745 = vrot.lane.b32.xlu1 %v2207_v53, %s1999_s15 }
  0xd4   : > { %842 = vst.msk [vmem:[#allocation2 + $0x68] sm:$0xf0] %vm594_vm14, %v840_v25 }
  0xd5   : > { %741 = vrot.lane.b32.xlu0 %v3114_v9, %s2000_s16  ;;  %v495_v39 = vpop.permute.xlu1 %494 }
  0xd6   : > { %497 = vst.msk [vmem:[#allocation2 + $0x40] sm:$0xf] %vm479_vm8, %v495_v39 }
  0xd7   : > { %v1150_v47 = vpop.permute.xlu0 %1149  ;;  %914 = vrot.lane.b32.xlu1 %v3112_v55, %s1992_s27 }
  0xd8   : > { %1152 = vst.msk [vmem:[#allocation2 + $0x98] sm:$0xf] %vm479_vm8, %v1150_v47 }
  0xd9   : > { %910 = vrot.lane.b32.xlu0 %v2395_v6, %s1996_s10  ;;  %v623_v44 = vpop.permute.xlu1 %622 }
  0xda   : > { %625 = vst.msk [vmem:[#allocation2 + $0x60] sm:$0xf] %vm589_vm11, %v623_v44 }
  0xdb   : > { %v499_v53 = vpop.permute.xlu0 %498  ;;  %v1273_v19 = vld [vmem:[#allocation2 + $0x68] sm:$0xff]  ;;  %1045 = vrot.lane.b32.xlu1 %v2616_v2, %s2002_s26 }
  0xdc   : > { %501 = vst.msk [vmem:[#allocation2 + $0x40] sm:$0xf0] %vm484_vm10, %v499_v53  ;;  %1327 = vmatprep.subr.mxu0 %v1273_v19 }
  0xdd   : > { %1034 = vrot.lane.b32.xlu0 %v2601_v7, %s2001_s17  ;;  %v648_v8 = vpop.permute.xlu1 %647 }
  0xde   : > { %650 = vst.msk [vmem:[#allocation2 + $0x28] sm:$0xf] %vm401_vm6, %v648_v8 }
  0xdf   : > { %v634_v33 = vpop.permute.xlu0 %633  ;;  %1169 = vrot.lane.b32.xlu1 %v2646_v52, %s1999_s15 }
  0xe0   : > { %636 = vst.msk [vmem:[#allocation2 + $0x60] sm:$0xf0] %vm594_vm14, %v634_v33 }
  0xe1   : > { %1059 = vrot.lane.b32.xlu0 %v3111_v58, %s1993_s30  ;;  %v762_v49 = vpop.permute.xlu1 %761 }
  0xe2   : > { %764 = vst.msk [vmem:[#allocation2 + $0x48] sm:$0xf0] %vm539_vm13, %v762_v49 }
  0xe3   : > { %v758_v11 = vpop.permute.xlu0 %757  ;;  %531 = vrot.lane.b32.xlu1 %v2216_v57, %s2000_s16 }
  0xe4   : > { %760 = vst.msk [vmem:[#allocation2 + $0x48] sm:$0xf] %vm534_vm9, %v758_v11 }
  0xe5   : > { %1173 = vrot.lane.b32.xlu0 %v2568_v15, %s1994_s8  ;;  %v1093_v9 = vpop.permute.xlu1 %1092 }
  0xe6   : > { %1095 = vst.msk [vmem:[#allocation2 + $0x78] sm:$0xf0] %vm416_vm7, %v1093_v9 }
  0xe7   : > { %v944_v27 = vpop.permute.xlu0 %943  ;;  %v1272_v46 = vld [vmem:[#allocation2 + $0x60] sm:$0xff]  ;;  %794 = vrot.lane.b32.xlu1 %v2150_v21, %s2001_s17 }
  0xe8   : > { %946 = vst.msk [vmem:[#allocation2 + $0x90] sm:$0xf] %vm479_vm8, %v944_v27  ;;  %1328 = vmatpush1.msra.mxu0 %v1272_v46 }
  0xe9   : > { %536 = vrot.lane.b32.xlu0 %v2269_v26, %s1999_s15  ;;  %v419_v57 = vpop.permute.xlu1 %418 }
  0xea   : > { %421 = vst.msk [vmem:[#allocation2 + $0x20] sm:$0xf] %vm401_vm6, %v419_v57 }
  0xeb   : > { %v1203_v0 = vpop.permute.xlu0 %1202  ;;  %853 = vrot.lane.b32.xlu1 %v3110_v18, %s1993_s30 }
  0xec   : > { %1205 = vst.msk [vmem:[#allocation2 + $0x98] sm:$0xf] %vm534_vm9, %v1203_v0 }
  0xed   : > { %798 = vrot.lane.b32.xlu0 %v2283_v34, %s2002_s26  ;;  %v554_v32 = vpop.permute.xlu1 %553 }
  0xee   : > { %556 = vst.msk [vmem:[#allocation2 + $0x40] sm:$0xf0] %vm539_vm13, %v554_v32 }
  0xef   : > { %v550_v21 = vpop.permute.xlu0 %549  ;;  %967 = vrot.lane.b32.xlu1 %v2589_v14, %s1994_s8 }
  0xf0   : > { %552 = vst.msk [vmem:[#allocation2 + $0x40] sm:$0xf] %vm534_vm9, %v550_v21 }
  0xf1   : > { %963 = vrot.lane.b32.xlu0 %v2486_v23, %s1999_s15  ;;  %v701_v26 = vpop.permute.xlu1 %700 }
  0xf2   : > { %703 = vst.msk [vmem:[#allocation2 + $0x28] sm:$0xf0] %vm484_vm10, %v701_v26 }
  0xf3   : > { %v697_v18 = vpop.permute.xlu0 %696  ;;  %1112 = vrot.lane.b32.xlu1 %v2679_v4, %s1997_s13 }
  0xf4   : > { %699 = vst.msk [vmem:[#allocation2 + $0x28] sm:$0xf] %vm479_vm8, %v697_v18 }
  0xf5   : > { %1108 = vrot.lane.b32.xlu0 %v2601_v7, %s1992_s27  ;;  %v815_v34 = vpop.permute.xlu1 %814 }
  0xf6   : > { %817 = vst.msk [vmem:[#allocation2 + $0x48] sm:$0xf0] %vm594_vm14, %v815_v34 }
  0xf7   : > { %v811_v62 = vpop.permute.xlu0 %810  ;;  %1226 = vrot.lane.b32.xlu1 %v2630_v29, %s1998_s14 }
  0xf8   : > { %813 = vst.msk [vmem:[#allocation2 + $0x48] sm:$0xf] %vm589_vm11, %v811_v62 }
  0xf9   : > { %1222 = vrot.lane.b32.xlu0 %v2499_v37, %s2002_s26  ;;  %v997_v61 = vpop.permute.xlu1 %996 }
  0xfa   : > { %999 = vst.msk [vmem:[#allocation2 + $0x90] sm:$0xf] %vm534_vm9, %v997_v61 }
  0xfb   : > { %v887_v36 = vpop.permute.xlu0 %886  ;;  %591 = vrot.lane.b32.xlu1 %v2331_v41, %s2002_s26 }
  0xfc   : > { %889 = vst.msk [vmem:[#allocation2 + $0x70] sm:$0xf0] %vm416_vm7, %v887_v36 }
  0xfd   : > { %586 = vrot.lane.b32.xlu0 %v2191_v45, %s2001_s17  ;;  %v1146_v20 = vpop.permute.xlu1 %1145 }
  0xfe   : > { %1148 = vst.msk [vmem:[#allocation2 + $0x78] sm:$0xf0] %vm484_vm10, %v1146_v20 }
  0xff   : > { %v1135_v31 = vpop.permute.xlu0 %1134  ;;  %v1269_v42 = vld [vmem:[#allocation2 + $0x48] sm:$0xff]  ;;  %906 = vrot.lane.b32.xlu1 %v3112_v55, %s1997_s13 }
 0x100   : > { %1137 = vst.msk [vmem:[#allocation2 + $0x78] sm:$0xf] %vm479_vm8, %v1135_v31  ;;  %1329 = vmatprep.subr.mxu0 %v1269_v42 }
 0x101   : > { %902 = vrot.lane.b32.xlu0 %v2320_v10, %s1992_s27  ;;  %v487_v41 = vpop.permute.xlu1 %486 }
 0x102   : > { %489 = vst.msk [vmem:[#allocation2 + $0x20] sm:$0xf] %vm479_vm8, %v487_v41 }
 0x103   : > { %v1256_v37 = vpop.permute.xlu0 %1255  ;;  %1020 = vrot.lane.b32.xlu1 %v2654_v24, %s1998_s14 }
 0x104   : > { %1258 = vst.msk [vmem:[#allocation2 + $0x98] sm:$0xf] %vm589_vm11, %v1256_v37 }
 0x105   : > { %1016 = vrot.lane.b32.xlu0 %v3111_v58, %s2002_s26  ;;  %v605_v45 = vpop.permute.xlu1 %604 }
 0x106   : > { %607 = vst.msk [vmem:[#allocation2 + $0x40] sm:$0xf] %vm589_vm11, %v605_v45 }
 0x107   : > { %v491_v40 = vpop.permute.xlu0 %490  ;;  %1161 = vrot.lane.b32.xlu1 %v3115_v13, %s1994_s8 }
 0x108   : > { %493 = vst.msk [vmem:[#allocation2 + $0x20] sm:$0xf0] %vm484_vm10, %v491_v40 }
 0x109   : > { %1055 = vrot.lane.b32.xlu0 %v2654_v24, %s1995_s9  ;;  %v644_v12 = vpop.permute.xlu1 %643 }
 0x10a   : > { %646 = vst.msk [vmem:[#allocation2 + $0x8] sm:$0xf0] %vm416_vm7, %v644_v12 }
 0x10b   : > { %v609_v1 = vpop.permute.xlu0 %608  ;;  %v1279_v35 = vld [vmem:[#allocation2 + $0x98] sm:$0xf]  ;;  %849 = vrot.lane.b32.xlu1 %v2414_v16, %s1995_s9 }
 0x10c   : > { %611 = vst.msk [vmem:[#allocation2 + $0x40] sm:$0xf0] %vm594_vm14, %v609_v1  ;;  %1803 = vmatprep.subr.msk.mxu1 %vm1290_vm12, %v1279_v35 }
 0x10d   : > { %1165 = vrot.lane.b32.xlu0 %v2568_v15, %s2000_s16  ;;  %v754_v58 = vpop.permute.xlu1 %753 }
 0x10e   : > { %756 = vst.msk [vmem:[#allocation2 + $0x28] sm:$0xf0] %vm539_vm13, %v754_v58  ;;  %v1259_v58 = vld [vmem:[%s3117_s1] sm:$0xff]  ;;  %s2005_s1 = smov [#allocation3]  }
 0x10f   : > { %v750_v43 = vpop.permute.xlu0 %749  ;;  %959 = vrot.lane.b32.xlu1 %v2589_v14, %s2000_s16 }
 0x110   : > { %752 = vst.msk [vmem:[#allocation2 + $0x28] sm:$0xf] %vm534_vm9, %v750_v43 }
 0x111   : > { %955 = vrot.lane.b32.xlu0 %v2395_v6, %s1994_s8  ;;  %v940_v16 = vpop.permute.xlu1 %939 }
 0x112   : > { %942 = vst.msk [vmem:[#allocation2 + $0x70] sm:$0xf0] %vm484_vm10, %v940_v16 }
 0x113   : > { %v929_v30 = vpop.permute.xlu0 %928  ;;  %v1268_v48 = vld [vmem:[#allocation2 + $0x40] sm:$0xff]  ;;  %1104 = vrot.lane.b32.xlu1 %v2616_v2, %s1996_s10 }
 0x114   : > { %931 = vst.msk [vmem:[#allocation2 + $0x70] sm:$0xf] %vm479_vm8, %v929_v30  ;;  %1330 = vmatpush1.msra.mxu0 %v1268_v48 }
 0x115   : > { %1100 = vrot.lane.b32.xlu0 %v2601_v7, %s1997_s13  ;;  %v1066_v38 = vpop.permute.xlu1 %1065 }
 0x116   : > { %1068 = vst.msk [vmem:[#allocation2 + $0x58] sm:$0xf] %vm401_vm6, %v1066_v38 }
 0x117   : > { %v1050_v5 = vpop.permute.xlu0 %1049  ;;  %1218 = vrot.lane.b32.xlu1 %v2630_v29, %s2001_s17 }
 0x118   : > { %1052 = vst.msk [vmem:[#allocation2 + $0x90] sm:$0xf] %vm589_vm11, %v1050_v5 }
 0x119   : > { %1214 = vrot.lane.b32.xlu0 %v2646_v52, %s1998_s14  ;;  %v1188_v59 = vpop.permute.xlu1 %1187 }
 0x11a   : > { %1190 = vst.msk [vmem:[#allocation2 + $0x78] sm:$0xf] %vm534_vm9, %v1188_v59 }
 0x11b   : > { %v1070_v2 = vpop.permute.xlu0 %1069  ;;  %898 = vrot.lane.b32.xlu1 %v2483_v63, %s1996_s10  ;;  %s234_s10 = sand.u32 1, %s1966_s19  }
 0x11c   : > { %1072 = vst.msk [vmem:[#allocation2 + $0x58] sm:$0xf0] %vm416_vm7, %v1070_v2 }
 0x11d   : > { %894 = vrot.lane.b32.xlu0 %v2320_v10, %s1997_s13  ;;  %v414_v7 = vpop.permute.xlu1 %413  ;;  %s1708_s13 = sshll.u32 %s234_s10, 5 }
 0x11e   : > { %417 = vst.msk [vmem:[#allocation2] sm:$0xf0] %vm416_vm7, %v414_v7 }
 0x11f   : > { %v1199_v29 = vpop.permute.xlu0 %1198  ;;  %v1278_v54 = vld [vmem:[#allocation2 + $0x90] sm:$0xf]  ;;  %1012 = vrot.lane.b32.xlu1 %v2654_v24, %s2001_s17  ;;  %v2003_v24 = vmov 0.0  }
 0x120   : > { %1201 = vst.msk [vmem:[#allocation2 + $0x78] sm:$0xf0] %vm539_vm13, %v1199_v29  ;;  %1804 = vmatpush1.msk.msra.mxu1 %vm1290_vm12, %v1278_v54  ;;  %1367 = vmatprep.mubr.f32.mxu0 %v2003_v24 }
 0x121   : > { %1008 = vrot.lane.b32.xlu0 %v2486_v23, %s1998_s14  ;;  %v546_v63 = vpop.permute.xlu1 %545  ;;  %1438 = vmatprep.mubr.f32.mxu1 %v2003_v24  ;;  %s236_s14 = scalar_lea.vmem [#allocation3], %s1708_s13  ;;  %s1467_s13 = scalar_lea.sflag [#allocation4], %s234_s10 }
 0x122   : > { %548 = vst.msk [vmem:[#allocation2 + $0x20] sm:$0xf0] %vm539_vm13, %v546_v63  ;;  %s1499_s9 = sshll.u32 %s236_s14, 4  ;;  %s1500_s9 = int_to_ptr.vmem [resolvable:$true] %s1499_s9 }
 0x123   : > { %v542_v51 = vpop.permute.xlu0 %541  ;;  %1157 = vrot.lane.b32.xlu1 %v2679_v4, %s1999_s15  ;;  %s1898_s0 = scalar_lea.vmem %s1500_s9, 512 }
 0x124   : > { %544 = vst.msk [vmem:[#allocation2 + $0x20] sm:$0xf] %vm534_vm9, %v542_v51  ;;  %p1899_p13 = scmp.ne.s32.totalorder %s1500_s9, %s1898_s0 }
 0x125   : > { %1153 = vrot.lane.b32.xlu0 %v3115_v13, %s2000_s16  ;;  %v693_v10 = vpop.permute.xlu1 %692 }
 0x126   : > { %695 = vst.msk [vmem:[#allocation2 + $0x8] sm:$0xf0] %vm484_vm10, %v693_v10  ;;  %p1900_p0 = pnand %p1899_p13, %p2087_p3 }
 0x127   : > { %v689_v3 = vpop.permute.xlu0 %688  ;;  %951 = vrot.lane.b32.xlu1 %v3112_v55, %s1999_s15  ;;  %v2004_v55 = vmov 0   ;;  %s1807_s15 = sshll.u32 %s1974_s21, 2 }
 0x128   : > { %691 = vst.msk [vmem:[#allocation2 + $0x8] sm:$0xf] %vm479_vm8, %v689_v3  ;;  %1897 = vset.pattern.permute.xlu0 %v2004_v55  ;;  %p1901_p1 = pneg %p1900_p0 }
 0x129   : > { %947 = vrot.lane.b32.xlu0 %v2395_v6, %s2000_s16  ;;  %v807_v4 = vpop.permute.xlu1 %806  ;;  %s1808_s16 = sshll.u32 %s1978_s22, 3 }
 0x12a   : > { %809 = vst.msk [vmem:[#allocation2 + $0x28] sm:$0xf0] %vm594_vm14, %v807_v4 }
 0x12b   : > { %v803_v50 = vpop.permute.xlu0 %802  ;;  %1210 = vrot.lane.b32.xlu1 %v2568_v15, %s2002_s26  ;;  %v1280_v15 = vld [vmem:[%s3116_s2] sm:$0xff]  ;;  %s1902_s2 = sshll.u32 %s2005_s1, 4  ;;  %s1903_s2 = int_to_ptr.vmem [resolvable:$false] %s1902_s2 }
 0x12c   : > { %805 = vst.msk [vmem:[#allocation2 + $0x28] sm:$0xf] %vm589_vm11, %v803_v50  ;;  %s1904_s29 = scalar_lea.vmem %s1903_s2, 1024  ;;  %p1905_p2 = scmp.lt.s32.totalorder %s1500_s9, %s1903_s2 }
 0x12d   : > { %1206 = vrot.lane.b32.xlu0 %v2646_v52, %s2001_s17  ;;  %v864_v13 = vpop.permute.xlu1 %863  ;;  %p1906_p4 = scmp.lt.s32.totalorder %s1904_s29, %s1898_s0 }
 0x12e   : > { %866 = vst.msk [vmem:[#allocation2 + $0x50] sm:$0xf0] %vm416_vm7, %v864_v13 }
 0x12f   : > { %v860_v22 = vpop.permute.xlu0 %859  ;;  %1004 = vrot.lane.b32.xlu1 %v2589_v14, %s2002_s26  ;;  %p1907_p5 = por %p1906_p4, %p1905_p2 }
 0x130   : > { %862 = vst.msk [vmem:[#allocation2 + $0x50] sm:$0xf] %vm401_vm6, %v860_v22 }
 0x131   : > { %1000 = vrot.lane.b32.xlu0 %v2486_v23, %s2001_s17  ;;  %v993_v6 = vpop.permute.xlu1 %992  ;;  %s1495_s17 = sadd.s32 %s1808_s16, %s1807_s15  ;;  %p1908_p6 = pnand %p1907_p5, %p1901_p1 }
 0x132   : > { %995 = vst.msk [vmem:[#allocation2 + $0x70] sm:$0xf0] %vm539_vm13, %v993_v6  ;;  %s1809_s26 = sshll.u32 %s1495_s17, 7 }
 0x133   : > { %v982_v52 = vpop.permute.xlu0 %981  ;;  %v1265_v17 = vld [vmem:[#allocation2 + $0x28] sm:$0xff]  ;;  %s1497_s8 = scalar_lea.hbm %s3081_s3, %s1809_s26 }
 0x134   : > { %984 = vst.msk [vmem:[#allocation2 + $0x70] sm:$0xf] %vm534_vm9, %v982_v52  ;;  %1331 = vmatprep.subr.mxu0 %v1265_v17 }
 0x135   : > { %v1121_v60 = vpop.permute.xlu1 %1120  ;;  %1283 = vperm.xlu0 %1897, %v1280_v15  }
 0x136   : > { %1123 = vst.msk [vmem:[#allocation2 + $0x58] sm:$0xf0] %vm484_vm10, %v1121_v60 }
 0x137   : > { %v1117_v14 = vpop.permute.xlu0 %1116 }
 0x138   : > { %1119 = vst.msk [vmem:[#allocation2 + $0x58] sm:$0xf] %vm479_vm8, %v1117_v14 }
 0x139   : > { %v1252_v23 = vpop.permute.xlu1 %1251 }
 0x13a   : > { %1254 = vst.msk [vmem:[#allocation2 + $0x78] sm:$0xf0] %vm594_vm14, %v1252_v23 }
 0x13b   : > { %v1241_v28 = vpop.permute.xlu0 %1240 }
 0x13c   : > { %1243 = vst.msk [vmem:[#allocation2 + $0x78] sm:$0xf] %vm589_vm11, %v1241_v28 }
 0x13d   : > { %v482_v56 = vpop.permute.xlu1 %481 }
 0x13e   : > { %485 = vst.msk [vmem:[#allocation2] sm:$0xf0] %vm484_vm10, %v482_v56 }
 0x13f   : > { %v477_v25 = vpop.permute.xlu0 %476 }
 0x140   : > { %480 = vst.msk [vmem:[#allocation2] sm:$0xf] %vm479_vm8, %v477_v25 }
 0x141   : > { %v601_v39 = vpop.permute.xlu1 %600 }
 0x142   : > { %603 = vst.msk [vmem:[#allocation2 + $0x20] sm:$0xf0] %vm594_vm14, %v601_v39 }
 0x143   : > { %v597_v47 = vpop.permute.xlu0 %596  ;;  %v1275_v44 = vld [vmem:[#allocation2 + $0x78] sm:$0xff] }
 0x144   : > { %599 = vst.msk [vmem:[#allocation2 + $0x20] sm:$0xf] %vm589_vm11, %v597_v47  ;;  %1398 = vmatprep.subr.mxu1 %v1275_v44 }
 0x145   : > { %v746_v53 = vpop.permute.xlu1 %745 }
 0x146   : > { %748 = vst.msk [vmem:[#allocation2 + $0x8] sm:$0xf0] %vm539_vm13, %v746_v53 }
 0x147   : > { %v742_v19 = vpop.permute.xlu0 %741 }
 0x148   : > { %744 = vst.msk [vmem:[#allocation2 + $0x8] sm:$0xf] %vm534_vm9, %v742_v19 }
 0x149   : > { %v915_v8 = vpop.permute.xlu1 %914 }
 0x14a   : > { %917 = vst.msk [vmem:[#allocation2 + $0x50] sm:$0xf0] %vm484_vm10, %v915_v8 }
 0x14b   : > { %v911_v33 = vpop.permute.xlu0 %910  ;;  %v1264_v49 = vld [vmem:[#allocation2 + $0x20] sm:$0xff] }
 0x14c   : > { %913 = vst.msk [vmem:[#allocation2 + $0x50] sm:$0xf] %vm479_vm8, %v911_v33  ;;  %1332 = vmatpush1.msra.mxu0 %v1264_v49 }
 0x14d   : > { %v1046_v11 = vpop.permute.xlu1 %1045 }
 0x14e   : > { %1048 = vst.msk [vmem:[#allocation2 + $0x70] sm:$0xf0] %vm594_vm14, %v1046_v11 }
 0x14f   : > { %v1035_v9 = vpop.permute.xlu0 %1034 }
 0x150   : > { %1037 = vst.msk [vmem:[#allocation2 + $0x70] sm:$0xf] %vm589_vm11, %v1035_v9 }
 0x151   : > { %v1170_v27 = vpop.permute.xlu1 %1169 }
 0x152   : > { %1172 = vst.msk [vmem:[#allocation2 + $0x58] sm:$0xf] %vm534_vm9, %v1170_v27 }
 0x153   : > { %v1060_v46 = vpop.permute.xlu0 %1059 }
 0x154   : > { %1062 = vst.msk [vmem:[#allocation2 + $0x38] sm:$0xf] %vm401_vm6, %v1060_v46 }
 0x155   : > { %v532_v57 = vpop.permute.xlu1 %531 }
 0x156   : > { %535 = vst.msk [vmem:[#allocation2] sm:$0xf] %vm534_vm9, %v532_v57 }
 0x157   : > { %v1174_v0 = vpop.permute.xlu0 %1173  ;;  %v1274_v32 = vld [vmem:[#allocation2 + $0x70] sm:$0xff] }
 0x158   : > { %1176 = vst.msk [vmem:[#allocation2 + $0x58] sm:$0xf0] %vm539_vm13, %v1174_v0  ;;  %1399 = vmatpush1.msra.mxu1 %v1274_v32 }
 0x159   : > { %v795_v21 = vpop.permute.xlu1 %794 }
 0x15a   : > { %797 = vst.msk [vmem:[#allocation2 + $0x8] sm:$0xf] %vm589_vm11, %v795_v21 }
 0x15b   : > { %v537_v26 = vpop.permute.xlu0 %536 }
 0x15c   : > { %540 = vst.msk [vmem:[#allocation2] sm:$0xf0] %vm539_vm13, %v537_v26 }
 0x15d   : > { %v854_v18 = vpop.permute.xlu1 %853 }
 0x15e   : > { %856 = vst.msk [vmem:[#allocation2 + $0x30] sm:$0xf] %vm401_vm6, %v854_v18 }
 0x15f   : > { %v799_v34 = vpop.permute.xlu0 %798 }
 0x160   : > { %801 = vst.msk [vmem:[#allocation2 + $0x8] sm:$0xf0] %vm594_vm14, %v799_v34 }
 0x161   : > { %v968_v62 = vpop.permute.xlu1 %967 }
 0x162   : > { %970 = vst.msk [vmem:[#allocation2 + $0x50] sm:$0xf0] %vm539_vm13, %v968_v62 }
 0x163   : > { %v964_v61 = vpop.permute.xlu0 %963 }
 0x164   : > { %966 = vst.msk [vmem:[#allocation2 + $0x50] sm:$0xf] %vm534_vm9, %v964_v61 }
 0x165   : > { %v1113_v36 = vpop.permute.xlu1 %1112 }
 0x166   : > { %1115 = vst.msk [vmem:[#allocation2 + $0x38] sm:$0xf0] %vm484_vm10, %v1113_v36 }
 0x167   : > { %v1109_v20 = vpop.permute.xlu0 %1108  ;;  %v1261_v31 = vld [vmem:[#allocation2 + $0x8] sm:$0xff] }
 0x168   : > { %1111 = vst.msk [vmem:[#allocation2 + $0x38] sm:$0xf] %vm479_vm8, %v1109_v20  ;;  %1333 = vmatprep.subr.mxu0 %v1261_v31 }
 0x169   : > { %v1227_v42 = vpop.permute.xlu1 %1226 }
 0x16a   : > { %1229 = vst.msk [vmem:[#allocation2 + $0x58] sm:$0xf0] %vm594_vm14, %v1227_v42 }
 0x16b   : > { %v1223_v41 = vpop.permute.xlu0 %1222 }
 0x16c   : > { %1225 = vst.msk [vmem:[#allocation2 + $0x58] sm:$0xf] %vm589_vm11, %v1223_v41 }
 0x16d   : > { %v592_v37 = vpop.permute.xlu1 %591 }
 0x16e   : > { %595 = vst.msk [vmem:[#allocation2] sm:$0xf0] %vm594_vm14, %v592_v37 }
 0x16f   : > { %v587_v45 = vpop.permute.xlu0 %586 }
 0x170   : > { %590 = vst.msk [vmem:[#allocation2] sm:$0xf] %vm589_vm11, %v587_v45 }
 0x171   : > { %v907_v40 = vpop.permute.xlu1 %906 }
 0x172   : > { %909 = vst.msk [vmem:[#allocation2 + $0x30] sm:$0xf0] %vm484_vm10, %v907_v40 }
 0x173   : > { %v903_v12 = vpop.permute.xlu0 %902  ;;  %v1271_v1 = vld [vmem:[#allocation2 + $0x58] sm:$0xff] }
 0x174   : > { %905 = vst.msk [vmem:[#allocation2 + $0x30] sm:$0xf] %vm479_vm8, %v903_v12  ;;  %1400 = vmatprep.subr.mxu1 %v1271_v1 }
 0x175   : > { %v1021_v35 = vpop.permute.xlu1 %1020 }
 0x176   : > { %1023 = vst.msk [vmem:[#allocation2 + $0x50] sm:$0xf0] %vm594_vm14, %v1021_v35 }
 0x177   : > { %v1017_v43 = vpop.permute.xlu0 %1016  ;;  %v1260_v16 = vld [vmem:[#allocation2] sm:$0xff] }
 0x178   : > { %1019 = vst.msk [vmem:[#allocation2 + $0x50] sm:$0xf] %vm589_vm11, %v1017_v43  ;;  %1334 = vmatpush1.msra.mxu0 %v1260_v16 }
 0x179   : > { %v1162_v30 = vpop.permute.xlu1 %1161  ;;  %1802 = vmatmul.mubr.msk.f32.vlgmr.msra.gmra.mxu0 %vm1286_vm15, %v1259_v58 }
 0x17a   : > { %1164 = vst.msk [vmem:[#allocation2 + $0x38] sm:$0xf] %vm534_vm9, %v1162_v30 }
 0x17b   : > { %v1056_v48 = vpop.permute.xlu0 %1055 }
 0x17c   : > { %1058 = vst.msk [vmem:[#allocation2 + $0x18] sm:$0xf0] %vm416_vm7, %v1056_v48 }
 0x17d   : > { %v850_v38 = vpop.permute.xlu1 %849 }
 0x17e   : > { %852 = vst.msk [vmem:[#allocation2 + $0x10] sm:$0xf0] %vm416_vm7, %v850_v38 }
 0x17f   : > { %v1166_v5 = vpop.permute.xlu0 %1165  ;;  %v1270_v59 = vld [vmem:[#allocation2 + $0x50] sm:$0xff] }
 0x180   : > { %1168 = vst.msk [vmem:[#allocation2 + $0x38] sm:$0xf0] %vm539_vm13, %v1166_v5  ;;  %1401 = vmatpush1.msra.mxu1 %v1270_v59 }
 0x181   : > { %v960_v2 = vpop.permute.xlu1 %959 }
 0x182   : > { %962 = vst.msk [vmem:[#allocation2 + $0x30] sm:$0xf0] %vm539_vm13, %v960_v2 }
 0x183   : > { %v956_v7 = vpop.permute.xlu0 %955 }
 0x184   : > { %958 = vst.msk [vmem:[#allocation2 + $0x30] sm:$0xf] %vm534_vm9, %v956_v7 }
 0x185   : > { %v1105_v29 = vpop.permute.xlu1 %1104 }
 0x186   : > { %1107 = vst.msk [vmem:[#allocation2 + $0x18] sm:$0xf0] %vm484_vm10, %v1105_v29 }
 0x187   : > { %v1101_v54 = vpop.permute.xlu0 %1100 }
 0x188   : > { %1103 = vst.msk [vmem:[#allocation2 + $0x18] sm:$0xf] %vm479_vm8, %v1101_v54 }
 0x189   : > { %v1219_v63 = vpop.permute.xlu1 %1218 }
 0x18a   : > { %1221 = vst.msk [vmem:[#allocation2 + $0x38] sm:$0xf0] %vm594_vm14, %v1219_v63 }
 0x18b   : > { %v1215_v51 = vpop.permute.xlu0 %1214 }
 0x18c   : > { %1217 = vst.msk [vmem:[#allocation2 + $0x38] sm:$0xf] %vm589_vm11, %v1215_v51 }
 0x18d   : > { %v899_v10 = vpop.permute.xlu1 %898 }
 0x18e   : > { %901 = vst.msk [vmem:[#allocation2 + $0x10] sm:$0xf0] %vm484_vm10, %v899_v10 }
 0x18f   : > { %v895_v24 = vpop.permute.xlu0 %894 }
 0x190   : > { %897 = vst.msk [vmem:[#allocation2 + $0x10] sm:$0xf] %vm479_vm8, %v895_v24 }
 0x191   : > { %v1013_v3 = vpop.permute.xlu1 %1012 }
 0x192   : > { %1015 = vst.msk [vmem:[#allocation2 + $0x30] sm:$0xf0] %vm594_vm14, %v1013_v3 }
 0x193   : > { %v1009_v4 = vpop.permute.xlu0 %1008  ;;  %v1267_v50 = vld [vmem:[#allocation2 + $0x38] sm:$0xff] }
 0x194   : > { %1011 = vst.msk [vmem:[#allocation2 + $0x30] sm:$0xf] %vm589_vm11, %v1009_v4  ;;  %1402 = vmatprep.subr.mxu1 %v1267_v50 }
 0x195   : > { %v1158_v13 = vpop.permute.xlu1 %1157 }
 0x196   : > { %1160 = vst.msk [vmem:[#allocation2 + $0x18] sm:$0xf0] %vm539_vm13, %v1158_v13 }
 0x197   : > { %v1154_v55 = vpop.permute.xlu0 %1153 }
 0x198   : > { %1156 = vst.msk [vmem:[#allocation2 + $0x18] sm:$0xf] %vm534_vm9, %v1154_v55 }
 0x199   : > { %v952_v22 = vpop.permute.xlu1 %951 }
 0x19a   : > { %954 = vst.msk [vmem:[#allocation2 + $0x10] sm:$0xf0] %vm539_vm13, %v952_v22 }
 0x19b   : > { %v948_v6 = vpop.permute.xlu0 %947  ;;  %v1266_v15 = vld [vmem:[#allocation2 + $0x30] sm:$0xff] }
 0x19c   : > { %950 = vst.msk [vmem:[#allocation2 + $0x10] sm:$0xf] %vm534_vm9, %v948_v6  ;;  %1403 = vmatpush1.msra.mxu1 %v1266_v15 }
 0x19d   : > { %v1211_v52 = vpop.permute.xlu1 %1210 }
 0x19e   : > { %1213 = vst.msk [vmem:[#allocation2 + $0x18] sm:$0xf0] %vm594_vm14, %v1211_v52 }
 0x19f   : > { %v1207_v17 = vpop.permute.xlu0 %1206 }
 0x1a0   : > { %1209 = vst.msk [vmem:[#allocation2 + $0x18] sm:$0xf] %vm589_vm11, %v1207_v17 }
 0x1a1   : > { %v1005_v60 = vpop.permute.xlu1 %1004 }
 0x1a2   : > { %1007 = vst.msk [vmem:[#allocation2 + $0x10] sm:$0xf0] %vm594_vm14, %v1005_v60 }
 0x1a3   : > { %v1001_v14 = vpop.permute.xlu0 %1000 }
 0x1a4   : > { %1003 = vst.msk [vmem:[#allocation2 + $0x10] sm:$0xf] %vm589_vm11, %v1001_v14 }
 0x1a7   : > { %v1263_v23 = vld [vmem:[#allocation2 + $0x18] sm:$0xff] }
 0x1a8   : > { %1404 = vmatprep.subr.mxu1 %v1263_v23 }
 0x1ab   : > { %v1262_v28 = vld [vmem:[#allocation2 + $0x10] sm:$0xff] }
 0x1ac   : > { %1405 = vmatpush1.msra.mxu1 %v1262_v28 }
 0x1ad   : > { %1805 = vmatmul.mubr.msk.f32.vlgmr.msra.gmra.mxu1 %vm1286_vm15, %v1259_v58 }
 0x1b0   : > { %v1284_v56 = vpop.permute.xlu0 %1283 }
 0x239   : > { %v1369_v25 = vpop.f32.mrf.mxu0 }
 0x23a   : > { %v1370_v39 = vadd.f32 %v1369_v25, %v1284_v56 }
 0x23b   : > { %v1371_v47 = vpop.f32.mrf.mxu0 }
 0x23c   : > { %1445 = vst [vmem:[%s236_s14] sm:$0xff] %v1370_v39  ;;  %v1372_v44 = vadd.f32 %v1371_v47, %v1284_v56  ;;  %v1456_v53 = vmul.f32 %v1370_v39, %v1370_v39 }
 0x23e   : > { %1446 = vst [vmem:[%s236_s14 + $0x8] sm:$0xff] %v1372_v44  ;;  %v1457_v19 = vmul.f32 %v1372_v44, %v1372_v44  ;;  %v1449_v33 = vadd.f32 %v1372_v44, %v1370_v39 }
 0x240   : > { %v1460_v9 = vadd.f32 %v1457_v19, %v1456_v53 }
 0x26d   : > { %v1440_v8 = vpop.f32.mrf.mxu1 }
 0x26e   : > { %v1441_v49 = vadd.f32 %v1440_v8, %v1284_v56 }
 0x26f   : > { %v1442_v11 = vpop.f32.mrf.mxu1 }
 0x270   : > { %1447 = vst [vmem:[%s236_s14 + $0x10] sm:$0xff] %v1441_v49  ;;  %v1450_v27 = vadd.f32 %v1449_v33, %v1441_v49  ;;  %v1458_v46 = vmul.f32 %v1441_v49, %v1441_v49  ;;  %v1443_v57 = vadd.f32 %v1442_v11, %v1284_v56 }
 0x272   : > { %1448 = vst [vmem:[%s236_s14 + $0x18] sm:$0xff] %v1443_v57  ;;  %v1459_v0 = vmul.f32 %v1443_v57, %v1443_v57  ;;  %v1451_v32 = vadd.f32 %v1450_v27, %v1443_v57  ;;  %v1461_v21 = vadd.f32 %v1460_v9, %v1458_v46 }
 0x274   : > { %1452 = vadd.xlane.f32.xlu1 %v1451_v32  ;;  %v1462_v26 = vadd.f32 %v1461_v21, %v1459_v0 }
 0x276   : > { %1463 = vadd.xlane.f32.xlu0 %v1462_v26 }
 0x277   : > { %1911 = shalt.err (!%p1908_p6)
}
 0x278   : > { %s1912_s22 = scalar_lea.hbm %s1497_s8, 512  ;;  %s1916_s15 = scalar_lea.hbm %s3081_s3, 2048 }
 0x279   : > { %p1913_p7 = scmp.ne.s32.totalorder %s1497_s8, %s1912_s22  ;;  %p1917_p11 = scmp.lt.s32.totalorder %s1497_s8, %s3081_s3 }
 0x27a   : > { %p1918_p12 = scmp.lt.s32.totalorder %s1916_s15, %s1912_s22 }
 0x27b   : > { %p1914_p9 = pnand %p1913_p7, %p2087_p3 }
 0x27c   : > { %p1919_p13 = por %p1918_p12, %p1917_p11 }
 0x27d   : > { %p1915_p10 = pneg %p1914_p9 }
 0x27f   : > { %p1920_p0 = pnand %p1919_p13, %p1915_p10 }
 0x281   : > { %1923 = shalt.err (!%p1920_p0)
}
 0x282   : > { %1813 = dma.vmem_to_hbm [thread:$0]  (%p2087_p3), %s1500_s9, 512, %s1497_s8, %s1467_s13   ;;  %vm1454_vm0 = vcmask 7168  }
 0x283   : > { %p265_p1 = scmp.lt.s32.totalorder %s1974_s21, 1  ;;  %s1710_s0 = sshll.u32 %s2109_s12, 1 }
 0x285   : > { %s3133_s21 = smov (!%p265_p1, %s1974_s21), 1 }
 0x286   : > { %s268_s1 = sadd.s32 %s1710_s0, %s3133_s21 }
 0x287   : > { %s1711_s2 = sshll.u32 %s268_s1, 3 }
 0x288   : > { %s270_s27 = scalar_lea.vmem %s3082_s4, %s1711_s2  ;;  %s278_s10 = scalar_lea.vmem %s3083_s5, %s1711_s2 }
 0x2fd   : > { %v1453_v18 = vpop.xlane.xlu1 %1452 }
 0x2fe   : > { %1455 = vst.msk [vmem:[%s270_s27] sm:$0xff] %vm1454_vm0, %v1453_v18 }
 0x2ff   : > { %v1464_v34 = vpop.xlane.xlu0 %1463 }
 0x300   : > { %1465 = vst.msk [vmem:[%s278_s10] sm:$0xff] %vm1454_vm0, %v1464_v34 }
 0x301 PF: > { %p1819_p3 = scmp.ge.s32.totalorder %s1990_s25, 2  ;;  %s1517_s21 = sand.u32 1, %s1962_s18  }
 0x302   : > { %s1518_s6 = scalar_lea.sflag [#allocation4], %s1517_s21 }
 0x303   : > { %p1816_p2 = pnand %p1819_p3, %p2096_p8 }
 0x305   : > { %p1817_p4 = pneg %p1816_p2 }
 0x307   : > { %1957 = dma.done.wait (%p1817_p4), %s1518_s6, 512  }
 0x308   : > { %1959 = vsyncadd (%p1817_p4), %s1518_s6, 4294966784  ;;  %s19_s25 = sadd.s32 1, %s1990_s25   ;;  %s3118_s12 = sld [smem:[#allocation6_spill]] }
 0x309   : > { %p16_p5 = scmp.ge.s32.totalorder %s19_s25, 6   ;;  %s3119_s18 = smov %s1966_s19 }
 0x30a   : > { %s3120_s19 = smov %s1970_s20  ;;  %s3121_s20 = smov %s2105_s11 }
 0x30b   : > { %s3122_s21 = smov %s1982_s23  ;;  %s3123_s22 = smov %s1986_s24 }
 0x30c   : > { %s3124_s23 = smov %s3127_s28  ;;  %18 = sbr.rel (!%p16_p5) target bundleno = 9 (0x9), region = 109 }
 0x30e   : > { %s3125_s24 = smov %s3118_s12 }
 0x311   :  { %1545 = vsyncpa [#allocation4], 1 }
 0x312   :  { %1547 = vsyncpa [#allocation4 + $0x1], 1 }

</bundles_post_ra>
